<compile_context>
chip_gen: v6e
topology: v6e:2x2x1
jax: 0.10.0
libtpu: 0.0.40
codegen_flags: <defaults>
</compile_context>

<pallas_src>
import math

import jax
import jax.numpy as jnp
from jax.experimental import pallas as pl
from jax.experimental.pallas import tpu as pltpu

# ---------------- RatSpnConfig (synthetic, deterministic) ----------------
F = 16   # in_features
D = 3    # tree depth
S = 3    # sum nodes per layer
I = 2    # leaf distributions per scope
R = 2    # repetitions
C = 5    # number of root heads / classes
CARD = math.ceil(F / 2 ** D)          # leaf product cardinality
assert F == CARD * 2 ** D             # no feature padding needed for this config
# TODO(synk): leaf feature padding (F not a multiple of 2**D) not implemented.

BSUB = 8                              # batch sublanes per tile
LANE = 128                            # batch lanes per tile
BN = BSUB * LANE                      # batch tile (1024 elements per grid step)
_LOG_SQRT_2PI = 0.5 * math.log(2.0 * math.pi)


def _build_plan():
    """Static layer plan mirroring RatSpn._build()."""
    plan = []
    sum_shapes = []
    plan.append(("prod",))                       # CrossProduct(2^D, I)
    ch = I * I
    for i in range(D - 1, 0, -1):
        feat = 2 ** i
        sum_shapes.append((feat, ch, S, R))      # Sum(feat, ch -> S)
        plan.append(("sum", len(sum_shapes) - 1))
        plan.append(("prod",))                   # CrossProduct(feat, S)
        ch = S * S
    root_in_channels = R * ch
    return plan, sum_shapes, ch, root_in_channels


PLAN, SUM_W_SHAPES, LAST_CH, ROOT_IC = _build_plan()


# ---------------- the fused Pallas kernel ----------------
def ratspn_kernel(x_ref, mu_ref, isig_ref, bias_ref, *refs):
    num_sums = len(SUM_W_SHAPES)
    sw_refs = refs[:num_sums]          # softmax(weights) over in_channels
    swr_ref = refs[num_sums]           # softmax(root weights) over (ch, rep)
    out_ref = refs[num_sums + 1]

    # (F*R, BSUB, LANE) -> (F, R, BSUB, LANE)  (leading-axis split, free)
    x = x_ref[...].reshape(F, R, BSUB, LANE)
    mu = mu_ref[...]                   # (F, I, R)
    isig = isig_ref[...]               # (F, I, R)  = 1 / sigma (precomputed)
    bias = bias_ref[...]               # (F, I, R)  = -(log sigma + 0.5 log 2pi)

    # --- leaf: independent Normal log-densities --------------------------
    xb = x[:, None]                                          # (F, 1, R, BSUB, LANE)
    z = (xb - mu[..., None, None]) * isig[..., None, None]   # (F, I, R, BSUB, LANE)
    lp = -0.5 * z * z + bias[..., None, None]

    # --- product over scopes of size CARD (sum of log-probs) -------------
    h = lp.reshape(2 ** D, CARD, I, R, BSUB, LANE).sum(axis=1)   # (2^D, I, R, BSUB, LANE)

    # --- inner CrossProduct / Sum layers ----------------------------------
    for layer in PLAN:
        if layer[0] == "prod":
            d, c = h.shape[0], h.shape[1]
            hr = h.reshape(d // 2, 2, c, R, BSUB, LANE)
            left = hr[:, 0]                                  # (d/2, c, R, BSUB, LANE)
            right = hr[:, 1]
            # flat output channel = i_left * c + j_right
            h = (left[:, :, None] + right[:, None, :]).reshape(d // 2, c * c, R, BSUB, LANE)
        else:
            sw = sw_refs[layer[1]][...]                      # (d, ic, oc, R), rows sum to 1
            oc = sw.shape[2]
            m = jnp.max(h, axis=1, keepdims=True)            # (d, 1, R, BSUB, LANE)
            e = jnp.exp(h - m)                               # (d, ic, R, BSUB, LANE)
            cols = []
            for o in range(oc):                              # unrolled; avoids (d,ic,oc,...) blowup
                w_o = sw[:, :, o, :]                         # (d, ic, R)
                acc = jnp.sum(w_o[..., None, None] * e, axis=1)   # (d, R, BSUB, LANE)
                cols.append(acc)
            h = m + jnp.log(jnp.stack(cols, axis=1))         # (d, oc, R, BSUB, LANE)

    # --- root Sum over (channels x repetitions) ---------------------------
    swr = swr_ref[...]                                       # (LAST_CH, R, C)
    hr = h[0]                                                # (LAST_CH, R, BSUB, LANE)
    m = jnp.max(hr, axis=(0, 1))                             # (BSUB, LANE)
    e = jnp.exp(hr - m[None, None])                          # (LAST_CH, R, BSUB, LANE)
    outs = []
    for c in range(C):                                       # unrolled over C heads
        acc = jnp.sum(swr[:, :, c][..., None, None] * e, axis=(0, 1))   # (BSUB, LANE)
        outs.append(m + jnp.log(acc))
    out_ref[...] = jnp.stack(outs, axis=0)                   # (C, BSUB, LANE)


# ---------------- wrapper (glue) ----------------
def ratspn_forward(x, params):
    """x: (N, F) float32 -> (N, C) conditional log-likelihoods P(X | C)."""
    n = x.shape[0]
    # _randomize: per-repetition feature permutation (gather; plain JAX glue)
    xp = x[:, params["rand_indices"]]                    # (N, F, R)
    xk = jnp.transpose(xp, (1, 2, 0)).reshape(F * R, n)  # (F*R, N) sublane-dense layout
    n_pad = pl.cdiv(n, BN) * BN
    if n_pad != n:
        xk = jnp.pad(xk, ((0, 0), (0, n_pad - n)))
    n_sub = n_pad // LANE
    xk = xk.reshape(F * R, n_sub, LANE)                  # batch on (sublane, lane)
    grid = (n_sub // BSUB,)

    # --- parameter-side precompute (grid-invariant, done once per call) ---
    inv_sigma = 1.0 / params["leaf_sigma"]                               # (F, I, R)
    bias = -(jnp.log(params["leaf_sigma"]) + _LOG_SQRT_2PI)              # (F, I, R)
    sum_sw = [jax.nn.softmax(w, axis=1) for w in params["sum_weights"]]  # softmax over ic
    root_sw = jax.nn.softmax(params["root_w"][0, :, :, 0], axis=0)       # (ROOT_IC, C)
    root_sw = root_sw.reshape(LAST_CH, R, C)             # flat channel = c_idx * R + r_idx

    in_specs = [
        pl.BlockSpec((F * R, BSUB, LANE), lambda b: (0, b, 0)),    # permuted inputs
        pl.BlockSpec((F, I, R), lambda b: (0, 0, 0)),              # leaf means
        pl.BlockSpec((F, I, R), lambda b: (0, 0, 0)),              # leaf 1/sigma
        pl.BlockSpec((F, I, R), lambda b: (0, 0, 0)),              # leaf bias
    ]
    for shp in SUM_W_SHAPES:
        in_specs.append(pl.BlockSpec(shp, lambda b: (0, 0, 0, 0)))
    in_specs.append(pl.BlockSpec((LAST_CH, R, C), lambda b: (0, 0, 0)))  # root weights

    out = pl.pallas_call(
        ratspn_kernel,
        out_shape=jax.ShapeDtypeStruct((C, n_sub, LANE), jnp.float32),
        grid=grid,
        in_specs=in_specs,
        out_specs=pl.BlockSpec((C, BSUB, LANE), lambda b: (0, b, 0)),
        compiler_params=pltpu.CompilerParams(dimension_semantics=("parallel",)),
    )(xk, params["leaf_mu"], inv_sigma, bias, *sum_sw, root_sw)

    out = out.reshape(C, n_pad)
    return jnp.transpose(out[:, :n])                     # (N, C)


# ---------------- deterministic parameter init (synthetic) ----------------
def init_params(key):
    n_keys = 4 + len(SUM_W_SHAPES)
    ks = jax.random.split(key, n_keys)
    # random per-repetition permutations (RatSpn.rand_indices)
    rand_indices = jnp.stack(
        [jax.random.permutation(jax.random.fold_in(ks[0], r), F) for r in range(R)],
        axis=1).astype(jnp.int32)                                  # (F, R)
    # RatNormal leaf parameters (means ~ randn, sigma via sigmoid squashing)
    leaf_mu = jax.random.normal(ks[1], (F, I, R), jnp.float32)
    raw_std = jax.random.uniform(ks[2], (F, I, R), jnp.float32)
    leaf_sigma = 0.1 + 0.9 * jax.nn.sigmoid(raw_std)               # min_sigma=0.1, max_sigma=1.0
    # Sum weights ~ truncated_normal_(std=0.5) (approximated with normal*0.5)
    sum_weights = [0.5 * jax.random.normal(jax.random.fold_in(ks[3], i), shp, jnp.float32)
                   for i, shp in enumerate(SUM_W_SHAPES)]
    root_w = 0.5 * jax.random.normal(jax.random.fold_in(ks[3], 1000),
                                     (1, ROOT_IC, C, 1), jnp.float32)
    return dict(rand_indices=rand_indices, leaf_mu=leaf_mu, leaf_sigma=leaf_sigma,
                sum_weights=sum_weights, root_w=root_w)


# ---------------- pure-JAX reference (PyTorch [n, d, c, r] layout) ----------------
def ratspn_reference(x, params):
    from jax.scipy.special import logsumexp
    n = x.shape[0]
    xp = x[:, params["rand_indices"]]                              # (N, F, R)
    mu = params["leaf_mu"][None]
    sig = params["leaf_sigma"][None]
    lp = -0.5 * ((xp[:, :, None, :] - mu) / sig) ** 2 - jnp.log(sig) - _LOG_SQRT_2PI
    h = lp.reshape(n, 2 ** D, CARD, I, R).sum(axis=2)              # (N, 2^D, I, R)
    for layer in PLAN:
        if layer[0] == "prod":
            _, d, c, r = h.shape
            left, right = h[:, 0::2], h[:, 1::2]
            h = (left[:, :, :, None, :] + right[:, :, None, :, :]).reshape(n, d // 2, c * c, r)
        else:
            w = params["sum_weights"][layer[1]]
            logw = jax.nn.log_softmax(w, axis=1)
            h = logsumexp(h[:, :, :, None, :] + logw[None], axis=2)
    _, d, c, r = h.shape
    h = h.reshape(n, 1, c * r, 1)
    logwr = jax.nn.log_softmax(params["root_w"], axis=1)
    out = logsumexp(h[:, :, :, None, :] + logwr[None], axis=2)     # (N, 1, C, 1)
    return out[:, 0, :, 0]


if __name__ == "__main__":
    key = jax.random.PRNGKey(0)
    pkey, xkey = jax.random.split(key)
    params = init_params(pkey)

    N = 2048                                      # 2 grid steps of 1024 (keeps both v7x TCs busy)
    x = jax.random.normal(xkey, (N, F), jnp.float32)

    y = ratspn_forward(x, params)
    y = jax.block_until_ready(y)

    y_ref = ratspn_reference(x, params)
    assert y.shape == (N, C), y.shape
    assert bool(jnp.all(jnp.isfinite(y)))
    max_err = float(jnp.max(jnp.abs(y - y_ref)))
    assert max_err < 1e-3, f"mismatch vs reference: {max_err}"
    print("KERNEL_OK")
</pallas_src>

<mosaic_0001>
module attributes {stable_mosaic.version = 11 : i64} {
  func.func @ratspn_kernel(%arg0: i32, %arg1: memref<32x8x128xf32, #tpu.memory_space<vmem>>, %arg2: memref<16x2x2xf32, #tpu.memory_space<vmem>>, %arg3: memref<16x2x2xf32, #tpu.memory_space<vmem>>, %arg4: memref<16x2x2xf32, #tpu.memory_space<vmem>>, %arg5: memref<4x4x3x2xf32, #tpu.memory_space<vmem>>, %arg6: memref<2x9x3x2xf32, #tpu.memory_space<vmem>>, %arg7: memref<9x2x5xf32, #tpu.memory_space<vmem>>, %arg8: memref<5x8x128xf32, #tpu.memory_space<vmem>>) attributes {dimension_semantics = [#tpu.dimension_semantics<parallel>], iteration_bounds = array<i64: 2>, scalar_prefetch = 0 : i64, scratch_operands = 0 : i64, tpu.core_type = #tpu.core_type<tc>, window_params = [{transform_indices = @transform_0, window_bounds = array<i64: 32, 8, 128>}, {pipeline_mode = #tpu.pipeline_mode<synchronous>, transform_indices = @transform_1, window_bounds = array<i64: 16, 2, 2>}, {pipeline_mode = #tpu.pipeline_mode<synchronous>, transform_indices = @transform_2, window_bounds = array<i64: 16, 2, 2>}, {pipeline_mode = #tpu.pipeline_mode<synchronous>, transform_indices = @transform_3, window_bounds = array<i64: 16, 2, 2>}, {pipeline_mode = #tpu.pipeline_mode<synchronous>, transform_indices = @transform_4, window_bounds = array<i64: 4, 4, 3, 2>}, {pipeline_mode = #tpu.pipeline_mode<synchronous>, transform_indices = @transform_5, window_bounds = array<i64: 2, 9, 3, 2>}, {pipeline_mode = #tpu.pipeline_mode<synchronous>, transform_indices = @transform_6, window_bounds = array<i64: 9, 2, 5>}, {transform_indices = @transform_7, window_bounds = array<i64: 5, 8, 128>}]} {
    %c0 = arith.constant 0 : index
    %c0_0 = arith.constant 0 : index
    %c0_1 = arith.constant 0 : index
    %0 = vector.load %arg1[%c0, %c0_0, %c0_1] : memref<32x8x128xf32, #tpu.memory_space<vmem>>, vector<32x8x128xf32>
    %1 = vector.shape_cast %0 : vector<32x8x128xf32> to vector<16x2x8x128xf32>
    %c0_2 = arith.constant 0 : index
    %c0_3 = arith.constant 0 : index
    %c0_4 = arith.constant 0 : index
    %2 = vector.load %arg2[%c0_2, %c0_3, %c0_4] : memref<16x2x2xf32, #tpu.memory_space<vmem>>, vector<16x2x2xf32>
    %c0_5 = arith.constant 0 : index
    %c0_6 = arith.constant 0 : index
    %c0_7 = arith.constant 0 : index
    %3 = vector.load %arg3[%c0_5, %c0_6, %c0_7] : memref<16x2x2xf32, #tpu.memory_space<vmem>>, vector<16x2x2xf32>
    %c0_8 = arith.constant 0 : index
    %c0_9 = arith.constant 0 : index
    %c0_10 = arith.constant 0 : index
    %4 = vector.load %arg4[%c0_8, %c0_9, %c0_10] : memref<16x2x2xf32, #tpu.memory_space<vmem>>, vector<16x2x2xf32>
    %5 = vector.shape_cast %1 : vector<16x2x8x128xf32> to vector<16x1x2x8x128xf32>
    %6 = vector.shape_cast %2 : vector<16x2x2xf32> to vector<16x2x2x1x1xf32>
    %7 = vector.broadcast %5 : vector<16x1x2x8x128xf32> to vector<16x2x2x8x128xf32>
    %8 = vector.broadcast %6 : vector<16x2x2x1x1xf32> to vector<16x2x2x8x128xf32>
    %9 = arith.subf %7, %8 : vector<16x2x2x8x128xf32>
    %10 = vector.shape_cast %3 : vector<16x2x2xf32> to vector<16x2x2x1x1xf32>
    %11 = vector.broadcast %10 : vector<16x2x2x1x1xf32> to vector<16x2x2x8x128xf32>
    %12 = arith.mulf %9, %11 : vector<16x2x2x8x128xf32>
    %cst = arith.constant -5.000000e-01 : f32
    %13 = vector.broadcast %cst : f32 to vector<16x2x2x8x128xf32>
    %14 = arith.mulf %13, %12 : vector<16x2x2x8x128xf32>
    %15 = arith.mulf %14, %12 : vector<16x2x2x8x128xf32>
    %16 = vector.shape_cast %4 : vector<16x2x2xf32> to vector<16x2x2x1x1xf32>
    %17 = vector.broadcast %16 : vector<16x2x2x1x1xf32> to vector<16x2x2x8x128xf32>
    %18 = arith.addf %15, %17 : vector<16x2x2x8x128xf32>
    %19 = vector.shape_cast %18 : vector<16x2x2x8x128xf32> to vector<8x2x2x2x8x128xf32>
    %cst_11 = arith.constant dense<0.000000e+00> : vector<8x2x2x8x128xf32>
    %20 = vector.multi_reduction <add>, %19, %cst_11 [1] : vector<8x2x2x2x8x128xf32> to vector<8x2x2x8x128xf32>
    %21 = vector.shape_cast %20 : vector<8x2x2x8x128xf32> to vector<4x2x2x2x8x128xf32>
    %22 = vector.extract_strided_slice %21 {offsets = [0, 0, 0, 0, 0, 0], sizes = [4, 1, 2, 2, 8, 128], strides = [1, 1, 1, 1, 1, 1]} : vector<4x2x2x2x8x128xf32> to vector<4x1x2x2x8x128xf32>
    %23 = vector.shape_cast %22 : vector<4x1x2x2x8x128xf32> to vector<4x2x2x8x128xf32>
    %24 = vector.extract_strided_slice %21 {offsets = [0, 1, 0, 0, 0, 0], sizes = [4, 1, 2, 2, 8, 128], strides = [1, 1, 1, 1, 1, 1]} : vector<4x2x2x2x8x128xf32> to vector<4x1x2x2x8x128xf32>
    %25 = vector.shape_cast %24 : vector<4x1x2x2x8x128xf32> to vector<4x2x2x8x128xf32>
    %26 = vector.shape_cast %23 : vector<4x2x2x8x128xf32> to vector<4x2x1x2x8x128xf32>
    %27 = vector.shape_cast %25 : vector<4x2x2x8x128xf32> to vector<4x1x2x2x8x128xf32>
    %28 = vector.broadcast %26 : vector<4x2x1x2x8x128xf32> to vector<4x2x2x2x8x128xf32>
    %29 = vector.broadcast %27 : vector<4x1x2x2x8x128xf32> to vector<4x2x2x2x8x128xf32>
    %30 = arith.addf %28, %29 : vector<4x2x2x2x8x128xf32>
    %31 = vector.shape_cast %30 : vector<4x2x2x2x8x128xf32> to vector<4x4x2x8x128xf32>
    %c0_12 = arith.constant 0 : index
    %c0_13 = arith.constant 0 : index
    %c0_14 = arith.constant 0 : index
    %c0_15 = arith.constant 0 : index
    %32 = vector.load %arg5[%c0_12, %c0_13, %c0_14, %c0_15] : memref<4x4x3x2xf32, #tpu.memory_space<vmem>>, vector<4x4x3x2xf32>
    %cst_16 = arith.constant dense<0xFF800000> : vector<4x2x8x128xf32>
    %33 = vector.multi_reduction <maximumf>, %31, %cst_16 [1] : vector<4x4x2x8x128xf32> to vector<4x2x8x128xf32>
    %34 = vector.shape_cast %33 : vector<4x2x8x128xf32> to vector<4x1x2x8x128xf32>
    %35 = vector.broadcast %34 : vector<4x1x2x8x128xf32> to vector<4x4x2x8x128xf32>
    %36 = arith.subf %31, %35 : vector<4x4x2x8x128xf32>
    %37 = math.exp %36 : vector<4x4x2x8x128xf32>
    %38 = vector.extract_strided_slice %32 {offsets = [0, 0, 0, 0], sizes = [4, 4, 1, 2], strides = [1, 1, 1, 1]} : vector<4x4x3x2xf32> to vector<4x4x1x2xf32>
    %39 = vector.shape_cast %38 : vector<4x4x1x2xf32> to vector<4x4x2xf32>
    %40 = vector.shape_cast %39 : vector<4x4x2xf32> to vector<4x4x2x1x1xf32>
    %41 = vector.broadcast %40 : vector<4x4x2x1x1xf32> to vector<4x4x2x8x128xf32>
    %42 = arith.mulf %41, %37 : vector<4x4x2x8x128xf32>
    %cst_17 = arith.constant dense<0.000000e+00> : vector<4x2x8x128xf32>
    %43 = vector.multi_reduction <add>, %42, %cst_17 [1] : vector<4x4x2x8x128xf32> to vector<4x2x8x128xf32>
    %44 = vector.extract_strided_slice %32 {offsets = [0, 0, 1, 0], sizes = [4, 4, 1, 2], strides = [1, 1, 1, 1]} : vector<4x4x3x2xf32> to vector<4x4x1x2xf32>
    %45 = vector.shape_cast %44 : vector<4x4x1x2xf32> to vector<4x4x2xf32>
    %46 = vector.shape_cast %45 : vector<4x4x2xf32> to vector<4x4x2x1x1xf32>
    %47 = vector.broadcast %46 : vector<4x4x2x1x1xf32> to vector<4x4x2x8x128xf32>
    %48 = arith.mulf %47, %37 : vector<4x4x2x8x128xf32>
    %cst_18 = arith.constant dense<0.000000e+00> : vector<4x2x8x128xf32>
    %49 = vector.multi_reduction <add>, %48, %cst_18 [1] : vector<4x4x2x8x128xf32> to vector<4x2x8x128xf32>
    %50 = vector.extract_strided_slice %32 {offsets = [0, 0, 2, 0], sizes = [4, 4, 1, 2], strides = [1, 1, 1, 1]} : vector<4x4x3x2xf32> to vector<4x4x1x2xf32>
    %51 = vector.shape_cast %50 : vector<4x4x1x2xf32> to vector<4x4x2xf32>
    %52 = vector.shape_cast %51 : vector<4x4x2xf32> to vector<4x4x2x1x1xf32>
    %53 = vector.broadcast %52 : vector<4x4x2x1x1xf32> to vector<4x4x2x8x128xf32>
    %54 = arith.mulf %53, %37 : vector<4x4x2x8x128xf32>
    %cst_19 = arith.constant dense<0.000000e+00> : vector<4x2x8x128xf32>
    %55 = vector.multi_reduction <add>, %54, %cst_19 [1] : vector<4x4x2x8x128xf32> to vector<4x2x8x128xf32>
    %56 = vector.shape_cast %43 : vector<4x2x8x128xf32> to vector<4x1x2x8x128xf32>
    %57 = vector.shape_cast %49 : vector<4x2x8x128xf32> to vector<4x1x2x8x128xf32>
    %58 = vector.shape_cast %55 : vector<4x2x8x128xf32> to vector<4x1x2x8x128xf32>
    %59 = tpu.concatenate %56, %57, %58 in 1 : vector<4x1x2x8x128xf32>, vector<4x1x2x8x128xf32>, vector<4x1x2x8x128xf32> -> vector<4x3x2x8x128xf32>
    %60 = math.log %59 : vector<4x3x2x8x128xf32>
    %61 = vector.broadcast %34 : vector<4x1x2x8x128xf32> to vector<4x3x2x8x128xf32>
    %62 = arith.addf %61, %60 : vector<4x3x2x8x128xf32>
    %63 = vector.shape_cast %62 : vector<4x3x2x8x128xf32> to vector<2x2x3x2x8x128xf32>
    %64 = vector.extract_strided_slice %63 {offsets = [0, 0, 0, 0, 0, 0], sizes = [2, 1, 3, 2, 8, 128], strides = [1, 1, 1, 1, 1, 1]} : vector<2x2x3x2x8x128xf32> to vector<2x1x3x2x8x128xf32>
    %65 = vector.shape_cast %64 : vector<2x1x3x2x8x128xf32> to vector<2x3x2x8x128xf32>
    %66 = vector.extract_strided_slice %63 {offsets = [0, 1, 0, 0, 0, 0], sizes = [2, 1, 3, 2, 8, 128], strides = [1, 1, 1, 1, 1, 1]} : vector<2x2x3x2x8x128xf32> to vector<2x1x3x2x8x128xf32>
    %67 = vector.shape_cast %66 : vector<2x1x3x2x8x128xf32> to vector<2x3x2x8x128xf32>
    %68 = vector.shape_cast %65 : vector<2x3x2x8x128xf32> to vector<2x3x1x2x8x128xf32>
    %69 = vector.shape_cast %67 : vector<2x3x2x8x128xf32> to vector<2x1x3x2x8x128xf32>
    %70 = vector.broadcast %68 : vector<2x3x1x2x8x128xf32> to vector<2x3x3x2x8x128xf32>
    %71 = vector.broadcast %69 : vector<2x1x3x2x8x128xf32> to vector<2x3x3x2x8x128xf32>
    %72 = arith.addf %70, %71 : vector<2x3x3x2x8x128xf32>
    %73 = vector.shape_cast %72 : vector<2x3x3x2x8x128xf32> to vector<2x9x2x8x128xf32>
    %c0_20 = arith.constant 0 : index
    %c0_21 = arith.constant 0 : index
    %c0_22 = arith.constant 0 : index
    %c0_23 = arith.constant 0 : index
    %74 = vector.load %arg6[%c0_20, %c0_21, %c0_22, %c0_23] : memref<2x9x3x2xf32, #tpu.memory_space<vmem>>, vector<2x9x3x2xf32>
    %cst_24 = arith.constant dense<0xFF800000> : vector<2x2x8x128xf32>
    %75 = vector.multi_reduction <maximumf>, %73, %cst_24 [1] : vector<2x9x2x8x128xf32> to vector<2x2x8x128xf32>
    %76 = vector.shape_cast %75 : vector<2x2x8x128xf32> to vector<2x1x2x8x128xf32>
    %77 = vector.broadcast %76 : vector<2x1x2x8x128xf32> to vector<2x9x2x8x128xf32>
    %78 = arith.subf %73, %77 : vector<2x9x2x8x128xf32>
    %79 = math.exp %78 : vector<2x9x2x8x128xf32>
    %80 = vector.extract_strided_slice %74 {offsets = [0, 0, 0, 0], sizes = [2, 9, 1, 2], strides = [1, 1, 1, 1]} : vector<2x9x3x2xf32> to vector<2x9x1x2xf32>
    %81 = vector.shape_cast %80 : vector<2x9x1x2xf32> to vector<2x9x2xf32>
    %82 = vector.shape_cast %81 : vector<2x9x2xf32> to vector<2x9x2x1x1xf32>
    %83 = vector.broadcast %82 : vector<2x9x2x1x1xf32> to vector<2x9x2x8x128xf32>
    %84 = arith.mulf %83, %79 : vector<2x9x2x8x128xf32>
    %cst_25 = arith.constant dense<0.000000e+00> : vector<2x2x8x128xf32>
    %85 = vector.multi_reduction <add>, %84, %cst_25 [1] : vector<2x9x2x8x128xf32> to vector<2x2x8x128xf32>
    %86 = vector.extract_strided_slice %74 {offsets = [0, 0, 1, 0], sizes = [2, 9, 1, 2], strides = [1, 1, 1, 1]} : vector<2x9x3x2xf32> to vector<2x9x1x2xf32>
    %87 = vector.shape_cast %86 : vector<2x9x1x2xf32> to vector<2x9x2xf32>
    %88 = vector.shape_cast %87 : vector<2x9x2xf32> to vector<2x9x2x1x1xf32>
    %89 = vector.broadcast %88 : vector<2x9x2x1x1xf32> to vector<2x9x2x8x128xf32>
    %90 = arith.mulf %89, %79 : vector<2x9x2x8x128xf32>
    %cst_26 = arith.constant dense<0.000000e+00> : vector<2x2x8x128xf32>
    %91 = vector.multi_reduction <add>, %90, %cst_26 [1] : vector<2x9x2x8x128xf32> to vector<2x2x8x128xf32>
    %92 = vector.extract_strided_slice %74 {offsets = [0, 0, 2, 0], sizes = [2, 9, 1, 2], strides = [1, 1, 1, 1]} : vector<2x9x3x2xf32> to vector<2x9x1x2xf32>
    %93 = vector.shape_cast %92 : vector<2x9x1x2xf32> to vector<2x9x2xf32>
    %94 = vector.shape_cast %93 : vector<2x9x2xf32> to vector<2x9x2x1x1xf32>
    %95 = vector.broadcast %94 : vector<2x9x2x1x1xf32> to vector<2x9x2x8x128xf32>
    %96 = arith.mulf %95, %79 : vector<2x9x2x8x128xf32>
    %cst_27 = arith.constant dense<0.000000e+00> : vector<2x2x8x128xf32>
    %97 = vector.multi_reduction <add>, %96, %cst_27 [1] : vector<2x9x2x8x128xf32> to vector<2x2x8x128xf32>
    %98 = vector.shape_cast %85 : vector<2x2x8x128xf32> to vector<2x1x2x8x128xf32>
    %99 = vector.shape_cast %91 : vector<2x2x8x128xf32> to vector<2x1x2x8x128xf32>
    %100 = vector.shape_cast %97 : vector<2x2x8x128xf32> to vector<2x1x2x8x128xf32>
    %101 = tpu.concatenate %98, %99, %100 in 1 : vector<2x1x2x8x128xf32>, vector<2x1x2x8x128xf32>, vector<2x1x2x8x128xf32> -> vector<2x3x2x8x128xf32>
    %102 = math.log %101 : vector<2x3x2x8x128xf32>
    %103 = vector.broadcast %76 : vector<2x1x2x8x128xf32> to vector<2x3x2x8x128xf32>
    %104 = arith.addf %103, %102 : vector<2x3x2x8x128xf32>
    %105 = vector.shape_cast %104 : vector<2x3x2x8x128xf32> to vector<1x2x3x2x8x128xf32>
    %106 = vector.extract_strided_slice %105 {offsets = [0, 0, 0, 0, 0, 0], sizes = [1, 1, 3, 2, 8, 128], strides = [1, 1, 1, 1, 1, 1]} : vector<1x2x3x2x8x128xf32> to vector<1x1x3x2x8x128xf32>
    %107 = vector.shape_cast %106 : vector<1x1x3x2x8x128xf32> to vector<1x3x2x8x128xf32>
    %108 = vector.extract_strided_slice %105 {offsets = [0, 1, 0, 0, 0, 0], sizes = [1, 1, 3, 2, 8, 128], strides = [1, 1, 1, 1, 1, 1]} : vector<1x2x3x2x8x128xf32> to vector<1x1x3x2x8x128xf32>
    %109 = vector.shape_cast %108 : vector<1x1x3x2x8x128xf32> to vector<1x3x2x8x128xf32>
    %110 = vector.shape_cast %107 : vector<1x3x2x8x128xf32> to vector<1x3x1x2x8x128xf32>
    %111 = vector.shape_cast %109 : vector<1x3x2x8x128xf32> to vector<1x1x3x2x8x128xf32>
    %112 = vector.broadcast %110 : vector<1x3x1x2x8x128xf32> to vector<1x3x3x2x8x128xf32>
    %113 = vector.broadcast %111 : vector<1x1x3x2x8x128xf32> to vector<1x3x3x2x8x128xf32>
    %114 = arith.addf %112, %113 : vector<1x3x3x2x8x128xf32>
    %115 = vector.shape_cast %114 : vector<1x3x3x2x8x128xf32> to vector<1x9x2x8x128xf32>
    %c0_28 = arith.constant 0 : index
    %c0_29 = arith.constant 0 : index
    %c0_30 = arith.constant 0 : index
    %116 = vector.load %arg7[%c0_28, %c0_29, %c0_30] : memref<9x2x5xf32, #tpu.memory_space<vmem>>, vector<9x2x5xf32>
    %117 = vector.shape_cast %115 : vector<1x9x2x8x128xf32> to vector<9x2x8x128xf32>
    %cst_31 = arith.constant dense<0xFF800000> : vector<8x128xf32>
    %118 = vector.multi_reduction <maximumf>, %117, %cst_31 [0, 1] : vector<9x2x8x128xf32> to vector<8x128xf32>
    %119 = vector.shape_cast %118 : vector<8x128xf32> to vector<1x1x8x128xf32>
    %120 = vector.broadcast %119 : vector<1x1x8x128xf32> to vector<9x2x8x128xf32>
    %121 = arith.subf %117, %120 : vector<9x2x8x128xf32>
    %122 = math.exp %121 : vector<9x2x8x128xf32>
    %123 = vector.extract_strided_slice %116 {offsets = [0, 0, 0], sizes = [9, 2, 1], strides = [1, 1, 1]} : vector<9x2x5xf32> to vector<9x2x1xf32>
    %124 = vector.shape_cast %123 : vector<9x2x1xf32> to vector<9x2xf32>
    %125 = vector.shape_cast %124 : vector<9x2xf32> to vector<9x2x1x1xf32>
    %126 = vector.broadcast %125 : vector<9x2x1x1xf32> to vector<9x2x8x128xf32>
    %127 = arith.mulf %126, %122 : vector<9x2x8x128xf32>
    %cst_32 = arith.constant dense<0.000000e+00> : vector<8x128xf32>
    %128 = vector.multi_reduction <add>, %127, %cst_32 [0, 1] : vector<9x2x8x128xf32> to vector<8x128xf32>
    %129 = math.log %128 : vector<8x128xf32>
    %130 = arith.addf %118, %129 : vector<8x128xf32>
    %131 = vector.extract_strided_slice %116 {offsets = [0, 0, 1], sizes = [9, 2, 1], strides = [1, 1, 1]} : vector<9x2x5xf32> to vector<9x2x1xf32>
    %132 = vector.shape_cast %131 : vector<9x2x1xf32> to vector<9x2xf32>
    %133 = vector.shape_cast %132 : vector<9x2xf32> to vector<9x2x1x1xf32>
    %134 = vector.broadcast %133 : vector<9x2x1x1xf32> to vector<9x2x8x128xf32>
    %135 = arith.mulf %134, %122 : vector<9x2x8x128xf32>
    %cst_33 = arith.constant dense<0.000000e+00> : vector<8x128xf32>
    %136 = vector.multi_reduction <add>, %135, %cst_33 [0, 1] : vector<9x2x8x128xf32> to vector<8x128xf32>
    %137 = math.log %136 : vector<8x128xf32>
    %138 = arith.addf %118, %137 : vector<8x128xf32>
    %139 = vector.extract_strided_slice %116 {offsets = [0, 0, 2], sizes = [9, 2, 1], strides = [1, 1, 1]} : vector<9x2x5xf32> to vector<9x2x1xf32>
    %140 = vector.shape_cast %139 : vector<9x2x1xf32> to vector<9x2xf32>
    %141 = vector.shape_cast %140 : vector<9x2xf32> to vector<9x2x1x1xf32>
    %142 = vector.broadcast %141 : vector<9x2x1x1xf32> to vector<9x2x8x128xf32>
    %143 = arith.mulf %142, %122 : vector<9x2x8x128xf32>
    %cst_34 = arith.constant dense<0.000000e+00> : vector<8x128xf32>
    %144 = vector.multi_reduction <add>, %143, %cst_34 [0, 1] : vector<9x2x8x128xf32> to vector<8x128xf32>
    %145 = math.log %144 : vector<8x128xf32>
    %146 = arith.addf %118, %145 : vector<8x128xf32>
    %147 = vector.extract_strided_slice %116 {offsets = [0, 0, 3], sizes = [9, 2, 1], strides = [1, 1, 1]} : vector<9x2x5xf32> to vector<9x2x1xf32>
    %148 = vector.shape_cast %147 : vector<9x2x1xf32> to vector<9x2xf32>
    %149 = vector.shape_cast %148 : vector<9x2xf32> to vector<9x2x1x1xf32>
    %150 = vector.broadcast %149 : vector<9x2x1x1xf32> to vector<9x2x8x128xf32>
    %151 = arith.mulf %150, %122 : vector<9x2x8x128xf32>
    %cst_35 = arith.constant dense<0.000000e+00> : vector<8x128xf32>
    %152 = vector.multi_reduction <add>, %151, %cst_35 [0, 1] : vector<9x2x8x128xf32> to vector<8x128xf32>
    %153 = math.log %152 : vector<8x128xf32>
    %154 = arith.addf %118, %153 : vector<8x128xf32>
    %155 = vector.extract_strided_slice %116 {offsets = [0, 0, 4], sizes = [9, 2, 1], strides = [1, 1, 1]} : vector<9x2x5xf32> to vector<9x2x1xf32>
    %156 = vector.shape_cast %155 : vector<9x2x1xf32> to vector<9x2xf32>
    %157 = vector.shape_cast %156 : vector<9x2xf32> to vector<9x2x1x1xf32>
    %158 = vector.broadcast %157 : vector<9x2x1x1xf32> to vector<9x2x8x128xf32>
    %159 = arith.mulf %158, %122 : vector<9x2x8x128xf32>
    %cst_36 = arith.constant dense<0.000000e+00> : vector<8x128xf32>
    %160 = vector.multi_reduction <add>, %159, %cst_36 [0, 1] : vector<9x2x8x128xf32> to vector<8x128xf32>
    %161 = math.log %160 : vector<8x128xf32>
    %162 = arith.addf %118, %161 : vector<8x128xf32>
    %163 = vector.shape_cast %130 : vector<8x128xf32> to vector<1x8x128xf32>
    %164 = vector.shape_cast %138 : vector<8x128xf32> to vector<1x8x128xf32>
    %165 = vector.shape_cast %146 : vector<8x128xf32> to vector<1x8x128xf32>
    %166 = vector.shape_cast %154 : vector<8x128xf32> to vector<1x8x128xf32>
    %167 = vector.shape_cast %162 : vector<8x128xf32> to vector<1x8x128xf32>
    %168 = tpu.concatenate %163, %164, %165, %166, %167 in 0 : vector<1x8x128xf32>, vector<1x8x128xf32>, vector<1x8x128xf32>, vector<1x8x128xf32>, vector<1x8x128xf32> -> vector<5x8x128xf32>
    %c0_37 = arith.constant 0 : index
    %c0_38 = arith.constant 0 : index
    %c0_39 = arith.constant 0 : index
    %169 = vector.load %arg8[%c0_37, %c0_38, %c0_39] : memref<5x8x128xf32, #tpu.memory_space<vmem>>, vector<5x8x128xf32>
    tpu.vector_store %arg8[%c0_37, %c0_38, %c0_39], %168 {strides = array<i32>} : memref<5x8x128xf32, #tpu.memory_space<vmem>>, vector<5x8x128xf32>,
    return
  }
  func.func @transform_0(%arg0: i32) -> (i32, i32, i32) {
    %c0_i32 = arith.constant 0 : i32
    %c0_i32_0 = arith.constant 0 : i32
    %c0_i32_1 = arith.constant 0 : i32
    return %c0_i32, %arg0, %c0_i32_0 : i32, i32, i32
  }
  func.func @transform_1(%arg0: i32) -> (i32, i32, i32) {
    %c0_i32 = arith.constant 0 : i32
    %c0_i32_0 = arith.constant 0 : i32
    %c0_i32_1 = arith.constant 0 : i32
    %c0_i32_2 = arith.constant 0 : i32
    return %c0_i32, %c0_i32_0, %c0_i32_1 : i32, i32, i32
  }
  func.func @transform_2(%arg0: i32) -> (i32, i32, i32) {
    %c0_i32 = arith.constant 0 : i32
    %c0_i32_0 = arith.constant 0 : i32
    %c0_i32_1 = arith.constant 0 : i32
    %c0_i32_2 = arith.constant 0 : i32
    return %c0_i32, %c0_i32_0, %c0_i32_1 : i32, i32, i32
  }
  func.func @transform_3(%arg0: i32) -> (i32, i32, i32) {
    %c0_i32 = arith.constant 0 : i32
    %c0_i32_0 = arith.constant 0 : i32
    %c0_i32_1 = arith.constant 0 : i32
    %c0_i32_2 = arith.constant 0 : i32
    return %c0_i32, %c0_i32_0, %c0_i32_1 : i32, i32, i32
  }
  func.func @transform_4(%arg0: i32) -> (i32, i32, i32, i32) {
    %c0_i32 = arith.constant 0 : i32
    %c0_i32_0 = arith.constant 0 : i32
    %c0_i32_1 = arith.constant 0 : i32
    %c0_i32_2 = arith.constant 0 : i32
    %c0_i32_3 = arith.constant 0 : i32
    return %c0_i32, %c0_i32_0, %c0_i32_1, %c0_i32_2 : i32, i32, i32, i32
  }
  func.func @transform_5(%arg0: i32) -> (i32, i32, i32, i32) {
    %c0_i32 = arith.constant 0 : i32
    %c0_i32_0 = arith.constant 0 : i32
    %c0_i32_1 = arith.constant 0 : i32
    %c0_i32_2 = arith.constant 0 : i32
    %c0_i32_3 = arith.constant 0 : i32
    return %c0_i32, %c0_i32_0, %c0_i32_1, %c0_i32_2 : i32, i32, i32, i32
  }
  func.func @transform_6(%arg0: i32) -> (i32, i32, i32) {
    %c0_i32 = arith.constant 0 : i32
    %c0_i32_0 = arith.constant 0 : i32
    %c0_i32_1 = arith.constant 0 : i32
    %c0_i32_2 = arith.constant 0 : i32
    return %c0_i32, %c0_i32_0, %c0_i32_1 : i32, i32, i32
  }
  func.func @transform_7(%arg0: i32) -> (i32, i32, i32) {
    %c0_i32 = arith.constant 0 : i32
    %c0_i32_0 = arith.constant 0 : i32
    %c0_i32_1 = arith.constant 0 : i32
    return %c0_i32, %arg0, %c0_i32_0 : i32, i32, i32
  }
}

</mosaic_0001>

<bundles_post_ra>
// kernel: tpu_custom_call.1
= control target key start
LH: loop header
LB: loop body
LE: loop exit
PB: predicated region body
PF: predicated region fallthrough
CT: control target
= control target key end

     0   :  { %12 = vsyncpa [#allocation3], 0  ;;  %s10179_s0 = inlined_call_operand.hbm [shape: f32[32,16,128], index: 0, kind: input, shape index: {}]   ;;  %s10180_s1 = inlined_call_operand.vmem [shape: f32[16,2,2], index: 1, kind: input, shape index: {}]   ;;  %s10181_s2 = inlined_call_operand.vmem [shape: f32[16,2,2], index: 2, kind: input, shape index: {}]   ;;  %s10182_s3 = inlined_call_operand.vmem [shape: f32[16,2,2], index: 3, kind: input, shape index: {}]   ;;  %s10183_s4 = inlined_call_operand.vmem [shape: f32[4,4,3,2], index: 4, kind: input, shape index: {}]   ;;  %s10184_s5 = inlined_call_operand.vmem [shape: f32[2,9,3,2], index: 5, kind: input, shape index: {}]   ;;  %s10185_s6 = inlined_call_operand.vmem [shape: f32[9,2,5], index: 6, kind: input, shape index: {}]   ;;  %s10186_s7 = inlined_call_operand.hbm [shape: f32[5,16,128], index: 7, kind: output, shape index: {}]  }
   0x1   :  { %14 = vsyncpa [#allocation3 + $0x1], 0 }
   0x2   :  { %15 = vsyncpa [#allocation4], 0 }
   0x3   :  { %17 = vsyncpa [#allocation4 + $0x1], 0  ;;  %s6067_s24 = smov 0   ;;  %s6069_s25 = smov 0  }
   0x4   :  { %s6071_s26 = smov 0   ;;  %s6073_s27 = smov 0  }
   0x5 LB: > { %s6088_s28 = sadd.s32 4294967295, %s6011_s27   ;;  %s5558_s29 = sadd.s32 4294967294, %s6011_s27   ;;  %s6011_s27 = sphi %s6073_s27, %s11048_s27   ;;  %s6007_s26 = sphi %s6071_s26, %s11047_s26   ;;  %s6003_s25 = sphi %s6069_s25, %s11046_s25   ;;  %s5999_s24 = sphi %s6067_s24, %s11045_s24  }
   0x6   : > { %s6092_s30 = sadd.s32 1, %s6011_s27   ;;  %s30_s8 = sadd.s32 1, %s6007_s26 }
   0x7   : > { %s27_s9 = ssub.s32 %s6011_s27, %s6092_s30  ;;  %p37_p0 = scmp.ne.s32.totalorder %s6007_s26, %s6003_s25 }
   0x8   : > { %p28_p1 = scmp.eq.s32.totalorder %s27_s9, 0  ;;  %p38_p2 = scmp.eq.s32.totalorder %s6011_s27, 0 }
   0x9   : > { %p43_p3 = scmp.ne.s32.totalorder %s6003_s25, %s5999_s24  ;;  %p44_p4 = scmp.eq.s32.totalorder %s6088_s28, 0 }
   0xa   : > { %s6104_s10 = scalar_select %p28_p1, %s6007_s26, %s30_s8  }
   0xb   : > { %p6106_p5 = por %p38_p2, %p37_p0  ;;  %p6110_p6 = por %p44_p4, %p43_p3 }
   0xc   : > { %p193_p7 = scmp.eq.s32.totalorder %s6088_s28, 1  ;;  %p199_p8 = scmp.eq.s32.totalorder %s5558_s29, 1 }
   0xd   : > { %s10394_s12 = scalar_select %p6110_p6, 1, 0 }
   0xe   : > { %p5590_p10 = scmp.lt.s32.totalorder %s6011_s27, 2  ;;  %p6117_p11 = por %p193_p7, %p37_p0 }
   0xf   : > { %p6121_p12 = por %p199_p8, %p43_p3  ;;  %s237_s15 = sand.u32 1, %s6007_s26  }
  0x10   : > { %s10395_s13 = scalar_select %p6117_p11, 1, 0 }
  0x11   : > { %s10396_s14 = scalar_select %p6121_p12, 1, 0 }
  0x12   : > { %s5562_s16 = sshll.u32 %s6011_s27, 7  ;;  %s5561_s17 = sshll.u32 %s237_s15, 8 }
  0x13   : > { %s6130_s20 = scalar_lea.hbm %s10179_s0, %s5562_s16  ;;  %s241_s21 = scalar_lea.vmem [#allocation2], %s5561_s17 }
  0x14   : > { %s247_s22 = sshll.u32 %s241_s21, 4  ;;  %p6134_p13 = pnand %p5590_p10, %p6106_p5  ;;  %s6138_s22 = int_to_ptr.vmem [resolvable:$true] %s247_s22 }
  0x15   : > { %s6141_s29 = scalar_lea.sflag [#allocation3], %s237_s15  ;;  %s5919_s8 = scalar_lea.hbm %s6130_s20, 4096 }
  0x16   : > { %p5920_p1 = scmp.ne.s32.totalorder %s6130_s20, %s5919_s8  ;;  %p5921_p2 = pneg %p6134_p13 }
  0x17   : > { %s5924_s11 = scalar_lea.hbm %s10179_s0, 8192  ;;  %p5925_p5 = scmp.lt.s32.totalorder %s6130_s20, %s10179_s0 }
  0x18   : > { %p5922_p3 = pnand %p5921_p2, %p5920_p1  ;;  %p5926_p7 = scmp.lt.s32.totalorder %s5924_s11, %s5919_s8 }
  0x1a   : > { %p5923_p4 = pneg %p5922_p3  ;;  %p5927_p8 = por %p5926_p7, %p5925_p5 }
  0x1c   : > { %p5928_p10 = pnand %p5927_p8, %p5923_p4 }
  0x1e   : > { %5931 = shalt.err (!%p5928_p10)
}
  0x1f   : > { %s5932_s15 = scalar_lea.vmem %s6138_s22, 4096  ;;  %s6013_s19 = smov [#allocation2]  }
  0x20   : > { %p5933_p9 = scmp.ne.s32.totalorder %s6138_s22, %s5932_s15  ;;  %s5937_s21 = sshll.u32 %s6013_s19, 4  ;;  %s5938_s21 = int_to_ptr.vmem [resolvable:$false] %s5937_s21 }
  0x21   : > { %s5939_s9 = scalar_lea.vmem %s5938_s21, 8192  ;;  %p5940_p3 = scmp.lt.s32.totalorder %s6138_s22, %s5938_s21 }
  0x22   : > { %p5935_p0 = pnand %p5933_p9, %p5921_p2  ;;  %p5941_p12 = scmp.lt.s32.totalorder %s5939_s9, %s5932_s15 }
  0x24   : > { %p5936_p1 = pneg %p5935_p0  ;;  %p5942_p11 = por %p5941_p12, %p5940_p3 }
  0x26   : > { %p5943_p6 = pnand %p5942_p11, %p5936_p1 }
  0x28   : > { %5946 = shalt.err (!%p5943_p6)
}
  0x29   : > { %s6014_s8 = smov 256   ;;  %s6015_s16 = smov 128  }
  0x2a   : > { %s6016_s11 = smov 8   ;;  %p255_p9 = scmp.lt.s32.totalorder %s6011_s27, 3 }
  0x2b   : > { %5585 = dma.hbm_to_vmem [thread:$0]  (!%p6134_p13), %s6130_s20, 4096, %s6138_s22, %s6141_s29, %s6014_s8, %s6015_s16, %s6016_s11  }
  0x2c   : > { %p10398_p0 = scmp.ge.s32.totalorder %s6011_s27, 1 }
  0x2e   : > { %p256_p2 = pnand %p10398_p0, %p255_p9 }
  0x30   : > { %259 = sbr.rel (%p256_p2) target bundleno = 892 (0x37c), region = 48 }
  0x35   : > { %s6166_s17 = sand.u32 1, %s6003_s25   ;;  %p10399_p6 = scmp.ne.s32.totalorder %s10394_s12, 0 }
  0x36   : > { %s5564_s18 = sshll.u32 %s6166_s17, 8  ;;  %s262_s15 = scalar_lea.sflag [#allocation3], %s6166_s17 }
  0x37   : > { %s6170_s19 = scalar_lea.vmem [#allocation2], %s5564_s18 }
  0x38   : > { %5990 = dma.done.wait (%p10399_p6), %s262_s15, 4096  }
  0x39   : > { %5992 = vsyncadd (%p10399_p6), %s262_s15, 4294963200  ;;  %v376_v0 = vlaneseq  ;;  %v329_v4 = vld [vmem:[%s10180_s1 + $0x2] sm:$0x3]  ;;  %v328_v5 = vld [vmem:[%s10180_s1] sm:$0x3]  ;;  %s5577_s16 = smul.u32 40, %s6166_s17 }
  0x3a   : > { %v330_v10 = vld [vmem:[%s10180_s1 + $0x4] sm:$0x3]  ;;  %v331_v13 = vld [vmem:[%s10180_s1 + $0x6] sm:$0x3]  ;;  %v332_v16 = vld [vmem:[%s10180_s1 + $0x8] sm:$0x3] }
  0x3b   : > { %v6176_v1 = vshrl.u32 %v376_v0, 7  ;;  %v333_v19 = vld [vmem:[%s10180_s1 + $0xa] sm:$0x3]  ;;  %v334_v22 = vld [vmem:[%s10180_s1 + $0xc] sm:$0x3]  ;;  %s10077_s11 = scalar_lea.vmem [#allocation5], %s5577_s16 }
  0x3c   : > { %v335_v25 = vld [vmem:[%s10180_s1 + $0xe] sm:$0x3]  ;;  %v336_v28 = vld [vmem:[%s10180_s1 + $0x10] sm:$0x3]  ;;  %v337_v31 = vld [vmem:[%s10180_s1 + $0x12] sm:$0x3] }
  0x3d   : > { %10400 = vst [vmem:[#allocation8_spill] sm:$0xff] %v6176_v1  ;;  %v6179_v2 = vsub.s32 0, %v6176_v1  ;;  %v6182_v3 = vsub.s32 1, %v6176_v1  ;;  %v338_v34 = vld [vmem:[%s10180_s1 + $0x14] sm:$0x3]  ;;  %s5485_s18 = sshll.u32 %s10077_s11, 4  ;;  %s10129_s18 = int_to_ptr.vmem [resolvable:$true] %s5485_s18 }
  0x3e   : > { %v339_v37 = vld [vmem:[%s10180_s1 + $0x16] sm:$0x3]  ;;  %v340_v40 = vld [vmem:[%s10180_s1 + $0x18] sm:$0x3]  ;;  %v341_v43 = vld [vmem:[%s10180_s1 + $0x1a] sm:$0x3] }
  0x3f   : > { %v393_v6 = vrot.slane %v329_v4, %v6179_v2  ;;  %v379_v7 = vrot.slane %v328_v5, %v6179_v2  ;;  %v400_v8 = vrot.slane %v329_v4, %v6182_v3  ;;  %v386_v9 = vrot.slane %v328_v5, %v6182_v3  ;;  %v342_v46 = vld [vmem:[%s10180_s1 + $0x1c] sm:$0x3]  ;;  %v343_v49 = vld [vmem:[%s10180_s1 + $0x1e] sm:$0x3]  ;;  %v344_v52 = vld [vmem:[%s10181_s2] sm:$0x3] }
  0x40   : > { %v414_v11 = vrot.slane %v330_v10, %v6182_v3  ;;  %v407_v12 = vrot.slane %v330_v10, %v6179_v2  ;;  %v428_v14 = vrot.slane %v331_v13, %v6182_v3  ;;  %v421_v15 = vrot.slane %v331_v13, %v6179_v2  ;;  %v345_v55 = vld [vmem:[%s10181_s2 + $0x2] sm:$0x3]  ;;  %v346_v58 = vld [vmem:[%s10181_s2 + $0x4] sm:$0x3]  ;;  %v347_v61 = vld [vmem:[%s10181_s2 + $0x6] sm:$0x3] }
  0x41   : > { %395 = vbcast.lane.b32.xlu1 %v393_v6, 256  ;;  %381 = vbcast.lane.b32.xlu0 %v379_v7, 256  ;;  %v442_v17 = vrot.slane %v332_v16, %v6182_v3  ;;  %v435_v18 = vrot.slane %v332_v16, %v6179_v2  ;;  %v456_v20 = vrot.slane %v333_v19, %v6182_v3  ;;  %v348_v0 = vld [vmem:[%s10181_s2 + $0x8] sm:$0x3]  ;;  %v349_v6 = vld [vmem:[%s10181_s2 + $0xa] sm:$0x3] }
  0x42   : > { %v449_v21 = vrot.slane %v333_v19, %v6179_v2  ;;  %v470_v23 = vrot.slane %v334_v22, %v6182_v3  ;;  %v463_v24 = vrot.slane %v334_v22, %v6179_v2  ;;  %v484_v26 = vrot.slane %v335_v25, %v6182_v3  ;;  %s5574_s15 = sshll.u32 %s6088_s28, 7  ;;  %s5473_s23 = scalar_lea.sflag [#allocation4], %s6166_s17 }
  0x43   : > { %v477_v27 = vrot.slane %v335_v25, %v6179_v2  ;;  %v498_v29 = vrot.slane %v336_v28, %v6182_v3  ;;  %v491_v30 = vrot.slane %v336_v28, %v6179_v2  ;;  %v512_v32 = vrot.slane %v337_v31, %v6182_v3  ;;  %s10134_s22 = scalar_lea.hbm %s10186_s7, %s5574_s15  ;;  %s5947_s29 = scalar_lea.vmem %s10129_s18, 640 }
  0x44   : > { %v505_v33 = vrot.slane %v337_v31, %v6179_v2  ;;  %v526_v35 = vrot.slane %v338_v34, %v6182_v3  ;;  %v519_v36 = vrot.slane %v338_v34, %v6179_v2  ;;  %v540_v38 = vrot.slane %v339_v37, %v6182_v3  ;;  %p5948_p11 = scmp.ne.s32.totalorder %s10129_s18, %s5947_s29  ;;  %p11042_p12 = scmp.ne.s32.totalorder %s10395_s13, 0 }
  0x45   : > { %402 = vbcast.lane.b32.xlu1 %v400_v8, 256  ;;  %388 = vbcast.lane.b32.xlu0 %v386_v9, 256  ;;  %v533_v39 = vrot.slane %v339_v37, %v6179_v2  ;;  %v554_v41 = vrot.slane %v340_v40, %v6182_v3  ;;  %v547_v42 = vrot.slane %v340_v40, %v6179_v2  ;;  %v350_v9 = vld [vmem:[%s10181_s2 + $0xc] sm:$0x3]  ;;  %s6023_s28 = smov [#allocation5]  }
  0x46   : > { %v568_v44 = vrot.slane %v341_v43, %v6182_v3  ;;  %v561_v45 = vrot.slane %v341_v43, %v6179_v2  ;;  %v582_v47 = vrot.slane %v342_v46, %v6182_v3  ;;  %v575_v48 = vrot.slane %v342_v46, %v6179_v2  ;;  %v360_v43 = vld [vmem:[%s10182_s3] sm:$0x3]  ;;  %v6368_v46 = vld [vmem:[%s10182_s3 + $0x6] sm:$0x3]  ;;  %p5949_p13 = pnand %p5948_p11, %p11042_p12  ;;  %s5951_s12 = sshll.u32 %s6023_s28, 4  ;;  %s5952_s12 = int_to_ptr.vmem [resolvable:$false] %s5951_s12 }
  0x47   : > { %v596_v50 = vrot.slane %v343_v49, %v6182_v3  ;;  %v589_v51 = vrot.slane %v343_v49, %v6179_v2  ;;  %v930_v53 = vrot.slane %v344_v52, %v6182_v3  ;;  %v923_v54 = vrot.slane %v344_v52, %v6179_v2  ;;  %v6377_v49 = vld [vmem:[%s10182_s3 + $0x8] sm:$0x3]  ;;  %s5953_s21 = scalar_lea.vmem %s5952_s12, 1280  ;;  %p5954_p5 = scmp.lt.s32.totalorder %s10129_s18, %s5952_s12 }
  0x48   : > { %v944_v56 = vrot.slane %v345_v55, %v6182_v3  ;;  %v937_v57 = vrot.slane %v345_v55, %v6179_v2  ;;  %v958_v59 = vrot.slane %v346_v58, %v6182_v3  ;;  %v951_v60 = vrot.slane %v346_v58, %v6179_v2  ;;  %v6393_v55 = vld [vmem:[%s10182_s3 + $0xc] sm:$0x3]  ;;  %p5950_p4 = pneg %p5949_p13  ;;  %p5955_p7 = scmp.lt.s32.totalorder %s5953_s21, %s5947_s29 }
  0x49   : > { %416 = vbcast.lane.b32.xlu1 %v414_v11, 256  ;;  %409 = vbcast.lane.b32.xlu0 %v407_v12, 256  ;;  %v972_v62 = vrot.slane %v347_v61, %v6182_v3  ;;  %v965_v63 = vrot.slane %v347_v61, %v6179_v2  ;;  %v986_v4 = vrot.slane %v348_v0, %v6182_v3  ;;  %v351_v12 = vld [vmem:[%s10181_s2 + $0xe] sm:$0x3]  ;;  %v6414_v61 = vld [vmem:[%s10182_s3 + $0x12] sm:$0x3] }
  0x4a   : > { %v979_v5 = vrot.slane %v348_v0, %v6179_v2  ;;  %v1000_v7 = vrot.slane %v349_v6, %v6182_v3  ;;  %v993_v8 = vrot.slane %v349_v6, %v6179_v2  ;;  %v1014_v10 = vrot.slane %v350_v9, %v6182_v3  ;;  %v6432_v6 = vld [vmem:[%s10182_s3 + $0x16] sm:$0x3]  ;;  %p5956_p8 = por %p5955_p7, %p5954_p5 }
  0x4b   : > { %v1007_v11 = vrot.slane %v350_v9, %v6179_v2  ;;  %v1028_v13 = vrot.slane %v351_v12, %v6182_v3  ;;  %v1595_v52 = vrot.slane %v360_v43, %v6179_v2 }
  0x4c   : > { %p5957_p10 = pnand %p5956_p8, %p5950_p4 }
  0x4d   : > { %430 = vbcast.lane.b32.xlu1 %v428_v14, 256  ;;  %423 = vbcast.lane.b32.xlu0 %v421_v15, 256  ;;  %v1021_v14 = vrot.slane %v351_v12, %v6179_v2  ;;  %v352_v15 = vld [vmem:[%s10181_s2 + $0x10] sm:$0x3] }
  0x4e   : > { %v1042_v16 = vrot.slane %v352_v15, %v6182_v3 }
  0x51   : > { %444 = vbcast.lane.b32.xlu1 %v442_v17, 256  ;;  %437 = vbcast.lane.b32.xlu0 %v435_v18, 256  ;;  %v1035_v17 = vrot.slane %v352_v15, %v6179_v2  ;;  %v353_v18 = vld [vmem:[%s10181_s2 + $0x12] sm:$0x3]  ;;  %v6459_v15 = vld [vmem:[%s10182_s3 + $0x1c] sm:$0x3] }
  0x52   : > { %v1056_v19 = vrot.slane %v353_v18, %v6182_v3 }
  0x55   : > { %458 = vbcast.lane.b32.xlu1 %v456_v20, 256  ;;  %451 = vbcast.lane.b32.xlu0 %v449_v21, 256  ;;  %v1049_v20 = vrot.slane %v353_v18, %v6179_v2  ;;  %v354_v21 = vld [vmem:[%s10181_s2 + $0x14] sm:$0x3] }
  0x56   : > { %v1070_v22 = vrot.slane %v354_v21, %v6182_v3 }
  0x59   : > { %472 = vbcast.lane.b32.xlu1 %v470_v23, 256  ;;  %465 = vbcast.lane.b32.xlu0 %v463_v24, 256  ;;  %v1063_v23 = vrot.slane %v354_v21, %v6179_v2  ;;  %v355_v24 = vld [vmem:[%s10181_s2 + $0x16] sm:$0x3]  ;;  %v6477_v21 = vld [vmem:[%s10183_s4 + $0x4] sm:$0x7] }
  0x5a   : > { %v1084_v25 = vrot.slane %v355_v24, %v6182_v3 }
  0x5d   : > { %486 = vbcast.lane.b32.xlu1 %v484_v26, 256  ;;  %479 = vbcast.lane.b32.xlu0 %v477_v27, 256  ;;  %v1077_v26 = vrot.slane %v355_v24, %v6179_v2  ;;  %v356_v27 = vld [vmem:[%s10181_s2 + $0x18] sm:$0x3] }
  0x5e   : > { %v1098_v28 = vrot.slane %v356_v27, %v6182_v3 }
  0x61   : > { %500 = vbcast.lane.b32.xlu1 %v498_v29, 256  ;;  %493 = vbcast.lane.b32.xlu0 %v491_v30, 256  ;;  %v1091_v29 = vrot.slane %v356_v27, %v6179_v2  ;;  %v357_v30 = vld [vmem:[%s10181_s2 + $0x1a] sm:$0x3]  ;;  %v6498_v27 = vld [vmem:[%s10183_s4 + $0x8] sm:$0x7] }
  0x62   : > { %v1112_v31 = vrot.slane %v357_v30, %v6182_v3 }
  0x65   : > { %514 = vbcast.lane.b32.xlu1 %v512_v32, 256  ;;  %507 = vbcast.lane.b32.xlu0 %v505_v33, 256  ;;  %v1105_v32 = vrot.slane %v357_v30, %v6179_v2  ;;  %v358_v33 = vld [vmem:[%s10181_s2 + $0x1c] sm:$0x3] }
  0x66   : > { %v1119_v37 = vrot.slane %v358_v33, %v6179_v2 }
  0x69   : > { %528 = vbcast.lane.b32.xlu1 %v526_v35, 256  ;;  %521 = vbcast.lane.b32.xlu0 %v519_v36, 256  ;;  %v1126_v36 = vrot.slane %v358_v33, %v6182_v3  ;;  %v6516_v33 = vld [vmem:[%s10183_s4 + $0x10] sm:$0x7] }
  0x6d   : > { %542 = vbcast.lane.b32.xlu1 %v540_v38, 256  ;;  %535 = vbcast.lane.b32.xlu0 %v533_v39, 256  ;;  %v359_v38 = vld [vmem:[%s10181_s2 + $0x1e] sm:$0x3] }
  0x71   : > { %556 = vbcast.lane.b32.xlu1 %v554_v41, 256  ;;  %549 = vbcast.lane.b32.xlu0 %v547_v42, 256  ;;  %v1140_v41 = vrot.slane %v359_v38, %v6182_v3  ;;  %v1133_v42 = vrot.slane %v359_v38, %v6179_v2 }
  0x75   : > { %570 = vbcast.lane.b32.xlu1 %v568_v44, 256  ;;  %563 = vbcast.lane.b32.xlu0 %v561_v45, 256  ;;  %v6358_v44 = vld [vmem:[%s10182_s3 + $0x2] sm:$0x3]  ;;  %v6363_v45 = vld [vmem:[%s10182_s3 + $0x4] sm:$0x3] }
  0x76   : > { %v1623_v58 = vrot.slane %v6363_v45, %v6179_v2 }
  0x79   : > { %584 = vbcast.lane.b32.xlu1 %v582_v47, 256  ;;  %577 = vbcast.lane.b32.xlu0 %v575_v48, 256 }
  0x7d   : > { %598 = vbcast.lane.b32.xlu1 %v596_v50, 256  ;;  %591 = vbcast.lane.b32.xlu0 %v589_v51, 256  ;;  %v6382_v50 = vld [vmem:[%s10182_s3 + $0xa] sm:$0x3]  ;;  %v1602_v51 = vrot.slane %v360_v43, %v6182_v3  ;;  %v6553_v43 = vld [vmem:[%s10183_s4 + $0x2c] sm:$0x7] }
  0x7e   : > { %10403 = vst [vmem:[#allocation11_spill] sm:$0xff] %v6553_v43 }
  0x81   : > { %932 = vbcast.lane.b32.xlu1 %v930_v53, 256  ;;  %925 = vbcast.lane.b32.xlu0 %v923_v54, 256  ;;  %v1616_v53 = vrot.slane %v6358_v44, %v6182_v3  ;;  %v1609_v54 = vrot.slane %v6358_v44, %v6179_v2 }
  0x85   : > { %946 = vbcast.lane.b32.xlu1 %v944_v56, 256  ;;  %939 = vbcast.lane.b32.xlu0 %v937_v57, 256  ;;  %v6398_v56 = vld [vmem:[%s10182_s3 + $0xe] sm:$0x3]  ;;  %v1630_v57 = vrot.slane %v6363_v45, %v6182_v3 }
  0x89   : > { %960 = vbcast.lane.b32.xlu1 %v958_v59, 256  ;;  %953 = vbcast.lane.b32.xlu0 %v951_v60, 256  ;;  %v1644_v59 = vrot.slane %v6368_v46, %v6182_v3  ;;  %v6409_v60 = vld [vmem:[%s10182_s3 + $0x10] sm:$0x3] }
  0x8d   : > { %974 = vbcast.lane.b32.xlu1 %v972_v62, 256  ;;  %967 = vbcast.lane.b32.xlu0 %v965_v63, 256  ;;  %v1637_v62 = vrot.slane %v6368_v46, %v6179_v2 }
  0x91   : > { %988 = vbcast.lane.b32.xlu1 %v986_v4, 256  ;;  %981 = vbcast.lane.b32.xlu0 %v979_v5, 256  ;;  %v6427_v5 = vld [vmem:[%s10182_s3 + $0x14] sm:$0x3] }
  0x95   : > { %1002 = vbcast.lane.b32.xlu1 %v1000_v7, 256  ;;  %995 = vbcast.lane.b32.xlu0 %v993_v8, 256  ;;  %v6437_v7 = vld [vmem:[%s10182_s3 + $0x18] sm:$0x3] }
  0x99   : > { %1016 = vbcast.lane.b32.xlu1 %v1014_v10, 256  ;;  %1009 = vbcast.lane.b32.xlu0 %v1007_v11, 256 }
  0x9d   : > { %1030 = vbcast.lane.b32.xlu1 %v1028_v13, 256  ;;  %1023 = vbcast.lane.b32.xlu0 %v1021_v14, 256  ;;  %v6454_v14 = vld [vmem:[%s10182_s3 + $0x1a] sm:$0x3] }
  0xa1   : > { %1044 = vbcast.lane.b32.xlu1 %v1042_v16, 256  ;;  %1037 = vbcast.lane.b32.xlu0 %v1035_v17, 256  ;;  %v6464_v16 = vld [vmem:[%s10182_s3 + $0x1e] sm:$0x3] }
  0xa2   : > { %10401 = vst [vmem:[#allocation9_spill] sm:$0xff] %v6464_v16 }
  0xa5   : > { %1058 = vbcast.lane.b32.xlu1 %v1056_v19, 256  ;;  %1051 = vbcast.lane.b32.xlu0 %v1049_v20, 256 }
  0xa9   : > { %1072 = vbcast.lane.b32.xlu1 %v1070_v22, 256  ;;  %1065 = vbcast.lane.b32.xlu0 %v1063_v23, 256  ;;  %v6482_v22 = vld [vmem:[%s10183_s4] sm:$0x7]  ;;  %v6487_v23 = vld [vmem:[%s10183_s4 + $0xc] sm:$0x7] }
  0xad   : > { %1086 = vbcast.lane.b32.xlu1 %v1084_v25, 256  ;;  %1079 = vbcast.lane.b32.xlu0 %v1077_v26, 256  ;;  %v6571_v26 = vld [vmem:[%s10183_s4 + $0x34] sm:$0x7]  ;;  %v6593_v25 = vld [vmem:[%s10183_s4 + $0x3c] sm:$0x7] }
  0xb1   : > { %1100 = vbcast.lane.b32.xlu1 %v1098_v28, 256  ;;  %1093 = vbcast.lane.b32.xlu0 %v1091_v29, 256  ;;  %v6503_v28 = vld [vmem:[%s10183_s4 + $0x14] sm:$0x7]  ;;  %v6566_v29 = vld [vmem:[%s10183_s4 + $0x28] sm:$0x7] }
  0xb2   : > { %10402 = vst [vmem:[#allocation10_spill] sm:$0xff] %v6503_v28 }
  0xb3   : > { %v6337_v34 = vpop.permute.xlu1 %395  ;;  %v6339_v35 = vpop.permute.xlu0 %381 }
  0xb4   : > { %v619_v19 = vrot.slane %v6337_v34, %v6179_v2  ;;  %v603_v45 = vrot.slane %v6339_v35, %v6179_v2  ;;  %v607_v44 = vrot.slane %v6339_v35, %v6182_v3 }
  0xb5   : > { %1114 = vbcast.lane.b32.xlu1 %v1112_v31, 256  ;;  %1107 = vbcast.lane.b32.xlu0 %v1105_v32, 256  ;;  %v6543_v32 = vld [vmem:[%s10183_s4 + $0x24] sm:$0x7]  ;;  %v6548_v31 = vld [vmem:[%s10183_s4 + $0x20] sm:$0x7] }
  0xb7   : > { %v6346_v39 = vpop.permute.xlu1 %402  ;;  %v6348_v40 = vpop.permute.xlu0 %388 }
  0xb8   : > { %v627_v12 = vrot.slane %v6346_v39, %v6179_v2  ;;  %v631_v35 = vrot.slane %v6346_v39, %v6182_v3  ;;  %v611_v17 = vrot.slane %v6348_v40, %v6179_v2 }
  0xb9   : > { %1128 = vbcast.lane.b32.xlu1 %v1126_v36, 256  ;;  %1121 = vbcast.lane.b32.xlu0 %v1119_v37, 256  ;;  %v6521_v36 = vld [vmem:[%s10183_s4 + $0x1c] sm:$0x7]  ;;  %v6526_v37 = vld [vmem:[%s10183_s4 + $0x18] sm:$0x7] }
  0xbb   : > { %v6370_v47 = vpop.permute.xlu1 %416  ;;  %v6372_v48 = vpop.permute.xlu0 %409 }
  0xbc   : > { %v635_v0 = vrot.slane %v6372_v48, %v6179_v2 }
  0xbd   : > { %1142 = vbcast.lane.b32.xlu1 %v1140_v41, 256  ;;  %1135 = vbcast.lane.b32.xlu0 %v1133_v42, 256  ;;  %v299_v42 = vld [vmem:[%s6170_s19 + $0x18] sm:$0xff] }
  0xbe   : > { %v6706_v39 = vsub.f32 %v299_v42, %v631_v35  ;;  %v303_v35 = vld [vmem:[%s6170_s19 + $0x38] sm:$0xff] }
  0xbf   : > { %v6439_v8 = vpop.permute.xlu1 %430  ;;  %v6441_v9 = vpop.permute.xlu0 %423 }
  0xc0   : > { %10407 = vst [vmem:[#allocation15_spill] sm:$0xff] %v6706_v39  ;;  %v304_v39 = vld [vmem:[%s6170_s19 + $0x40] sm:$0xff] }
  0xc1   : > { %1604 = vbcast.lane.b32.xlu1 %v1602_v51, 256  ;;  %1597 = vbcast.lane.b32.xlu0 %v1595_v52, 256  ;;  %v6576_v52 = vld [vmem:[%s10183_s4 + $0x30] sm:$0x7] }
  0xc2   : > { %v298_v51 = vld [vmem:[%s6170_s19 + $0x10] sm:$0xff] }
  0xc3   : > { %v6528_v38 = vpop.permute.xlu1 %444  ;;  %v6530_v41 = vpop.permute.xlu0 %437  ;;  %v6684_v11 = vsub.f32 %v298_v51, %v619_v19  ;;  %v301_v19 = vld [vmem:[%s6170_s19 + $0x28] sm:$0xff] }
  0xc5   : > { %1618 = vbcast.lane.b32.xlu1 %v1616_v53, 256  ;;  %1611 = vbcast.lane.b32.xlu0 %v1609_v54, 256  ;;  %v6598_v53 = vld [vmem:[%s10183_s4 + $0x38] sm:$0x7]  ;;  %v296_v54 = vld [vmem:[%s6170_s19] sm:$0xff]  ;;  %10405 = vst [vmem:[#allocation13_spill] sm:$0xff] %v6684_v11 }
  0xc6   : > { %10404 = vst [vmem:[#allocation12_spill] sm:$0xff] %v6598_v53  ;;  %v6688_v13 = vsub.f32 %v296_v54, %v603_v45  ;;  %v6704_v45 = vsub.f32 %v298_v51, %v627_v12  ;;  %v6713_v63 = vsub.f32 %v296_v54, %v611_v17  ;;  %v639_v12 = vrot.slane %v6372_v48, %v6182_v3  ;;  %v7031_v53 = vld [vmem:[%s10184_s5 + $0x8] sm:$0x7] }
  0xc7   : > { %v6608_v30 = vpop.permute.xlu1 %458  ;;  %v6610_v24 = vpop.permute.xlu0 %451  ;;  %v10409_v51 = vrot.slane %v6377_v49, %v6179_v2  ;;  %v663_v17 = vrot.slane %v6439_v8, %v6182_v3  ;;  %v651_v54 = vrot.slane %v6441_v9, %v6179_v2  ;;  %v655_v48 = vrot.slane %v6441_v9, %v6182_v3  ;;  %10455 = vst [vmem:[#allocation47_spill] sm:$0xff] %v7031_v53 }
  0xc8   : > { %v6757_v11 = vsub.f32 %v301_v19, %v639_v12 }
  0xc9   : > { %1632 = vbcast.lane.b32.xlu1 %v1630_v57, 256  ;;  %1625 = vbcast.lane.b32.xlu0 %v1623_v58, 256  ;;  %v623_v57 = vrot.slane %v6337_v34, %v6182_v3  ;;  %v297_v58 = vld [vmem:[%s6170_s19 + $0x8] sm:$0xff]  ;;  %v615_v34 = vrot.slane %v6348_v40, %v6182_v3  ;;  %v647_v40 = vrot.slane %v6370_v47, %v6182_v3 }
  0xca   : > { %v6692_v4 = vsub.f32 %v297_v58, %v607_v44  ;;  %v300_v44 = vld [vmem:[%s6170_s19 + $0x20] sm:$0xff]  ;;  %10413 = vst [vmem:[#allocation19_spill] sm:$0xff] %v6757_v11  ;;  %v695_v11 = vrot.slane %v6608_v30, %v6182_v3 }
  0xcb   : > { %v6653_v18 = vpop.permute.xlu1 %472  ;;  %v6655_v20 = vpop.permute.xlu0 %465  ;;  %v6686_v10 = vsub.f32 %v299_v42, %v623_v57  ;;  %v6715_v16 = vsub.f32 %v297_v58, %v615_v34  ;;  %v10408_v42 = vrot.slane %v6377_v49, %v6182_v3  ;;  %v302_v34 = vld [vmem:[%s6170_s19 + $0x30] sm:$0xff]  ;;  %v6747_v57 = vsub.s32 2, %v6176_v1 }
  0xcc   : > { %v6751_v9 = vsub.f32 %v300_v44, %v635_v0  ;;  %v10414_v0 = vrot.slane %v6382_v50, %v6182_v3  ;;  %v6775_v12 = vsub.f32 %v302_v34, %v651_v54  ;;  %v6777_v1 = vsub.f32 %v303_v35, %v655_v48  ;;  %v306_v48 = vld [vmem:[%s6170_s19 + $0x50] sm:$0xff] }
  0xcd   : > { %1646 = vbcast.lane.b32.xlu1 %v1644_v59, 256  ;;  %1639 = vbcast.lane.b32.xlu0 %v1637_v62, 256  ;;  %10406 = vst [vmem:[#allocation14_spill] sm:$0xff] %v6686_v10  ;;  %v643_v59 = vrot.slane %v6370_v47, %v6179_v2  ;;  %v659_v47 = vrot.slane %v6439_v8, %v6179_v2  ;;  %10411 = vst [vmem:[#allocation17_spill] sm:$0xff] %v6747_v57  ;;  %v321_v57 = vld [vmem:[%s6170_s19 + $0xc8] sm:$0xff] }
  0xce   : > { %v6749_v10 = vsub.f32 %v301_v19, %v647_v40  ;;  %10412 = vst [vmem:[#allocation18_spill] sm:$0xff] %v6751_v9  ;;  %v667_v8 = vrot.slane %v6530_v41, %v6179_v2  ;;  %v671_v40 = vrot.slane %v6530_v41, %v6182_v3  ;;  %v6773_v19 = vsub.f32 %v303_v35, %v663_v17 }
  0xcf   : > { %v6696_v46 = vpop.permute.xlu1 %486  ;;  %v6698_v62 = vpop.permute.xlu0 %479  ;;  %v6734_v58 = vsub.f32 %v300_v44, %v643_v59  ;;  %v675_v59 = vrot.slane %v6528_v38, %v6179_v2  ;;  %v10415_v44 = vrot.slane %v6382_v50, %v6179_v2  ;;  %10416 = vst [vmem:[#allocation20_spill] sm:$0xff] %v6777_v1  ;;  %v691_v41 = vrot.slane %v6608_v30, %v6179_v2 }
  0xd0   : > { %v687_v30 = vrot.slane %v6610_v24, %v6182_v3  ;;  %v703_v35 = vrot.slane %v6655_v20, %v6182_v3 }
  0xd1   : > { %1660 = vbcast.lane.b32.xlu1 %v10408_v42, 256  ;;  %1653 = vbcast.lane.b32.xlu0 %v10409_v51, 256  ;;  %10410 = vst [vmem:[#allocation16_spill] sm:$0xff] %v6734_v58  ;;  %v679_v58 = vrot.slane %v6528_v38, %v6182_v3  ;;  %v305_v51 = vld [vmem:[%s6170_s19 + $0x48] sm:$0xff]  ;;  %v6771_v38 = vsub.f32 %v302_v34, %v659_v47  ;;  %v307_v34 = vld [vmem:[%s6170_s19 + $0x58] sm:$0xff] }
  0xd2   : > { %v6791_v17 = vsub.f32 %v304_v39, %v675_v59  ;;  %v6803_v1 = vsub.f32 %v305_v51, %v671_v40  ;;  %v10419_v59 = vrot.slane %v6393_v55, %v6182_v3  ;;  %v6821_v40 = vsub.f32 %v306_v48, %v691_v41  ;;  %v309_v47 = vld [vmem:[%s6170_s19 + $0x68] sm:$0xff] }
  0xd3   : > { %v6738_v49 = vpop.permute.xlu1 %500  ;;  %v6740_v42 = vpop.permute.xlu0 %493  ;;  %v6793_v54 = vsub.f32 %v305_v51, %v679_v58  ;;  %v10420_v58 = vrot.slane %v6393_v55, %v6179_v2  ;;  %v699_v51 = vrot.slane %v6655_v20, %v6179_v2  ;;  %v6823_v55 = vsub.f32 %v307_v34, %v695_v11 }
  0xd4   : > { %10418 = vst [vmem:[#allocation22_spill] sm:$0xff] %v6803_v1  ;;  %10421 = vst [vmem:[#allocation23_spill] sm:$0xff] %v6821_v40  ;;  %v723_v41 = vrot.slane %v6696_v46, %v6179_v2  ;;  %v727_v11 = vrot.slane %v6696_v46, %v6182_v3  ;;  %v715_v20 = vrot.slane %v6698_v62, %v6179_v2 }
  0xd5   : > { %1674 = vbcast.lane.b32.xlu1 %v10414_v0, 256  ;;  %1667 = vbcast.lane.b32.xlu0 %v10415_v44, 256  ;;  %v683_v0 = vrot.slane %v6610_v24, %v6179_v2  ;;  %v6801_v44 = vsub.f32 %v304_v39, %v667_v8  ;;  %v707_v24 = vrot.slane %v6653_v18, %v6179_v2  ;;  %v311_v8 = vld [vmem:[%s6170_s19 + $0x78] sm:$0xff] }
  0xd6   : > { %v711_v39 = vrot.slane %v6653_v18, %v6182_v3  ;;  %10422 = vst [vmem:[#allocation24_spill] sm:$0xff] %v6823_v55  ;;  %v6865_v40 = vsub.f32 %v309_v47, %v703_v35  ;;  %v735_v35 = vrot.slane %v6740_v42, %v6182_v3 }
  0xd7   : > { %v6785_v9 = vpop.permute.xlu1 %514  ;;  %v6787_v50 = vpop.permute.xlu0 %507  ;;  %10417 = vst [vmem:[#allocation21_spill] sm:$0xff] %v6801_v44  ;;  %v6835_v44 = vsub.f32 %v307_v34, %v687_v30  ;;  %v10425_v34 = vrot.slane %v6398_v56, %v6182_v3  ;;  %v10426_v30 = vrot.slane %v6398_v56, %v6179_v2  ;;  %v743_v56 = vrot.slane %v6738_v49, %v6182_v3 }
  0xd8   : > { %10427 = vst [vmem:[#allocation27_spill] sm:$0xff] %v6865_v40 }
  0xd9   : > { %1688 = vbcast.lane.b32.xlu1 %v10419_v59, 256  ;;  %1681 = vbcast.lane.b32.xlu0 %v10420_v58, 256  ;;  %v6825_v59 = vsub.f32 %v306_v48, %v683_v0  ;;  %v308_v58 = vld [vmem:[%s6170_s19 + $0x60] sm:$0xff]  ;;  %10424 = vst [vmem:[#allocation26_spill] sm:$0xff] %v6835_v44  ;;  %v310_v48 = vld [vmem:[%s6170_s19 + $0x70] sm:$0xff]  ;;  %v6859_v44 = vsub.f32 %v309_v47, %v711_v39  ;;  %v313_v47 = vld [vmem:[%s6170_s19 + $0x88] sm:$0xff] }
  0xda   : > { %v6857_v0 = vsub.f32 %v308_v58, %v707_v24  ;;  %v6861_v55 = vsub.f32 %v308_v58, %v699_v51  ;;  %v6876_v39 = vsub.f32 %v310_v48, %v723_v41  ;;  %v6878_v51 = vsub.f32 %v311_v8, %v727_v11 }
  0xdb   : > { %10423 = vst [vmem:[#allocation25_spill] sm:$0xff] %v6825_v59  ;;  %v6831_v1 = vpop.permute.xlu1 %528  ;;  %v6833_v18 = vpop.permute.xlu0 %521  ;;  %v719_v59 = vrot.slane %v6698_v62, %v6182_v3  ;;  %v739_v62 = vrot.slane %v6738_v49, %v6179_v2  ;;  %v6885_v58 = vsub.f32 %v310_v48, %v715_v20  ;;  %v10432_v24 = vrot.slane %v6409_v60, %v6182_v3  ;;  %v314_v20 = vld [vmem:[%s6170_s19 + $0x90] sm:$0xff] }
  0xdc   : > { %10428 = vst [vmem:[#allocation28_spill] sm:$0xff] %v6876_v39  ;;  %10429 = vst [vmem:[#allocation29_spill] sm:$0xff] %v6878_v51  ;;  %v10433_v41 = vrot.slane %v6409_v60, %v6179_v2  ;;  %v6905_v48 = vsub.f32 %v313_v47, %v743_v56  ;;  %v771_v56 = vrot.slane %v6831_v1, %v6179_v2 }
  0xdd   : > { %1702 = vbcast.lane.b32.xlu1 %v10425_v34, 256  ;;  %1695 = vbcast.lane.b32.xlu0 %v10426_v30, 256  ;;  %v312_v34 = vld [vmem:[%s6170_s19 + $0x80] sm:$0xff]  ;;  %v731_v30 = vrot.slane %v6740_v42, %v6179_v2  ;;  %10430 = vst [vmem:[#allocation30_spill] sm:$0xff] %v6885_v58  ;;  %v6887_v40 = vsub.f32 %v311_v8, %v719_v59  ;;  %v319_v58 = vld [vmem:[%s6170_s19 + $0xb8] sm:$0xff] }
  0xde   : > { %v6897_v51 = vsub.f32 %v312_v34, %v739_v62  ;;  %v755_v42 = vrot.slane %v6785_v9, %v6179_v2  ;;  %v759_v8 = vrot.slane %v6785_v9, %v6182_v3  ;;  %10435 = vst [vmem:[#allocation33_spill] sm:$0xff] %v6905_v48  ;;  %v747_v62 = vrot.slane %v6787_v50, %v6179_v2  ;;  %v316_v59 = vld [vmem:[%s6170_s19 + $0xa0] sm:$0xff] }
  0xdf   : > { %v543_v28 = vpop.permute.xlu1 %542  ;;  %v6872_v46 = vpop.permute.xlu0 %535  ;;  %10431 = vst [vmem:[#allocation31_spill] sm:$0xff] %v6887_v40  ;;  %v6907_v60 = vsub.f32 %v312_v34, %v731_v30  ;;  %v6919_v9 = vsub.f32 %v313_v47, %v735_v35  ;;  %v775_v34 = vrot.slane %v6831_v1, %v6182_v3  ;;  %v767_v47 = vrot.slane %v6833_v18, %v6182_v3 }
  0xe0   : > { %10434 = vst [vmem:[#allocation32_spill] sm:$0xff] %v6897_v51  ;;  %v10438_v35 = vrot.slane %v6414_v61, %v6182_v3  ;;  %v6941_v30 = vsub.f32 %v314_v20, %v755_v42  ;;  %v787_v51 = vrot.slane %v543_v28, %v6179_v2  ;;  %v791_v43 = vrot.slane %v543_v28, %v6182_v3 }
  0xe1   : > { %1716 = vbcast.lane.b32.xlu1 %v10432_v24, 256  ;;  %1709 = vbcast.lane.b32.xlu0 %v10433_v41, 256  ;;  %10436 = vst [vmem:[#allocation34_spill] sm:$0xff] %v6907_v60  ;;  %v315_v24 = vld [vmem:[%s6170_s19 + $0x98] sm:$0xff]  ;;  %v751_v41 = vrot.slane %v6787_v50, %v6182_v3  ;;  %10437 = vst [vmem:[#allocation35_spill] sm:$0xff] %v6919_v9  ;;  %v317_v60 = vld [vmem:[%s6170_s19 + $0xa8] sm:$0xff]  ;;  %v763_v50 = vrot.slane %v6833_v18, %v6179_v2 }
  0xe2   : > { %v10439_v9 = vrot.slane %v6414_v61, %v6179_v2  ;;  %v6943_v48 = vsub.f32 %v315_v24, %v759_v8  ;;  %v6947_v18 = vsub.f32 %v314_v20, %v747_v62  ;;  %v779_v61 = vrot.slane %v6872_v46, %v6179_v2 }
  0xe3   : > { %v6915_v11 = vpop.permute.xlu1 %556  ;;  %v6917_v49 = vpop.permute.xlu0 %549  ;;  %v6949_v40 = vsub.f32 %v315_v24, %v751_v41  ;;  %v6957_v8 = vsub.f32 %v316_v59, %v771_v56  ;;  %v6959_v1 = vsub.f32 %v317_v60, %v775_v34  ;;  %v783_v28 = vrot.slane %v6872_v46, %v6182_v3 }
  0xe4   : > { %v6965_v24 = vsub.f32 %v316_v59, %v763_v50  ;;  %v6967_v62 = vsub.f32 %v317_v60, %v767_v47  ;;  %v10444_v41 = vrot.slane %v6427_v5, %v6182_v3  ;;  %v10445_v56 = vrot.slane %v6427_v5, %v6179_v2  ;;  %v6988_v5 = vld [vmem:[%s10184_s5 + $0x4] sm:$0x7] }
  0xe5   : > { %1730 = vbcast.lane.b32.xlu1 %v10438_v35, 256  ;;  %1723 = vbcast.lane.b32.xlu0 %v10439_v9, 256  ;;  %v318_v35 = vld [vmem:[%s6170_s19 + $0xb0] sm:$0xff]  ;;  %10440 = vst [vmem:[#allocation36_spill] sm:$0xff] %v6957_v8  ;;  %10441 = vst [vmem:[#allocation37_spill] sm:$0xff] %v6959_v1  ;;  %v6979_v42 = vsub.f32 %v319_v58, %v791_v43  ;;  %v803_v59 = vrot.slane %v6915_v11, %v6179_v2  ;;  %v320_v50 = vld [vmem:[%s6170_s19 + $0xc0] sm:$0xff] }
  0xe6   : > { %10442 = vst [vmem:[#allocation38_spill] sm:$0xff] %v6965_v24  ;;  %10443 = vst [vmem:[#allocation39_spill] sm:$0xff] %v6967_v62  ;;  %v6977_v46 = vsub.f32 %v318_v35, %v787_v51  ;;  %v6993_v51 = vld [vmem:[%s10184_s5] sm:$0x7]  ;;  %v6995_v43 = vsub.f32 %v318_v35, %v779_v61  ;;  %v807_v47 = vrot.slane %v6915_v11, %v6182_v3  ;;  %v7013_v11 = vld [vmem:[%s10184_s5 + $0xc] sm:$0x7] }
  0xe7   : > { %v571_v9 = vpop.permute.xlu1 %570  ;;  %v564_v39 = vpop.permute.xlu0 %563  ;;  %10447 = vst [vmem:[#allocation41_spill] sm:$0xff] %v6979_v42  ;;  %10448 = vst [vmem:[#allocation42_spill] sm:$0xff] %v6988_v5  ;;  %v7004_v20 = vsub.f32 %v319_v58, %v783_v28  ;;  %v10453_v58 = vrot.slane %v6432_v6, %v6182_v3  ;;  %v324_v5 = vld [vmem:[%s6170_s19 + $0xe0] sm:$0xff]  ;;  %v7056_v1 = vld [vmem:[%s10184_s5 + $0x10] sm:$0x7] }
  0xe8   : > { %10446 = vst [vmem:[#allocation40_spill] sm:$0xff] %v6977_v46  ;;  %10449 = vst [vmem:[#allocation43_spill] sm:$0xff] %v6993_v51  ;;  %v819_v42 = vrot.slane %v571_v9, %v6179_v2  ;;  %v823_v35 = vrot.slane %v571_v9, %v6182_v3  ;;  %v811_v61 = vrot.slane %v564_v39, %v6179_v2  ;;  %v323_v46 = vld [vmem:[%s6170_s19 + $0xd8] sm:$0xff] }
  0xe9   : > { %1744 = vbcast.lane.b32.xlu1 %v10444_v41, 256  ;;  %1737 = vbcast.lane.b32.xlu0 %v10445_v56, 256  ;;  %10450 = vst [vmem:[#allocation44_spill] sm:$0xff] %v6995_v43  ;;  %v795_v41 = vrot.slane %v6917_v49, %v6179_v2  ;;  %v799_v56 = vrot.slane %v6917_v49, %v6182_v3  ;;  %10451 = vst [vmem:[#allocation45_spill] sm:$0xff] %v7004_v20  ;;  %v322_v43 = vld [vmem:[%s6170_s19 + $0xd0] sm:$0xff] }
  0xea   : > { %10452 = vst [vmem:[#allocation46_spill] sm:$0xff] %v7013_v11  ;;  %v815_v49 = vrot.slane %v564_v39, %v6182_v3  ;;  %v10454_v9 = vrot.slane %v6432_v6, %v6179_v2  ;;  %v7033_v39 = vsub.f32 %v320_v50, %v803_v59  ;;  %v7043_v28 = vsub.f32 %v321_v57, %v807_v47  ;;  %v325_v59 = vld [vmem:[%s6170_s19 + $0xe8] sm:$0xff] }
  0xeb   : > { %v585_v60 = vpop.permute.xlu1 %584  ;;  %v578_v34 = vpop.permute.xlu0 %577  ;;  %v7045_v20 = vsub.f32 %v320_v50, %v795_v41  ;;  %v7047_v51 = vsub.f32 %v321_v57, %v799_v56  ;;  %10458 = vst [vmem:[#allocation50_spill] sm:$0xff] %v7056_v1  ;;  %v7058_v8 = vsub.f32 %v322_v43, %v819_v42  ;;  %v7060_v47 = vsub.f32 %v323_v46, %v823_v35 }
  0xec   : > { %10456 = vst [vmem:[#allocation48_spill] sm:$0xff] %v7033_v39  ;;  %v835_v62 = vrot.slane %v585_v60, %v6179_v2  ;;  %v827_v6 = vrot.slane %v578_v34, %v6179_v2  ;;  %v7062_v50 = vsub.f32 %v322_v43, %v811_v61  ;;  %v7066_v41 = vsub.f32 %v323_v46, %v815_v49  ;;  %v7088_v49 = vld [vmem:[%s10184_s5 + $0x1c] sm:$0x7] }
  0xed   : > { %1758 = vbcast.lane.b32.xlu1 %v10453_v58, 256  ;;  %1751 = vbcast.lane.b32.xlu0 %v10454_v9, 256  ;;  %v839_v58 = vrot.slane %v585_v60, %v6182_v3  ;;  %v7041_v9 = vld [vmem:[%s10184_s5 + $0x14] sm:$0x7]  ;;  %v831_v56 = vrot.slane %v578_v34, %v6182_v3  ;;  %v10461_v60 = vrot.slane %v6437_v7, %v6182_v3  ;;  %v327_v43 = vld [vmem:[%s6170_s19 + $0xf8] sm:$0xff] }
  0xee   : > { %10457 = vst [vmem:[#allocation49_spill] sm:$0xff] %v7041_v9  ;;  %10459 = vst [vmem:[#allocation51_spill] sm:$0xff] %v7062_v50  ;;  %v10462_v42 = vrot.slane %v6437_v7, %v6179_v2  ;;  %v7077_v35 = vsub.f32 %v324_v5, %v835_v62  ;;  %v7081_v46 = vsub.f32 %v324_v5, %v827_v6  ;;  %v7093_v7 = vld [vmem:[%s10184_s5 + $0x18] sm:$0x7]  ;;  %v326_v34 = vld [vmem:[%s6170_s19 + $0xf0] sm:$0xff] }
  0xef   : > { %v599_v39 = vpop.permute.xlu1 %598  ;;  %v592_v24 = vpop.permute.xlu0 %591  ;;  %10460 = vst [vmem:[#allocation52_spill] sm:$0xff] %v7066_v41  ;;  %v7079_v61 = vsub.f32 %v325_v59, %v839_v58  ;;  %10466 = vst [vmem:[#allocation56_spill] sm:$0xff] %v7088_v49  ;;  %v7105_v11 = vsub.f32 %v325_v59, %v831_v56  ;;  %v7125_v59 = vld [vmem:[%s10184_s5 + $0x20] sm:$0x7] }
  0xf0   : > { %10463 = vst [vmem:[#allocation53_spill] sm:$0xff] %v7077_v35  ;;  %10465 = vst [vmem:[#allocation55_spill] sm:$0xff] %v7081_v46  ;;  %v851_v62 = vrot.slane %v599_v39, %v6179_v2  ;;  %v855_v58 = vrot.slane %v599_v39, %v6182_v3  ;;  %v843_v5 = vrot.slane %v592_v24, %v6179_v2 }
  0xf1   : > { %1772 = vbcast.lane.b32.xlu1 %v10461_v60, 256  ;;  %1765 = vbcast.lane.b32.xlu0 %v10462_v42, 256  ;;  %10464 = vst [vmem:[#allocation54_spill] sm:$0xff] %v7079_v61  ;;  %10467 = vst [vmem:[#allocation57_spill] sm:$0xff] %v7093_v7  ;;  %v847_v6 = vrot.slane %v592_v24, %v6182_v3  ;;  %v10469_v39 = vrot.slane %v6454_v14, %v6182_v3 }
  0xf2   : > { %10468 = vst [vmem:[#allocation58_spill] sm:$0xff] %v7105_v11  ;;  %v10470_v24 = vrot.slane %v6454_v14, %v6179_v2  ;;  %10472 = vst [vmem:[#allocation60_spill] sm:$0xff] %v7125_v59  ;;  %v7131_v46 = vsub.f32 %v326_v34, %v851_v62  ;;  %v7135_v7 = vsub.f32 %v326_v34, %v843_v5  ;;  %v10481_v5 = vld [vmem:[#allocation15_spill] sm:$0xff] }
  0xf3   : > { %v933_v60 = vpop.permute.xlu1 %932  ;;  %v926_v42 = vpop.permute.xlu0 %925  ;;  %v7137_v49 = vsub.f32 %v327_v43, %v847_v6  ;;  %v10478_v34 = vrot.slane %v6459_v15, %v6179_v2 }
  0xf4   : > { %v1155_v57 = vrot.slane %v933_v60, %v6179_v2  ;;  %v1159_v1 = vrot.slane %v933_v60, %v6182_v3  ;;  %v1147_v9 = vrot.slane %v926_v42, %v6179_v2  ;;  %v1151_v53 = vrot.slane %v926_v42, %v6182_v3  ;;  %v7120_v42 = vld [vmem:[%s10184_s5 + $0x24] sm:$0x7]  ;;  %10473 = vst [vmem:[#allocation61_spill] sm:$0xff] %v7131_v46 }
  0xf5   : > { %1786 = vbcast.lane.b32.xlu1 %v10469_v39, 256  ;;  %1779 = vbcast.lane.b32.xlu0 %v10470_v24, 256  ;;  %10471 = vst [vmem:[#allocation59_spill] sm:$0xff] %v7120_v42  ;;  %v7133_v60 = vsub.f32 %v327_v43, %v855_v58  ;;  %10475 = vst [vmem:[#allocation63_spill] sm:$0xff] %v7135_v7 }
  0xf6   : > { %v1402_v56 = vmul.f32 %v1155_v57, %v6713_v63  ;;  %v1403_v14 = vmul.f32 %v1159_v1, %v6715_v16  ;;  %v1400_v39 = vmul.f32 %v1147_v9, %v6688_v13  ;;  %v1401_v24 = vmul.f32 %v1151_v53, %v6692_v4  ;;  %10476 = vst [vmem:[#allocation64_spill] sm:$0xff] %v7137_v49  ;;  %v10482_v13 = vld [vmem:[#allocation13_spill] sm:$0xff]  ;;  %v10483_v63 = vld [vmem:[#allocation14_spill] sm:$0xff] }
  0xf7   : > { %10474 = vst [vmem:[#allocation62_spill] sm:$0xff] %v7133_v60  ;;  %v947_v11 = vpop.permute.xlu1 %946  ;;  %v940_v61 = vpop.permute.xlu0 %939  ;;  %v10477_v9 = vrot.slane %v6459_v15, %v6182_v3 }
  0xf8   : > { %v1466_v35 = vmul.f32 -0.5, %v1402_v56  ;;  %v1467_v41 = vmul.f32 -0.5, %v1403_v14  ;;  %v1171_v4 = vrot.slane %v947_v11, %v6179_v2  ;;  %v1175_v16 = vrot.slane %v947_v11, %v6182_v3 }
  0xf9   : > { %v1163_v53 = vrot.slane %v940_v61, %v6179_v2  ;;  %v1167_v1 = vrot.slane %v940_v61, %v6182_v3  ;;  %1800 = vbcast.lane.b32.xlu1 %v10477_v9, 256  ;;  %v1464_v57 = vmul.f32 -0.5, %v1400_v39  ;;  %v1465_v43 = vmul.f32 -0.5, %v1401_v24  ;;  %1793 = vbcast.lane.b32.xlu0 %v10478_v34, 256 }
  0xfa   : > { %v7153_v62 = vmul.f32 %v1466_v35, %v1402_v56  ;;  %v7155_v58 = vmul.f32 %v1467_v41, %v1403_v14  ;;  %v1406_v11 = vmul.f32 %v1171_v4, %v6704_v45  ;;  %v1407_v6 = vmul.f32 %v1175_v16, %v10481_v5  ;;  %v10484_v4 = vld [vmem:[#allocation9_spill] sm:$0xff]  ;;  %v10488_v5 = vld [vmem:[#allocation19_spill] sm:$0xff] }
  0xfb   : > { %v1404_v61 = vmul.f32 %v1163_v53, %v10482_v13  ;;  %v1405_v59 = vmul.f32 %v1167_v1, %v10483_v63  ;;  %v961_v42 = vpop.permute.xlu1 %960  ;;  %v954_v9 = vpop.permute.xlu0 %953  ;;  %v10485_v16 = vrot.slane %v10484_v4, %v6182_v3  ;;  %v10486_v13 = vld [vmem:[#allocation16_spill] sm:$0xff]  ;;  %v10487_v1 = vld [vmem:[#allocation18_spill] sm:$0xff]  ;;  %v7175_v60 = vmul.f32 %v1464_v57, %v1400_v39 }
  0xfc   : > { %10479 = vst [vmem:[#allocation65_spill] sm:$0xff] %v7153_v62  ;;  %10480 = vst [vmem:[#allocation66_spill] sm:$0xff] %v7155_v58  ;;  %v1187_v49 = vrot.slane %v961_v42, %v6179_v2  ;;  %v1191_v7 = vrot.slane %v961_v42, %v6182_v3  ;;  %v1179_v15 = vrot.slane %v954_v9, %v6179_v2  ;;  %v1470_v41 = vmul.f32 -0.5, %v1406_v11 }
  0xfd   : > { %v1183_v35 = vrot.slane %v954_v9, %v6182_v3  ;;  %v1471_v56 = vmul.f32 -0.5, %v1407_v6  ;;  %v1468_v14 = vmul.f32 -0.5, %v1404_v61  ;;  %v1469_v45 = vmul.f32 -0.5, %v1405_v59  ;;  %1814 = vbcast.lane.b32.xlu1 %v10485_v16, 256 }
  0xfe   : > { %v1410_v63 = vmul.f32 %v1187_v49, %v10486_v13  ;;  %v1411_v53 = vmul.f32 %v1191_v7, %v6749_v10  ;;  %v1408_v34 = vmul.f32 %v1179_v15, %v10487_v1  ;;  %v10489_v58 = vrot.slane %v10484_v4, %v6179_v2 }
  0xff   : > { %v1409_v42 = vmul.f32 %v1183_v35, %v10488_v5  ;;  %v975_v9 = vpop.permute.xlu1 %974  ;;  %v968_v62 = vpop.permute.xlu0 %967  ;;  %v7177_v46 = vmul.f32 %v1465_v43, %v1401_v24  ;;  %v7179_v50 = vmul.f32 %v1470_v41, %v1406_v11  ;;  %v7181_v16 = vmul.f32 %v1471_v56, %v1407_v6  ;;  %v10494_v56 = vld [vmem:[#allocation20_spill] sm:$0xff] }
 0x100   : > { %1807 = vbcast.lane.b32.xlu0 %v10489_v58, 256  ;;  %v1474_v49 = vmul.f32 -0.5, %v1410_v63  ;;  %v1475_v10 = vmul.f32 -0.5, %v1411_v53  ;;  %v7183_v7 = vmul.f32 %v1468_v14, %v1404_v61  ;;  %v7185_v15 = vmul.f32 %v1469_v45, %v1405_v59 }
 0x101   : > { %v1203_v35 = vrot.slane %v975_v9, %v6179_v2  ;;  %v1207_v58 = vrot.slane %v975_v9, %v6182_v3  ;;  %v1195_v4 = vrot.slane %v968_v62, %v6179_v2  ;;  %v1199_v39 = vrot.slane %v968_v62, %v6182_v3 }
 0x102   : > { %v10490_v24 = vrot.slane %v6477_v21, %v6179_v2  ;;  %v1472_v57 = vmul.f32 -0.5, %v1408_v34  ;;  %v1473_v43 = vmul.f32 -0.5, %v1409_v42  ;;  %v10491_v11 = vrot.slane %v6482_v22, %v6179_v2 }
 0x103   : > { %v7197_v59 = vmul.f32 %v1474_v49, %v1410_v63  ;;  %v7199_v6 = vmul.f32 %v1475_v10, %v1411_v53  ;;  %v1414_v61 = vmul.f32 %v1203_v35, %v6771_v38  ;;  %v1415_v41 = vmul.f32 %v1207_v58, %v6773_v19  ;;  %v989_v45 = vpop.permute.xlu1 %988  ;;  %v982_v13 = vpop.permute.xlu0 %981  ;;  %v10496_v58 = vld [vmem:[#allocation21_spill] sm:$0xff] }
 0x104   : > { %2348 = vbcast.lane.b32.xlu1 %v10490_v24, 256  ;;  %2341 = vbcast.lane.b32.xlu0 %v10491_v11, 256  ;;  %v1412_v62 = vmul.f32 %v1195_v4, %v6775_v12  ;;  %v1413_v14 = vmul.f32 %v1199_v39, %v10494_v56  ;;  %v1219_v1 = vrot.slane %v989_v45, %v6179_v2  ;;  %v10497_v39 = vld [vmem:[#allocation22_spill] sm:$0xff] }
 0x105   : > { %10492 = vst [vmem:[#allocation15_spill] sm:$0xff] %v7197_v59  ;;  %10493 = vst [vmem:[#allocation13_spill] sm:$0xff] %v7199_v6  ;;  %v1223_v5 = vrot.slane %v989_v45, %v6182_v3  ;;  %v1211_v9 = vrot.slane %v982_v13, %v6179_v2  ;;  %v1215_v63 = vrot.slane %v982_v13, %v6182_v3  ;;  %v1478_v53 = vmul.f32 -0.5, %v1414_v61 }
 0x106   : > { %v1479_v49 = vmul.f32 -0.5, %v1415_v41  ;;  %v1476_v10 = vmul.f32 -0.5, %v1412_v62  ;;  %v1477_v38 = vmul.f32 -0.5, %v1413_v14  ;;  %v10495_v19 = vrot.slane %v6487_v23, %v6179_v2 }
 0x107   : > { %v1418_v12 = vmul.f32 %v1219_v1, %v6791_v17  ;;  %v1419_v35 = vmul.f32 %v1223_v5, %v6793_v54  ;;  %v1416_v4 = vmul.f32 %v1211_v9, %v10496_v58  ;;  %v1417_v24 = vmul.f32 %v1215_v63, %v10497_v39  ;;  %v1003_v56 = vpop.permute.xlu1 %1002  ;;  %v996_v45 = vpop.permute.xlu0 %995  ;;  %v10511_v39 = vld [vmem:[#allocation25_spill] sm:$0xff] }
 0x108   : > { %2362 = vbcast.lane.b32.xlu1 %v10495_v19, 256  ;;  %v10498_v11 = vrot.slane %v6498_v27, %v6179_v2  ;;  %v7219_v13 = vmul.f32 %v1472_v57, %v1408_v34  ;;  %v7221_v6 = vmul.f32 %v1473_v43, %v1409_v42  ;;  %v7223_v59 = vmul.f32 %v1478_v53, %v1414_v61  ;;  %v10504_v42 = vld [vmem:[#allocation10_spill] sm:$0xff]  ;;  %v10509_v53 = vld [vmem:[#allocation23_spill] sm:$0xff] }
 0x109   : > { %v7225_v19 = vmul.f32 %v1479_v49, %v1415_v41  ;;  %v1482_v17 = vmul.f32 -0.5, %v1418_v12  ;;  %v1483_v54 = vmul.f32 -0.5, %v1419_v35  ;;  %v7227_v1 = vmul.f32 %v1476_v10, %v1412_v62  ;;  %v10510_v10 = vld [vmem:[#allocation24_spill] sm:$0xff] }
 0x10a   : > { %2355 = vbcast.lane.b32.xlu0 %v10498_v11, 256  ;;  %10499 = vst [vmem:[#allocation14_spill] sm:$0xff] %v7221_v6  ;;  %10500 = vst [vmem:[#allocation9_spill] sm:$0xff] %v7223_v59  ;;  %v7229_v5 = vmul.f32 %v1477_v38, %v1413_v14  ;;  %v1235_v9 = vrot.slane %v1003_v56, %v6179_v2  ;;  %v1239_v63 = vrot.slane %v1003_v56, %v6182_v3  ;;  %v10512_v56 = vld [vmem:[#allocation26_spill] sm:$0xff] }
 0x10b   : > { %10501 = vst [vmem:[#allocation16_spill] sm:$0xff] %v7225_v19  ;;  %10502 = vst [vmem:[#allocation18_spill] sm:$0xff] %v7227_v1  ;;  %v1227_v58 = vrot.slane %v996_v45, %v6179_v2  ;;  %v1231_v34 = vrot.slane %v996_v45, %v6182_v3  ;;  %v10505_v57 = vrot.slane %v10504_v42, %v6179_v2  ;;  %v1480_v43 = vmul.f32 -0.5, %v1416_v4 }
 0x10c   : > { %10503 = vst [vmem:[#allocation19_spill] sm:$0xff] %v7229_v5  ;;  %v1481_v61 = vmul.f32 -0.5, %v1417_v24  ;;  %v10506_v41 = vrot.slane %v6516_v33, %v6179_v2  ;;  %v7241_v62 = vmul.f32 %v1482_v17, %v1418_v12  ;;  %v7243_v14 = vmul.f32 %v1483_v54, %v1419_v35  ;;  %v1017_v5 = vpop.permute.xlu1 %1016 }
 0x10d   : > { %2376 = vbcast.lane.b32.xlu1 %v10505_v57, 256  ;;  %v1422_v49 = vmul.f32 %v1235_v9, %v10509_v53  ;;  %v1423_v38 = vmul.f32 %v1239_v63, %v10510_v10  ;;  %v1420_v11 = vmul.f32 %v1227_v58, %v10511_v39  ;;  %v1421_v45 = vmul.f32 %v1231_v34, %v10512_v56  ;;  %v1010_v57 = vpop.permute.xlu0 %1009  ;;  %v10514_v10 = vld [vmem:[#allocation27_spill] sm:$0xff] }
 0x10e   : > { %2369 = vbcast.lane.b32.xlu0 %v10506_v41, 256  ;;  %10507 = vst [vmem:[#allocation20_spill] sm:$0xff] %v7241_v62  ;;  %10508 = vst [vmem:[#allocation21_spill] sm:$0xff] %v7243_v14  ;;  %v1251_v1 = vrot.slane %v1017_v5, %v6179_v2  ;;  %v1255_v19 = vrot.slane %v1017_v5, %v6182_v3  ;;  %v1243_v41 = vrot.slane %v1010_v57, %v6179_v2 }
 0x10f   : > { %v1247_v12 = vrot.slane %v1010_v57, %v6182_v3  ;;  %v1486_v35 = vmul.f32 -0.5, %v1422_v49  ;;  %v1487_v17 = vmul.f32 -0.5, %v1423_v38  ;;  %v1484_v54 = vmul.f32 -0.5, %v1420_v11 }
 0x110   : > { %v1485_v9 = vmul.f32 -0.5, %v1421_v45  ;;  %v10513_v63 = vrot.slane %v6521_v36, %v6179_v2  ;;  %v1426_v58 = vmul.f32 %v1251_v1, %v6857_v0  ;;  %v1427_v34 = vmul.f32 %v1255_v19, %v6859_v44  ;;  %v1031_v56 = vpop.permute.xlu1 %1030 }
 0x111   : > { %v1424_v53 = vmul.f32 %v1243_v41, %v6861_v55  ;;  %v1425_v5 = vmul.f32 %v1247_v12, %v10514_v10  ;;  %v10515_v39 = vrot.slane %v6526_v37, %v6179_v2  ;;  %v1024_v57 = vpop.permute.xlu0 %1023  ;;  %v7263_v14 = vmul.f32 %v1480_v43, %v1416_v4 }
 0x112   : > { %2390 = vbcast.lane.b32.xlu1 %v10513_v63, 256  ;;  %v7265_v62 = vmul.f32 %v1481_v61, %v1417_v24  ;;  %v7267_v59 = vmul.f32 %v1486_v35, %v1422_v49  ;;  %v7269_v63 = vmul.f32 %v1487_v17, %v1423_v38  ;;  %v1490_v0 = vmul.f32 -0.5, %v1426_v58  ;;  %v10527_v17 = vld [vmem:[#allocation29_spill] sm:$0xff] }
 0x113   : > { %2383 = vbcast.lane.b32.xlu0 %v10515_v39, 256  ;;  %10516 = vst [vmem:[#allocation22_spill] sm:$0xff] %v7263_v14  ;;  %v1491_v44 = vmul.f32 -0.5, %v1427_v34  ;;  %v7271_v19 = vmul.f32 %v1484_v54, %v1420_v11  ;;  %v7273_v55 = vmul.f32 %v1485_v9, %v1421_v45  ;;  %v1267_v1 = vrot.slane %v1031_v56, %v6179_v2  ;;  %v10526_v45 = vld [vmem:[#allocation28_spill] sm:$0xff]  ;;  %v10528_v9 = vld [vmem:[#allocation30_spill] sm:$0xff]  ;;  %v10529_v39 = vld [vmem:[#allocation31_spill] sm:$0xff] }
 0x114   : > { %10517 = vst [vmem:[#allocation10_spill] sm:$0xff] %v7265_v62  ;;  %10518 = vst [vmem:[#allocation23_spill] sm:$0xff] %v7267_v59  ;;  %v1271_v41 = vrot.slane %v1031_v56, %v6182_v3  ;;  %v1259_v12 = vrot.slane %v1024_v57, %v6179_v2  ;;  %v1263_v4 = vrot.slane %v1024_v57, %v6182_v3  ;;  %v1488_v43 = vmul.f32 -0.5, %v1424_v53  ;;  %v1045_v57 = vpop.permute.xlu1 %1044 }
 0x115   : > { %10519 = vst [vmem:[#allocation24_spill] sm:$0xff] %v7269_v63  ;;  %10520 = vst [vmem:[#allocation25_spill] sm:$0xff] %v7271_v19  ;;  %v10522_v24 = vrot.slane %v6543_v32, %v6179_v2  ;;  %v1489_v61 = vmul.f32 -0.5, %v1425_v5  ;;  %v10523_v49 = vrot.slane %v6548_v31, %v6179_v2  ;;  %v7285_v38 = vmul.f32 %v1490_v0, %v1426_v58 }
 0x116   : > { %10521 = vst [vmem:[#allocation26_spill] sm:$0xff] %v7273_v55  ;;  %v7287_v11 = vmul.f32 %v1491_v44, %v1427_v34  ;;  %v1430_v35 = vmul.f32 %v1267_v1, %v10526_v45  ;;  %v1431_v54 = vmul.f32 %v1271_v41, %v10527_v17  ;;  %v1428_v10 = vmul.f32 %v1259_v12, %v10528_v9  ;;  %v10530_v45 = vld [vmem:[#allocation11_spill] sm:$0xff]  ;;  %v10532_v12 = vld [vmem:[#allocation32_spill] sm:$0xff]  ;;  %v10533_v17 = vld [vmem:[#allocation33_spill] sm:$0xff] }
 0x117   : > { %2404 = vbcast.lane.b32.xlu1 %v10522_v24, 256  ;;  %2397 = vbcast.lane.b32.xlu0 %v10523_v49, 256  ;;  %10524 = vst [vmem:[#allocation27_spill] sm:$0xff] %v7285_v38  ;;  %v1429_v56 = vmul.f32 %v1263_v4, %v10529_v39  ;;  %v1038_v24 = vpop.permute.xlu0 %1037  ;;  %v1283_v63 = vrot.slane %v1045_v57, %v6179_v2  ;;  %v10534_v39 = vld [vmem:[#allocation34_spill] sm:$0xff]  ;;  %v10535_v38 = vld [vmem:[#allocation35_spill] sm:$0xff] }
 0x118   : > { %10525 = vst [vmem:[#allocation67_spill] sm:$0xff] %v7287_v11  ;;  %v1287_v55 = vrot.slane %v1045_v57, %v6182_v3  ;;  %v1275_v49 = vrot.slane %v1038_v24, %v6179_v2  ;;  %v1279_v58 = vrot.slane %v1038_v24, %v6182_v3  ;;  %v1494_v34 = vmul.f32 -0.5, %v1430_v35  ;;  %v1059_v24 = vpop.permute.xlu1 %1058 }
 0x119   : > { %v1495_v0 = vmul.f32 -0.5, %v1431_v54  ;;  %v1492_v44 = vmul.f32 -0.5, %v1428_v10  ;;  %v1493_v1 = vmul.f32 -0.5, %v1429_v56  ;;  %v10531_v41 = vrot.slane %v10530_v45, %v6179_v2 }
 0x11a   : > { %v1434_v4 = vmul.f32 %v1283_v63, %v10532_v12  ;;  %v1435_v9 = vmul.f32 %v1287_v55, %v10533_v17  ;;  %v1432_v11 = vmul.f32 %v1275_v49, %v10534_v39  ;;  %v1433_v57 = vmul.f32 %v1279_v58, %v10535_v38 }
 0x11b   : > { %2418 = vbcast.lane.b32.xlu1 %v10531_v41, 256  ;;  %v10536_v19 = vrot.slane %v6566_v29, %v6179_v2  ;;  %v1052_v59 = vpop.permute.xlu0 %1051  ;;  %v7307_v62 = vmul.f32 %v1488_v43, %v1424_v53  ;;  %v7309_v14 = vmul.f32 %v1489_v61, %v1425_v5  ;;  %v7311_v6 = vmul.f32 %v1494_v34, %v1430_v35 }
 0x11c   : > { %v7313_v41 = vmul.f32 %v1495_v0, %v1431_v54  ;;  %v1498_v63 = vmul.f32 -0.5, %v1434_v4  ;;  %v1499_v55 = vmul.f32 -0.5, %v1435_v9  ;;  %v7315_v12 = vmul.f32 %v1492_v44, %v1428_v10  ;;  %v1073_v44 = vpop.permute.xlu1 %1072 }
 0x11d   : > { %2411 = vbcast.lane.b32.xlu0 %v10536_v19, 256  ;;  %v7317_v49 = vmul.f32 %v1493_v1, %v1429_v56  ;;  %v1299_v38 = vrot.slane %v1059_v24, %v6179_v2  ;;  %v1303_v19 = vrot.slane %v1059_v24, %v6182_v3  ;;  %v1291_v58 = vrot.slane %v1052_v59, %v6179_v2 }
 0x11e   : > { %10537 = vst [vmem:[#allocation28_spill] sm:$0xff] %v7313_v41  ;;  %10538 = vst [vmem:[#allocation29_spill] sm:$0xff] %v7315_v12  ;;  %v1295_v53 = vrot.slane %v1052_v59, %v6182_v3  ;;  %v10540_v5 = vrot.slane %v6571_v26, %v6179_v2  ;;  %v1496_v43 = vmul.f32 -0.5, %v1432_v11  ;;  %v1497_v61 = vmul.f32 -0.5, %v1433_v57 }
 0x11f   : > { %10539 = vst [vmem:[#allocation30_spill] sm:$0xff] %v7317_v49  ;;  %v10541_v35 = vrot.slane %v6576_v52, %v6179_v2  ;;  %v7329_v54 = vmul.f32 %v1498_v63, %v1434_v4  ;;  %v7331_v10 = vmul.f32 %v1499_v55, %v1435_v9  ;;  %v1438_v56 = vmul.f32 %v1299_v38, %v6941_v30  ;;  %v1066_v1 = vpop.permute.xlu0 %1065  ;;  %v10546_v38 = vld [vmem:[#allocation37_spill] sm:$0xff] }
 0x120   : > { %2432 = vbcast.lane.b32.xlu1 %v10540_v5, 256  ;;  %v1439_v34 = vmul.f32 %v1303_v19, %v6943_v48  ;;  %v1436_v59 = vmul.f32 %v1291_v58, %v6947_v18  ;;  %v1437_v0 = vmul.f32 %v1295_v53, %v6949_v40  ;;  %v1315_v17 = vrot.slane %v1073_v44, %v6179_v2  ;;  %v10545_v18 = vld [vmem:[#allocation36_spill] sm:$0xff]  ;;  %v10547_v58 = vld [vmem:[#allocation38_spill] sm:$0xff]  ;;  %v10548_v5 = vld [vmem:[#allocation39_spill] sm:$0xff] }
 0x121   : > { %2425 = vbcast.lane.b32.xlu0 %v10541_v35, 256  ;;  %10542 = vst [vmem:[#allocation31_spill] sm:$0xff] %v7329_v54  ;;  %10543 = vst [vmem:[#allocation11_spill] sm:$0xff] %v7331_v10  ;;  %v1319_v39 = vrot.slane %v1073_v44, %v6182_v3  ;;  %v1307_v24 = vrot.slane %v1066_v1, %v6179_v2  ;;  %v1311_v4 = vrot.slane %v1066_v1, %v6182_v3  ;;  %v10549_v44 = vld [vmem:[#allocation12_spill] sm:$0xff]  ;;  %v1087_v1 = vpop.permute.xlu1 %1086 }
 0x122   : > { %v1502_v9 = vmul.f32 -0.5, %v1438_v56  ;;  %v1503_v63 = vmul.f32 -0.5, %v1439_v34  ;;  %v1500_v55 = vmul.f32 -0.5, %v1436_v59  ;;  %v1501_v30 = vmul.f32 -0.5, %v1437_v0 }
 0x123   : > { %v10544_v48 = vrot.slane %v6593_v25, %v6179_v2  ;;  %v1442_v40 = vmul.f32 %v1315_v17, %v10545_v18  ;;  %v1443_v19 = vmul.f32 %v1319_v39, %v10546_v38  ;;  %v1440_v53 = vmul.f32 %v1307_v24, %v10547_v58  ;;  %v1080_v54 = vpop.permute.xlu0 %1079  ;;  %v10561_v58 = vld [vmem:[#allocation45_spill] sm:$0xff] }
 0x124   : > { %v1441_v35 = vmul.f32 %v1311_v4, %v10548_v5  ;;  %v10550_v10 = vrot.slane %v10549_v44, %v6179_v2  ;;  %v7351_v49 = vmul.f32 %v1496_v43, %v1432_v11  ;;  %v7353_v12 = vmul.f32 %v1497_v61, %v1433_v57 }
 0x125   : > { %2446 = vbcast.lane.b32.xlu1 %v10544_v48, 256  ;;  %v7355_v41 = vmul.f32 %v1502_v9, %v1438_v56  ;;  %v7357_v48 = vmul.f32 %v1503_v63, %v1439_v34  ;;  %v1506_v17 = vmul.f32 -0.5, %v1442_v40  ;;  %v1507_v39 = vmul.f32 -0.5, %v1443_v19  ;;  %v10559_v63 = vld [vmem:[#allocation41_spill] sm:$0xff] }
 0x126   : > { %2439 = vbcast.lane.b32.xlu0 %v10550_v10, 256  ;;  %10551 = vst [vmem:[#allocation32_spill] sm:$0xff] %v7353_v12  ;;  %v7359_v18 = vmul.f32 %v1500_v55, %v1436_v59  ;;  %v7361_v24 = vmul.f32 %v1501_v30, %v1437_v0  ;;  %v1331_v4 = vrot.slane %v1087_v1, %v6179_v2  ;;  %v1504_v43 = vmul.f32 -0.5, %v1440_v53  ;;  %v10558_v0 = vld [vmem:[#allocation40_spill] sm:$0xff] }
 0x127   : > { %v1335_v10 = vrot.slane %v1087_v1, %v6182_v3  ;;  %v1323_v38 = vrot.slane %v1080_v54, %v6179_v2  ;;  %v1327_v11 = vrot.slane %v1080_v54, %v6182_v3  ;;  %v10554_v57 = vrot.slane %v6477_v21, %v6182_v3  ;;  %v10560_v30 = vld [vmem:[#allocation44_spill] sm:$0xff]  ;;  %v1101_v1 = vpop.permute.xlu1 %1100 }
 0x128   : > { %10552 = vst [vmem:[#allocation33_spill] sm:$0xff] %v7359_v18  ;;  %10553 = vst [vmem:[#allocation34_spill] sm:$0xff] %v7361_v24  ;;  %v1505_v61 = vmul.f32 -0.5, %v1441_v35  ;;  %v10555_v56 = vrot.slane %v6482_v22, %v6182_v3  ;;  %v7373_v34 = vmul.f32 %v1506_v17, %v1442_v40  ;;  %v7375_v59 = vmul.f32 %v1507_v39, %v1443_v19 }
 0x129   : > { %2644 = vbcast.lane.b32.xlu1 %v10554_v57, 256  ;;  %v1446_v9 = vmul.f32 %v1331_v4, %v10558_v0  ;;  %v1447_v55 = vmul.f32 %v1335_v10, %v10559_v63  ;;  %v1444_v54 = vmul.f32 %v1323_v38, %v10560_v30  ;;  %v1445_v5 = vmul.f32 %v1327_v11, %v10561_v58  ;;  %v1094_v57 = vpop.permute.xlu0 %1093  ;;  %v10563_v38 = vld [vmem:[#allocation48_spill] sm:$0xff] }
 0x12a   : > { %2637 = vbcast.lane.b32.xlu0 %v10555_v56, 256  ;;  %10556 = vst [vmem:[#allocation35_spill] sm:$0xff] %v7373_v34  ;;  %10557 = vst [vmem:[#allocation36_spill] sm:$0xff] %v7375_v59  ;;  %v1347_v24 = vrot.slane %v1101_v1, %v6179_v2  ;;  %v1351_v12 = vrot.slane %v1101_v1, %v6182_v3  ;;  %v1339_v56 = vrot.slane %v1094_v57, %v6179_v2 }
 0x12b   : > { %v1343_v40 = vrot.slane %v1094_v57, %v6182_v3  ;;  %v1510_v19 = vmul.f32 -0.5, %v1446_v9  ;;  %v1511_v17 = vmul.f32 -0.5, %v1447_v55  ;;  %v1508_v39 = vmul.f32 -0.5, %v1444_v54  ;;  %v1115_v1 = vpop.permute.xlu1 %1114 }
 0x12c   : > { %v1509_v4 = vmul.f32 -0.5, %v1445_v5  ;;  %v10562_v10 = vrot.slane %v6487_v23, %v6182_v3  ;;  %v1450_v11 = vmul.f32 %v1347_v24, %v10563_v38  ;;  %v1451_v0 = vmul.f32 %v1351_v12, %v7043_v28 }
 0x12d   : > { %v1448_v63 = vmul.f32 %v1339_v56, %v7045_v20  ;;  %v1449_v30 = vmul.f32 %v1343_v40, %v7047_v51  ;;  %v10564_v58 = vrot.slane %v6498_v27, %v6182_v3  ;;  %v1108_v57 = vpop.permute.xlu0 %1107  ;;  %v7395_v59 = vmul.f32 %v1504_v43, %v1440_v53 }
 0x12e   : > { %2658 = vbcast.lane.b32.xlu1 %v10562_v10, 256  ;;  %v7397_v34 = vmul.f32 %v1505_v61, %v1441_v35  ;;  %v7399_v18 = vmul.f32 %v1510_v19, %v1446_v9  ;;  %v7401_v10 = vmul.f32 %v1511_v17, %v1447_v55  ;;  %v1514_v24 = vmul.f32 -0.5, %v1450_v11  ;;  %v10573_v17 = vld [vmem:[#allocation51_spill] sm:$0xff] }
 0x12f   : > { %2651 = vbcast.lane.b32.xlu0 %v10564_v58, 256  ;;  %v1515_v28 = vmul.f32 -0.5, %v1451_v0  ;;  %v7403_v12 = vmul.f32 %v1508_v39, %v1444_v54  ;;  %v7405_v20 = vmul.f32 %v1509_v4, %v1445_v5  ;;  %v1363_v51 = vrot.slane %v1115_v1, %v6179_v2  ;;  %v10574_v4 = vld [vmem:[#allocation52_spill] sm:$0xff]  ;;  %v1129_v58 = vpop.permute.xlu1 %1128 }
 0x130   : > { %10565 = vst [vmem:[#allocation37_spill] sm:$0xff] %v7397_v34  ;;  %10566 = vst [vmem:[#allocation38_spill] sm:$0xff] %v7401_v10  ;;  %v1367_v56 = vrot.slane %v1115_v1, %v6182_v3  ;;  %v1355_v40 = vrot.slane %v1108_v57, %v6179_v2  ;;  %v1359_v53 = vrot.slane %v1108_v57, %v6182_v3  ;;  %v1512_v43 = vmul.f32 -0.5, %v1448_v63 }
 0x131   : > { %10567 = vst [vmem:[#allocation39_spill] sm:$0xff] %v7403_v12  ;;  %10568 = vst [vmem:[#allocation12_spill] sm:$0xff] %v7405_v20  ;;  %v10569_v35 = vrot.slane %v10504_v42, %v6182_v3  ;;  %v1513_v61 = vmul.f32 -0.5, %v1449_v30  ;;  %v10570_v9 = vrot.slane %v6516_v33, %v6182_v3  ;;  %v7417_v55 = vmul.f32 %v1514_v24, %v1450_v11  ;;  %v1122_v1 = vpop.permute.xlu0 %1121 }
 0x132   : > { %v7419_v54 = vmul.f32 %v1515_v28, %v1451_v0  ;;  %v1454_v5 = vmul.f32 %v1363_v51, %v7058_v8  ;;  %v1455_v19 = vmul.f32 %v1367_v56, %v7060_v47  ;;  %v1452_v39 = vmul.f32 %v1355_v40, %v10573_v17  ;;  %v10576_v51 = vld [vmem:[#allocation53_spill] sm:$0xff]  ;;  %v10577_v40 = vld [vmem:[#allocation54_spill] sm:$0xff]  ;;  %v10578_v17 = vld [vmem:[#allocation55_spill] sm:$0xff] }
 0x133   : > { %2672 = vbcast.lane.b32.xlu1 %v10569_v35, 256  ;;  %2665 = vbcast.lane.b32.xlu0 %v10570_v9, 256  ;;  %10571 = vst [vmem:[#allocation40_spill] sm:$0xff] %v7417_v55  ;;  %v1453_v38 = vmul.f32 %v1359_v53, %v10574_v4  ;;  %v1379_v57 = vrot.slane %v1129_v58, %v6179_v2 }
 0x134   : > { %10572 = vst [vmem:[#allocation41_spill] sm:$0xff] %v7419_v54  ;;  %v1383_v35 = vrot.slane %v1129_v58, %v6182_v3  ;;  %v1371_v9 = vrot.slane %v1122_v1, %v6179_v2  ;;  %v1375_v11 = vrot.slane %v1122_v1, %v6182_v3  ;;  %v1518_v0 = vmul.f32 -0.5, %v1454_v5  ;;  %v10579_v54 = vld [vmem:[#allocation58_spill] sm:$0xff]  ;;  %v1143_v1 = vpop.permute.xlu1 %1142 }
 0x135   : > { %v1519_v24 = vmul.f32 -0.5, %v1455_v19  ;;  %v1516_v28 = vmul.f32 -0.5, %v1452_v39  ;;  %v1517_v8 = vmul.f32 -0.5, %v1453_v38  ;;  %v10575_v47 = vrot.slane %v6521_v36, %v6182_v3  ;;  %v1136_v20 = vpop.permute.xlu0 %1135 }
 0x136   : > { %v1458_v56 = vmul.f32 %v1379_v57, %v10576_v51  ;;  %v1459_v53 = vmul.f32 %v1383_v35, %v10577_v40  ;;  %v1456_v4 = vmul.f32 %v1371_v9, %v10578_v17  ;;  %v1457_v58 = vmul.f32 %v1375_v11, %v10579_v54  ;;  %v10592_v40 = vld [vmem:[#allocation64_spill] sm:$0xff] }
 0x137   : > { %2686 = vbcast.lane.b32.xlu1 %v10575_v47, 256  ;;  %v10580_v55 = vrot.slane %v6526_v37, %v6182_v3  ;;  %v7439_v34 = vmul.f32 %v1512_v43, %v1448_v63  ;;  %v7441_v12 = vmul.f32 %v1513_v61, %v1449_v30  ;;  %v7443_v10 = vmul.f32 %v1518_v0, %v1454_v5 }
 0x138   : > { %v7445_v47 = vmul.f32 %v1519_v24, %v1455_v19  ;;  %v1522_v57 = vmul.f32 -0.5, %v1458_v56  ;;  %v1523_v35 = vmul.f32 -0.5, %v1459_v53  ;;  %v7447_v51 = vmul.f32 %v1516_v28, %v1452_v39  ;;  %v10590_v24 = vld [vmem:[#allocation62_spill] sm:$0xff] }
 0x139   : > { %2679 = vbcast.lane.b32.xlu0 %v10580_v55, 256  ;;  %10581 = vst [vmem:[#allocation44_spill] sm:$0xff] %v7441_v12  ;;  %v7449_v9 = vmul.f32 %v1517_v8, %v1453_v38  ;;  %v1395_v54 = vrot.slane %v1143_v1, %v6179_v2  ;;  %v1399_v55 = vrot.slane %v1143_v1, %v6182_v3  ;;  %v1520_v43 = vmul.f32 -0.5, %v1456_v4  ;;  %v10589_v38 = vld [vmem:[#allocation61_spill] sm:$0xff]  ;;  %v10591_v8 = vld [vmem:[#allocation63_spill] sm:$0xff]  ;;  %v1605_v1 = vpop.permute.xlu1 %1604 }
 0x13a   : > { %10582 = vst [vmem:[#allocation45_spill] sm:$0xff] %v7445_v47  ;;  %10583 = vst [vmem:[#allocation48_spill] sm:$0xff] %v7447_v51  ;;  %v1387_v11 = vrot.slane %v1136_v20, %v6179_v2  ;;  %v1391_v63 = vrot.slane %v1136_v20, %v6182_v3  ;;  %v10585_v30 = vrot.slane %v6543_v32, %v6182_v3  ;;  %v1521_v61 = vmul.f32 -0.5, %v1457_v58  ;;  %v10628_v47 = vld [vmem:[#allocation18_spill] sm:$0xff]  ;;  %v10629_v12 = vld [vmem:[#allocation19_spill] sm:$0xff] }
 0x13b   : > { %10584 = vst [vmem:[#allocation51_spill] sm:$0xff] %v7449_v9  ;;  %v10586_v5 = vrot.slane %v6548_v31, %v6182_v3  ;;  %v7461_v19 = vmul.f32 %v1522_v57, %v1458_v56  ;;  %v7463_v39 = vmul.f32 %v1523_v35, %v1459_v53  ;;  %v1462_v0 = vmul.f32 %v1395_v54, %v10589_v38  ;;  %v10595_v38 = vld [vmem:[#allocation66_spill] sm:$0xff] }
 0x13c   : > { %2700 = vbcast.lane.b32.xlu1 %v10585_v30, 256  ;;  %v1463_v28 = vmul.f32 %v1399_v55, %v10590_v24  ;;  %v1460_v20 = vmul.f32 %v1387_v11, %v10591_v8  ;;  %v1461_v17 = vmul.f32 %v1391_v63, %v10592_v40  ;;  %v1598_v30 = vpop.permute.xlu0 %1597  ;;  %v1827_v9 = vrot.slane %v1605_v1, %v6179_v2  ;;  %v10594_v11 = vld [vmem:[#allocation65_spill] sm:$0xff] }
 0x13d   : > { %2693 = vbcast.lane.b32.xlu0 %v10586_v5, 256  ;;  %10587 = vst [vmem:[#allocation52_spill] sm:$0xff] %v7461_v19  ;;  %10588 = vst [vmem:[#allocation53_spill] sm:$0xff] %v7463_v39  ;;  %v1831_v51 = vrot.slane %v1605_v1, %v6182_v3  ;;  %v1819_v5 = vrot.slane %v1598_v30, %v6179_v2  ;;  %v1823_v56 = vrot.slane %v1598_v30, %v6182_v3  ;;  %v7488_v30 = vld [vmem:[%s10184_s5 + $0x2c] sm:$0x7]  ;;  %v10627_v39 = vld [vmem:[#allocation16_spill] sm:$0xff] }
 0x13e   : > { %v1526_v53 = vmul.f32 -0.5, %v1462_v0  ;;  %v1527_v57 = vmul.f32 -0.5, %v1463_v28  ;;  %v1524_v35 = vmul.f32 -0.5, %v1460_v20  ;;  %v1525_v54 = vmul.f32 -0.5, %v1461_v17  ;;  %10599 = vst [vmem:[#allocation58_spill] sm:$0xff] %v7488_v30 }
 0x13f   : > { %v10593_v55 = vrot.slane %v10530_v45, %v6182_v3  ;;  %v2074_v63 = vadd.f32 %v1827_v9, %v10594_v11  ;;  %v2075_v24 = vadd.f32 %v1831_v51, %v10595_v38  ;;  %v10596_v8 = vrot.slane %v6566_v29, %v6182_v3  ;;  %v1619_v11 = vpop.permute.xlu1 %1618 }
 0x140   : > { %v7481_v40 = vmul.f32 %v1520_v43, %v1456_v4  ;;  %v7483_v1 = vmul.f32 %v1521_v61, %v1457_v58  ;;  %v2072_v51 = vadd.f32 %v1819_v5, %v7175_v60  ;;  %v2073_v9 = vadd.f32 %v1823_v56, %v7177_v46  ;;  %v1612_v38 = vpop.permute.xlu0 %1611  ;;  %v7504_v43 = vld [vmem:[%s10184_s5 + $0x34] sm:$0x7]  ;;  %v7513_v46 = vld [vmem:[%s10184_s5 + $0x30] sm:$0x7] }
 0x141   : > { %2714 = vbcast.lane.b32.xlu1 %v10593_v55, 256  ;;  %2707 = vbcast.lane.b32.xlu0 %v10596_v8, 256  ;;  %v7493_v55 = vld [vmem:[%s10184_s5 + $0x28] sm:$0x7]  ;;  %v7497_v4 = vmul.f32 %v1526_v53, %v1462_v0  ;;  %v7499_v58 = vmul.f32 %v1527_v57, %v1463_v28  ;;  %10603 = vst [vmem:[#allocation64_spill] sm:$0xff] %v7504_v43  ;;  %10604 = vst [vmem:[#allocation65_spill] sm:$0xff] %v7513_v46 }
 0x142   : > { %10597 = vst [vmem:[#allocation54_spill] sm:$0xff] %v7481_v40  ;;  %10598 = vst [vmem:[#allocation55_spill] sm:$0xff] %v7483_v1  ;;  %v1843_v61 = vrot.slane %v1619_v11, %v6179_v2  ;;  %v1847_v8 = vrot.slane %v1619_v11, %v6182_v3  ;;  %v1835_v1 = vrot.slane %v1612_v38, %v6179_v2  ;;  %v7518_v0 = vld [vmem:[%s10184_s5 + $0x3c] sm:$0x7]  ;;  %v7523_v28 = vld [vmem:[%s10184_s5 + $0x38] sm:$0x7] }
 0x143   : > { %10600 = vst [vmem:[#allocation61_spill] sm:$0xff] %v7493_v55  ;;  %10601 = vst [vmem:[#allocation62_spill] sm:$0xff] %v7497_v4  ;;  %v1839_v60 = vrot.slane %v1612_v38, %v6182_v3  ;;  %v10607_v5 = vrot.slane %v6571_v26, %v6182_v3  ;;  %v7528_v56 = vmul.f32 %v1524_v35, %v1460_v20  ;;  %v7539_v38 = vld [vmem:[%s10184_s5 + $0x44] sm:$0x7]  ;;  %v1633_v11 = vpop.permute.xlu1 %1632  ;;  %v10626_v40 = vld [vmem:[#allocation9_spill] sm:$0xff] }
 0x144   : > { %10602 = vst [vmem:[#allocation63_spill] sm:$0xff] %v7499_v58  ;;  %10605 = vst [vmem:[#allocation66_spill] sm:$0xff] %v7518_v0  ;;  %v7530_v53 = vmul.f32 %v1525_v54, %v1461_v17  ;;  %v7544_v58 = vld [vmem:[%s10184_s5 + $0x40] sm:$0x7]  ;;  %v2078_v20 = vadd.f32 %v1843_v61, %v7179_v50  ;;  %v2079_v17 = vadd.f32 %v1847_v8, %v7181_v16  ;;  %v1626_v57 = vpop.permute.xlu0 %1625  ;;  %v10617_v16 = vld [vmem:[#allocation15_spill] sm:$0xff] }
 0x145   : > { %10606 = vst [vmem:[#allocation68_spill] sm:$0xff] %v7523_v28  ;;  %2728 = vbcast.lane.b32.xlu1 %v10607_v5, 256  ;;  %10608 = vst [vmem:[#allocation69_spill] sm:$0xff] %v7528_v56  ;;  %v2076_v35 = vadd.f32 %v1835_v1, %v7183_v7  ;;  %v2077_v54 = vadd.f32 %v1839_v60, %v7185_v15  ;;  %v10612_v5 = vrot.slane %v6576_v52, %v6182_v3  ;;  %v10616_v1 = vld [vmem:[#allocation43_spill] sm:$0xff]  ;;  %v10632_v46 = vld [vmem:[#allocation57_spill] sm:$0xff] }
 0x146   : > { %10609 = vst [vmem:[#allocation70_spill] sm:$0xff] %v7530_v53  ;;  %10610 = vst [vmem:[#allocation71_spill] sm:$0xff] %v7539_v38  ;;  %v2138_v7 = vadd.f32 %v2078_v20, %v2074_v63  ;;  %v2139_v15 = vadd.f32 %v2079_v17, %v2075_v24  ;;  %v1859_v8 = vrot.slane %v1633_v11, %v6179_v2  ;;  %v10615_v17 = vld [vmem:[#allocation42_spill] sm:$0xff]  ;;  %v10639_v4 = vld [vmem:[#allocation20_spill] sm:$0xff] }
 0x147   : > { %10611 = vst [vmem:[#allocation72_spill] sm:$0xff] %v7544_v58  ;;  %2721 = vbcast.lane.b32.xlu0 %v10612_v5, 256  ;;  %v1863_v60 = vrot.slane %v1633_v11, %v6182_v3  ;;  %v1851_v5 = vrot.slane %v1626_v57, %v6179_v2  ;;  %v1855_v56 = vrot.slane %v1626_v57, %v6182_v3  ;;  %v10618_v58 = vld [vmem:[#allocation13_spill] sm:$0xff]  ;;  %v1647_v38 = vpop.permute.xlu1 %1646 }
 0x148   : > { %v10613_v50 = vrot.slane %v6593_v25, %v6182_v3  ;;  %v2136_v63 = vadd.f32 %v2076_v35, %v2072_v51  ;;  %v2137_v24 = vadd.f32 %v2077_v54, %v2073_v9  ;;  %v10614_v20 = vrot.slane %v10549_v44, %v6182_v3  ;;  %v1640_v28 = vpop.permute.xlu0 %1639  ;;  %v10620_v9 = vld [vmem:[#allocation47_spill] sm:$0xff]  ;;  %v10624_v51 = vld [vmem:[#allocation49_spill] sm:$0xff]  ;;  %v10625_v35 = vld [vmem:[#allocation50_spill] sm:$0xff] }
 0x149   : > { %v2082_v53 = vadd.f32 %v1859_v8, %v10617_v16  ;;  %v2083_v57 = vadd.f32 %v1863_v60, %v10618_v58  ;;  %v1875_v54 = vrot.slane %v1647_v38, %v6179_v2  ;;  %v1867_v61 = vrot.slane %v1640_v28, %v6179_v2  ;;  %v10621_v8 = vld [vmem:[#allocation14_spill] sm:$0xff]  ;;  %v10622_v60 = vld [vmem:[#allocation17_spill] sm:$0xff] }
 0x14a   : > { %2742 = vbcast.lane.b32.xlu1 %v10613_v50, 256  ;;  %v10619_v50 = vld [vmem:[#allocation46_spill] sm:$0xff]  ;;  %v1871_v11 = vrot.slane %v1640_v28, %v6182_v3  ;;  %v2080_v16 = vadd.f32 %v1851_v5, %v7219_v13  ;;  %v2081_v58 = vadd.f32 %v1855_v56, %v10621_v8  ;;  %v10623_v0 = vrot.slane %v6477_v21, %v10622_v60  ;;  %v10631_v5 = vld [vmem:[#allocation56_spill] sm:$0xff]  ;;  %v10640_v55 = vld [vmem:[#allocation21_spill] sm:$0xff] }
 0x14b   : > { %2735 = vbcast.lane.b32.xlu0 %v10614_v20, 256  ;;  %v1879_v20 = vrot.slane %v1647_v38, %v6182_v3  ;;  %v2086_v38 = vadd.f32 %v1875_v54, %v10626_v40  ;;  %v2084_v28 = vadd.f32 %v1867_v61, %v10628_v47  ;;  %v10630_v56 = vrot.slane %v6482_v22, %v10622_v60  ;;  %v1661_v21 = vpop.permute.xlu1 %1660 }
 0x14c   : > { %v2085_v13 = vadd.f32 %v1871_v11, %v10629_v12  ;;  %v1891_v22 = vrot.slane %v1661_v21, %v6179_v2  ;;  %v10635_v8 = vrot.slane %v6487_v23, %v10622_v60 }
 0x14d   : > { %v2087_v19 = vadd.f32 %v1879_v20, %v10627_v39  ;;  %v10634_v39 = vld [vmem:[#allocation60_spill] sm:$0xff]  ;;  %v2142_v61 = vadd.f32 %v2086_v38, %v2082_v53  ;;  %v2140_v11 = vadd.f32 %v2084_v28, %v2080_v16  ;;  %v10638_v16 = vrot.slane %v6498_v27, %v10622_v60 }
 0x14e   : > { %2940 = vbcast.lane.b32.xlu1 %v10623_v0, 256  ;;  %v1654_v0 = vpop.permute.xlu0 %1653  ;;  %v2141_v20 = vadd.f32 %v2085_v13, %v2081_v58  ;;  %v2090_v47 = vadd.f32 %v1891_v22, %v10639_v4 }
 0x14f   : > { %2933 = vbcast.lane.b32.xlu0 %v10630_v56, 256  ;;  %v2143_v12 = vadd.f32 %v2087_v19, %v2083_v57  ;;  %v1895_v56 = vrot.slane %v1661_v21, %v6182_v3  ;;  %v7622_v40 = vadd.f32 %v2142_v61, %v2136_v63  ;;  %v1883_v19 = vrot.slane %v1654_v0, %v6179_v2  ;;  %v1675_v13 = vpop.permute.xlu1 %1674 }
 0x150   : > { %v1887_v57 = vrot.slane %v1654_v0, %v6182_v3  ;;  %v7631_v23 = vadd.f32 %v2142_v61, %v2138_v7  ;;  %v2168_v38 = vadd.f32 %v2140_v11, %v2136_v63  ;;  %v2169_v28 = vadd.f32 %v2141_v20, %v2137_v24 }
 0x151   : > { %10636 = vst [vmem:[#allocation42_spill] sm:$0xff] %v7622_v40  ;;  %v7624_v53 = vadd.f32 %v2143_v12, %v2137_v24  ;;  %v7633_v58 = vadd.f32 %v2143_v12, %v2139_v15  ;;  %v2173_v54 = vadd.f32 %v2141_v20, %v2139_v15  ;;  %v7637_v30 = vadd.f32 %v1895_v56, %v10640_v55  ;;  %v10642_v24 = vld [vmem:[#allocation22_spill] sm:$0xff] }
 0x152   : > { %2954 = vbcast.lane.b32.xlu1 %v10635_v8, 256  ;;  %v1668_v21 = vpop.permute.xlu0 %1667  ;;  %v2172_v8 = vadd.f32 %v2140_v11, %v2138_v7  ;;  %v2216_v0 = vmax.f32 %v2168_v38, %v7622_v40  ;;  %v1907_v61 = vrot.slane %v1675_v13, %v6179_v2  ;;  %v1911_v12 = vrot.slane %v1675_v13, %v6182_v3  ;;  %v10643_v15 = vld [vmem:[#allocation10_spill] sm:$0xff] }
 0x153   : > { %10637 = vst [vmem:[#allocation43_spill] sm:$0xff] %v7624_v53  ;;  %2947 = vbcast.lane.b32.xlu0 %v10638_v16, 256  ;;  %v2219_v27 = vmax.f32 %v2169_v28, %v7624_v53  ;;  %v10641_v63 = vrot.slane %v10504_v42, %v10622_v60  ;;  %v2088_v7 = vadd.f32 %v1883_v19, %v10642_v24  ;;  %v10645_v16 = vld [vmem:[#allocation23_spill] sm:$0xff]  ;;  %v1689_v53 = vpop.permute.xlu1 %1688  ;;  %v10646_v19 = vld [vmem:[#allocation25_spill] sm:$0xff] }
 0x154   : > { %v2089_v11 = vadd.f32 %v1887_v57, %v10643_v15  ;;  %v1899_v4 = vrot.slane %v1668_v21, %v6179_v2  ;;  %v1903_v55 = vrot.slane %v1668_v21, %v6182_v3  ;;  %v10644_v20 = vrot.slane %v6516_v33, %v10622_v60  ;;  %v10647_v57 = vld [vmem:[#allocation26_spill] sm:$0xff]  ;;  %v10653_v42 = vld [vmem:[#allocation67_spill] sm:$0xff] }
 0x155   : > { %v2217_v22 = vmax.f32 %v2216_v0, %v2172_v8  ;;  %v2220_v56 = vmax.f32 %v2219_v27, %v2173_v54  ;;  %v2094_v13 = vadd.f32 %v1907_v61, %v10645_v16  ;;  %v1923_v15 = vrot.slane %v1689_v53, %v6179_v2  ;;  %v10650_v27 = vld [vmem:[#allocation24_spill] sm:$0xff] }
 0x156   : > { %2968 = vbcast.lane.b32.xlu1 %v10641_v63, 256  ;;  %v1682_v40 = vpop.permute.xlu0 %1681  ;;  %v2092_v63 = vadd.f32 %v1899_v4, %v10646_v19  ;;  %v2093_v24 = vadd.f32 %v1903_v55, %v10647_v57  ;;  %v1927_v21 = vrot.slane %v1689_v53, %v6182_v3  ;;  %v2095_v61 = vadd.f32 %v1911_v12, %v10650_v27  ;;  %v10652_v55 = vld [vmem:[#allocation27_spill] sm:$0xff] }
 0x157   : > { %2961 = vbcast.lane.b32.xlu0 %v10644_v20, 256  ;;  %v7661_v33 = vmax.f32 %v2217_v22, %v7631_v23  ;;  %v7664_v0 = vmax.f32 %v2220_v56, %v7633_v58  ;;  %v2146_v20 = vadd.f32 %v2094_v13, %v2090_v47  ;;  %v10651_v16 = vrot.slane %v6521_v36, %v10622_v60  ;;  %v1703_v36 = vpop.permute.xlu1 %1702 }
 0x158   : > { %v2144_v4 = vadd.f32 %v2092_v63, %v2088_v7  ;;  %v2145_v19 = vadd.f32 %v2093_v24, %v2089_v11  ;;  %v2098_v57 = vadd.f32 %v1923_v15, %v10652_v55  ;;  %v2099_v43 = vadd.f32 %v1927_v21, %v10653_v42 }
 0x159   : > { %10648 = vst [vmem:[#allocation15_spill] sm:$0xff] %v7661_v33  ;;  %10649 = vst [vmem:[#allocation13_spill] sm:$0xff] %v7664_v0  ;;  %v10654_v53 = vrot.slane %v6526_v37, %v10622_v60  ;;  %v2240_v22 = vsub.f32 %v2168_v38, %v7661_v33  ;;  %v2241_v56 = vsub.f32 %v2169_v28, %v7664_v0 }
 0x15a   : > { %2982 = vbcast.lane.b32.xlu1 %v10651_v16, 256  ;;  %v2244_v47 = vsub.f32 %v2172_v8, %v7661_v33  ;;  %v2245_v12 = vsub.f32 %v2173_v54, %v7664_v0  ;;  %v1696_v13 = vpop.permute.xlu0 %1695  ;;  %v1915_v7 = vrot.slane %v1682_v40, %v6179_v2  ;;  %v1919_v11 = vrot.slane %v1682_v40, %v6182_v3  ;;  %v10657_v16 = vld [vmem:[#allocation28_spill] sm:$0xff] }
 0x15b   : > { %2975 = vbcast.lane.b32.xlu0 %v10654_v53, 256  ;;  %v1939_v42 = vrot.slane %v1703_v36, %v6179_v2  ;;  %v1943_v63 = vrot.slane %v1703_v36, %v6182_v3  ;;  %v2272_v37 = vmul.f32 1.442695, %v2240_v22  ;;  %v2274_v24 = vmul.f32 1.442695, %v2241_v56  ;;  %v10658_v22 = vld [vmem:[#allocation29_spill] sm:$0xff] }
 0x15c   : > { %v2280_v15 = vmul.f32 1.442695, %v2244_v47  ;;  %v1931_v38 = vrot.slane %v1696_v13, %v6179_v2  ;;  %v2282_v28 = vmul.f32 1.442695, %v2245_v12  ;;  %v2096_v8 = vadd.f32 %v1915_v7, %v7307_v62  ;;  %v1717_v62 = vpop.permute.xlu1 %1716  ;;  %v10659_v36 = vld [vmem:[#allocation30_spill] sm:$0xff] }
 0x15d   : > { %v2097_v54 = vadd.f32 %v1919_v11, %v7309_v14  ;;  %v2102_v21 = vadd.f32 %v1939_v42, %v7311_v6  ;;  %v10655_v27 = vrot.slane %v6543_v32, %v10622_v60  ;;  %v10656_v40 = vrot.slane %v6548_v31, %v10622_v60 }
 0x15e   : > { %5647 = vpow2.f32 %v2272_v37  ;;  %v2103_v55 = vadd.f32 %v1943_v63, %v10657_v16  ;;  %v1935_v53 = vrot.slane %v1696_v13, %v6182_v3  ;;  %v2100_v56 = vadd.f32 %v1931_v38, %v10658_v22  ;;  %v1710_v47 = vpop.permute.xlu0 %1709 }
 0x15f   : > { %2996 = vbcast.lane.b32.xlu1 %v10655_v27, 256  ;;  %2989 = vbcast.lane.b32.xlu0 %v10656_v40, 256  ;;  %5649 = vpow2.f32 %v2274_v24  ;;  %v2150_v14 = vadd.f32 %v2102_v21, %v2098_v57  ;;  %v1955_v6 = vrot.slane %v1717_v62, %v6179_v2  ;;  %v1959_v32 = vrot.slane %v1717_v62, %v6182_v3  ;;  %v10663_v21 = vld [vmem:[#allocation11_spill] sm:$0xff] }
 0x160   : > { %5651 = vpow2.f32 %v2280_v15  ;;  %v2151_v12 = vadd.f32 %v2103_v55, %v2099_v43  ;;  %v2101_v31 = vadd.f32 %v1935_v53, %v10659_v36  ;;  %v2148_v7 = vadd.f32 %v2100_v56, %v2096_v8  ;;  %v10662_v15 = vld [vmem:[#allocation31_spill] sm:$0xff] }
 0x161   : > { %5653 = vpow2.f32 %v2282_v28  ;;  %v2147_v11 = vadd.f32 %v2095_v61, %v7637_v30  ;;  %v7700_v42 = vadd.f32 %v2150_v14, %v2144_v4  ;;  %v7702_v13 = vadd.f32 %v2150_v14, %v2146_v20  ;;  %v1731_v28 = vpop.permute.xlu1 %1730 }
 0x162   : > { %v10660_v63 = vrot.slane %v10530_v45, %v10622_v60  ;;  %v10661_v57 = vrot.slane %v6566_v29, %v10622_v60  ;;  %v7710_v37 = vadd.f32 %v2151_v12, %v2145_v19  ;;  %v2149_v43 = vadd.f32 %v2101_v31, %v2097_v54  ;;  %v1724_v30 = vpop.permute.xlu0 %1723 }
 0x163   : > { %v2176_v24 = vadd.f32 %v2148_v7, %v2144_v4  ;;  %v2106_v38 = vadd.f32 %v1955_v6, %v10662_v15  ;;  %v7713_v61 = vadd.f32 %v2151_v12, %v2147_v11  ;;  %v2180_v8 = vadd.f32 %v2148_v7, %v2146_v20  ;;  %v10666_v12 = vld [vmem:[#allocation33_spill] sm:$0xff] }
 0x164   : > { %3010 = vbcast.lane.b32.xlu1 %v10660_v63, 256  ;;  %3003 = vbcast.lane.b32.xlu0 %v10661_v57, 256  ;;  %v2107_v27 = vadd.f32 %v1959_v32, %v10663_v21  ;;  %v1947_v45 = vrot.slane %v1710_v47, %v6179_v2  ;;  %v2177_v40 = vadd.f32 %v2149_v43, %v2145_v19  ;;  %v10668_v57 = vld [vmem:[#allocation34_spill] sm:$0xff] }
 0x165   : > { %v2222_v16 = vmax.f32 %v2176_v24, %v7700_v42  ;;  %v1951_v29 = vrot.slane %v1710_v47, %v6182_v3  ;;  %v1971_v55 = vrot.slane %v1731_v28, %v6179_v2  ;;  %v2181_v54 = vadd.f32 %v2149_v43, %v2147_v11  ;;  %v10667_v11 = vld [vmem:[#allocation32_spill] sm:$0xff] }
 0x166   : > { %v2104_v4 = vadd.f32 %v1947_v45, %v7351_v49  ;;  %v1975_v53 = vrot.slane %v1731_v28, %v6182_v3  ;;  %v1963_v22 = vrot.slane %v1724_v30, %v6179_v2  ;;  %v10664_v20 = vrot.slane %v6571_v26, %v10622_v60  ;;  %v1745_v49 = vpop.permute.xlu1 %1744  ;;  %v1738_v6 = vpop.permute.xlu0 %1737 }
 0x167   : > { %v2223_v56 = vmax.f32 %v2222_v16, %v2180_v8  ;;  %v2225_v19 = vmax.f32 %v2177_v40, %v7710_v37  ;;  %v2110_v62 = vadd.f32 %v1971_v55, %v7355_v41  ;;  %v1967_v47 = vrot.slane %v1724_v30, %v6182_v3  ;;  %v10672_v55 = vld [vmem:[#allocation36_spill] sm:$0xff] }
 0x168   : > { %3024 = vbcast.lane.b32.xlu1 %v10664_v20, 256  ;;  %v10665_v14 = vrot.slane %v6576_v52, %v10622_v60  ;;  %v2111_v32 = vadd.f32 %v1975_v53, %v7357_v48  ;;  %v2108_v36 = vadd.f32 %v1963_v22, %v10666_v12  ;;  %v1987_v26 = vrot.slane %v1745_v49, %v6179_v2  ;;  %v10669_v48 = vld [vmem:[#allocation35_spill] sm:$0xff] }
 0x169   : > { %v1991_v31 = vrot.slane %v1745_v49, %v6182_v3  ;;  %v7737_v7 = vmax.f32 %v2223_v56, %v7702_v13  ;;  %v2226_v41 = vmax.f32 %v2225_v19, %v2181_v54  ;;  %v2105_v63 = vadd.f32 %v1951_v29, %v10667_v11 }
 0x16a   : > { %3017 = vbcast.lane.b32.xlu0 %v10665_v14, 256  ;;  %v2109_v43 = vadd.f32 %v1967_v47, %v10668_v57  ;;  %v7741_v52 = vadd.f32 %v2110_v62, %v2106_v38  ;;  %v7743_v15 = vadd.f32 %v2111_v32, %v2107_v27  ;;  %v2152_v28 = vadd.f32 %v2108_v36, %v2104_v4  ;;  %v1759_v27 = vpop.permute.xlu1 %1758  ;;  %v1752_v4 = vpop.permute.xlu0 %1751  ;;  %v10676_v36 = vld [vmem:[#allocation38_spill] sm:$0xff] }
 0x16b   : > { %v2114_v30 = vadd.f32 %v1987_v26, %v10669_v48  ;;  %v10670_v21 = vrot.slane %v6593_v25, %v10622_v60  ;;  %v7750_v45 = vmax.f32 %v2226_v41, %v7713_v61  ;;  %v2248_v16 = vsub.f32 %v2176_v24, %v7737_v7  ;;  %v7758_v22 = vpop.eup %5647  ;;  %v10679_v48 = vld [vmem:[#allocation39_spill] sm:$0xff] }
 0x16c   : > { %v2252_v29 = vsub.f32 %v2180_v8, %v7737_v7  ;;  %v2115_v53 = vadd.f32 %v1991_v31, %v10672_v55  ;;  %v10673_v38 = vrot.slane %v10549_v44, %v10622_v60  ;;  %10674 = vst [vmem:[#allocation47_spill] sm:$0xff] %v7758_v22  ;;  %v2153_v20 = vadd.f32 %v2109_v43, %v2105_v63  ;;  %v7763_v24 = vpop.eup %5649  ;;  %v10680_v55 = vld [vmem:[#allocation37_spill] sm:$0xff] }
 0x16d   : > { %3038 = vbcast.lane.b32.xlu1 %v10670_v21, 256  ;;  %10671 = vst [vmem:[#allocation46_spill] sm:$0xff] %v7750_v45  ;;  %v1979_v25 = vrot.slane %v1738_v6, %v6179_v2  ;;  %v2003_v56 = vrot.slane %v1759_v27, %v6179_v2  ;;  %v2007_v19 = vrot.slane %v1759_v27, %v6182_v3  ;;  %v2288_v47 = vmul.f32 1.442695, %v2248_v16  ;;  %v7767_v14 = vpop.eup %5651 }
 0x16e   : > { %3031 = vbcast.lane.b32.xlu0 %v10673_v38, 256  ;;  %v2249_v8 = vsub.f32 %v2177_v40, %v7750_v45  ;;  %v2253_v62 = vsub.f32 %v2181_v54, %v7750_v45  ;;  %v2296_v44 = vmul.f32 1.442695, %v2252_v29  ;;  %10675 = vst [vmem:[#allocation14_spill] sm:$0xff] %v7767_v14  ;;  %v1983_v49 = vrot.slane %v1738_v6, %v6182_v3  ;;  %v7776_v41 = vpop.eup %5653  ;;  %v1766_v63 = vpop.permute.xlu0 %1765 }
 0x16f   : > { %v2112_v32 = vadd.f32 %v1979_v25, %v7395_v59  ;;  %v2118_v12 = vadd.f32 %v2003_v56, %v7399_v18  ;;  %v2119_v26 = vadd.f32 %v2007_v19, %v10676_v36  ;;  %v10677_v31 = vrot.slane %v10615_v17, %v6179_v2  ;;  %v1773_v59 = vpop.permute.xlu1 %1772  ;;  %v10682_v56 = vld [vmem:[#allocation12_spill] sm:$0xff] }
 0x170   : > { %5655 = vpow2.f32 %v2288_v47  ;;  %v2290_v40 = vmul.f32 1.442695, %v2249_v8  ;;  %v2298_v54 = vmul.f32 1.442695, %v2253_v62  ;;  %v1995_v11 = vrot.slane %v1752_v4, %v6179_v2 }
 0x171   : > { %3502 = vbcast.lane.b32.xlu1 %v10677_v31, 256  ;;  %v10678_v6 = vrot.slane %v10616_v1, %v6179_v2  ;;  %5657 = vpow2.f32 %v2296_v44  ;;  %v2158_v18 = vadd.f32 %v2118_v12, %v2114_v30  ;;  %v2159_v57 = vadd.f32 %v2119_v26, %v2115_v53 }
 0x172   : > { %v1999_v43 = vrot.slane %v1752_v4, %v6182_v3  ;;  %5659 = vpow2.f32 %v2290_v40  ;;  %v2116_v21 = vadd.f32 %v1995_v11, %v10679_v48  ;;  %v2019_v16 = vrot.slane %v1773_v59, %v6179_v2  ;;  %v1780_v44 = vpop.permute.xlu0 %1779  ;;  %v10685_v11 = vld [vmem:[#allocation41_spill] sm:$0xff] }
 0x173   : > { %3495 = vbcast.lane.b32.xlu0 %v10678_v6, 256  ;;  %v2023_v29 = vrot.slane %v1773_v59, %v6182_v3  ;;  %5661 = vpow2.f32 %v2298_v54  ;;  %v2113_v38 = vadd.f32 %v1983_v49, %v10680_v55  ;;  %v7787_v27 = vadd.f32 %v2158_v18, %v2152_v28  ;;  %v1787_v47 = vpop.permute.xlu1 %1786  ;;  %v10684_v49 = vld [vmem:[#allocation40_spill] sm:$0xff]  ;;  %v10689_v55 = vld [vmem:[#allocation45_spill] sm:$0xff] }
 0x174   : > { %v7789_v25 = vadd.f32 %v2159_v57, %v2153_v20  ;;  %v10681_v30 = vrot.slane %v10619_v50, %v6179_v2  ;;  %v7795_v53 = vadd.f32 %v2158_v18, %v7741_v52  ;;  %v7798_v4 = vadd.f32 %v2159_v57, %v7743_v15 }
 0x175   : > { %v2117_v19 = vadd.f32 %v1999_v43, %v10682_v56  ;;  %v2156_v8 = vadd.f32 %v2116_v21, %v2112_v32  ;;  %v10683_v62 = vrot.slane %v10620_v9, %v6179_v2  ;;  %v2122_v12 = vadd.f32 %v2019_v16, %v10684_v49  ;;  %v10687_v16 = vld [vmem:[#allocation44_spill] sm:$0xff]  ;;  %v10691_v49 = vld [vmem:[#allocation51_spill] sm:$0xff] }
 0x176   : > { %3516 = vbcast.lane.b32.xlu1 %v10681_v30, 256  ;;  %v2011_v36 = vrot.slane %v1766_v63, %v6179_v2  ;;  %v2015_v26 = vrot.slane %v1766_v63, %v6182_v3  ;;  %v2035_v31 = vrot.slane %v1787_v47, %v6179_v2  ;;  %v7809_v6 = vadd.f32 %v2023_v29, %v10685_v11  ;;  %v10690_v30 = vld [vmem:[#allocation48_spill] sm:$0xff] }
 0x177   : > { %3509 = vbcast.lane.b32.xlu0 %v10683_v62, 256  ;;  %v2157_v40 = vadd.f32 %v2117_v19, %v2113_v38  ;;  %v2184_v54 = vadd.f32 %v2156_v8, %v2152_v28  ;;  %v2039_v32 = vrot.slane %v1787_v47, %v6182_v3  ;;  %v2188_v59 = vadd.f32 %v2156_v8, %v7741_v52 }
 0x178   : > { %v2120_v18 = vadd.f32 %v2011_v36, %v7439_v34  ;;  %v2126_v57 = vadd.f32 %v2035_v31, %v7443_v10  ;;  %v2027_v43 = vrot.slane %v1780_v44, %v6179_v2  ;;  %v10686_v63 = vrot.slane %v10624_v51, %v6179_v2  ;;  %v1801_v34 = vpop.permute.xlu1 %1800  ;;  %v10692_v31 = vld [vmem:[#allocation52_spill] sm:$0xff] }
 0x179   : > { %v2185_v48 = vadd.f32 %v2157_v40, %v2153_v20  ;;  %v2189_v28 = vadd.f32 %v2157_v40, %v7743_v15  ;;  %v2228_v21 = vmax.f32 %v2184_v54, %v7787_v27  ;;  %v2121_v29 = vadd.f32 %v2015_v26, %v10687_v16  ;;  %v1794_v20 = vpop.permute.xlu0 %1793 }
 0x17a   : > { %3530 = vbcast.lane.b32.xlu1 %v10686_v63, 256  ;;  %v10688_v52 = vrot.slane %v10625_v35, %v6179_v2  ;;  %v2127_v10 = vadd.f32 %v2039_v32, %v10689_v55  ;;  %v2031_v38 = vrot.slane %v1780_v44, %v6182_v3  ;;  %v2124_v56 = vadd.f32 %v2027_v43, %v10690_v30  ;;  %v10695_v63 = vld [vmem:[#allocation53_spill] sm:$0xff] }
 0x17b   : > { %v2051_v19 = vrot.slane %v1801_v34, %v6179_v2  ;;  %v2229_v8 = vmax.f32 %v2228_v21, %v2188_v59  ;;  %v2231_v15 = vmax.f32 %v2185_v48, %v7789_v25  ;;  %v7830_v62 = vadd.f32 %v2126_v57, %v2122_v12 }
 0x17c   : > { %3523 = vbcast.lane.b32.xlu0 %v10688_v52, 256  ;;  %v2055_v47 = vrot.slane %v1801_v34, %v6182_v3  ;;  %v2125_v36 = vadd.f32 %v2031_v38, %v10691_v49  ;;  %v2160_v26 = vadd.f32 %v2124_v56, %v2120_v18  ;;  %v2043_v11 = vrot.slane %v1794_v20, %v6179_v2  ;;  %v1815_v18 = vpop.permute.xlu1 %1814  ;;  %v10697_v34 = vld [vmem:[#allocation54_spill] sm:$0xff] }
 0x17d   : > { %v2130_v40 = vadd.f32 %v2051_v19, %v10692_v31  ;;  %v10693_v44 = vrot.slane %v10631_v5, %v6179_v2  ;;  %v7840_v32 = vmax.f32 %v2229_v8, %v7795_v53  ;;  %v2232_v43 = vmax.f32 %v2231_v15, %v2189_v28  ;;  %v7847_v16 = vpop.eup %5655  ;;  %v1808_v56 = vpop.permute.xlu0 %1807 }
 0x17e   : > { %v2131_v12 = vadd.f32 %v2055_v47, %v10695_v63  ;;  %v2047_v57 = vrot.slane %v1794_v20, %v6182_v3  ;;  %v10696_v21 = vrot.slane %v10632_v46, %v6179_v2  ;;  %v2161_v52 = vadd.f32 %v2125_v36, %v2121_v29  ;;  %v7852_v19 = vpop.eup %5657  ;;  %v10700_v47 = vld [vmem:[#allocation55_spill] sm:$0xff]  ;;  %v10701_v29 = vld [vmem:[#allocation62_spill] sm:$0xff] }
 0x17f   : > { %3544 = vbcast.lane.b32.xlu1 %v10693_v44, 256  ;;  %10694 = vst [vmem:[#allocation49_spill] sm:$0xff] %v7840_v32  ;;  %v2128_v55 = vadd.f32 %v2043_v11, %v10697_v34  ;;  %v2067_v38 = vrot.slane %v1815_v18, %v6179_v2  ;;  %v2071_v30 = vrot.slane %v1815_v18, %v6182_v3  ;;  %10698 = vst [vmem:[#allocation50_spill] sm:$0xff] %v7852_v19  ;;  %v7860_v31 = vpop.eup %5659  ;;  %v10702_v11 = vld [vmem:[#allocation63_spill] sm:$0xff] }
 0x180   : > { %3537 = vbcast.lane.b32.xlu0 %v10696_v21, 256  ;;  %v7855_v8 = vmax.f32 %v2232_v43, %v7798_v4  ;;  %v2256_v20 = vsub.f32 %v2184_v54, %v7840_v32  ;;  %v2260_v15 = vsub.f32 %v2188_v59, %v7840_v32  ;;  %v2129_v49 = vadd.f32 %v2047_v57, %v10700_v47  ;;  %v10703_v18 = vld [vmem:[#allocation59_spill] sm:$0xff]  ;;  %v7869_v34 = vpop.eup %5661 }
 0x181   : > { %v2134_v36 = vadd.f32 %v2067_v38, %v10701_v29  ;;  %v2135_v44 = vadd.f32 %v2071_v30, %v10702_v11  ;;  %v2059_v63 = vrot.slane %v1808_v56, %v6179_v2  ;;  %v2063_v21 = vrot.slane %v1808_v56, %v6182_v3  ;;  %10705 = vst [vmem:[#allocation16_spill] sm:$0xff] %v7869_v34  ;;  %v7876_v30 = vpop.permute.xlu1 %2348  ;;  %v10707_v11 = vld [vmem:[#allocation69_spill] sm:$0xff]  ;;  %v2342_v46 = vpop.permute.xlu0 %2341 }
 0x182   : > { %10699 = vst [vmem:[#allocation9_spill] sm:$0xff] %v7855_v8  ;;  %v10704_v43 = vrot.slane %v10703_v18, %v6179_v2  ;;  %v2257_v54 = vsub.f32 %v2185_v48, %v7855_v8  ;;  %v2261_v59 = vsub.f32 %v2189_v28, %v7855_v8  ;;  %v2304_v57 = vmul.f32 1.442695, %v2256_v20  ;;  %v10708_v18 = vld [vmem:[#allocation70_spill] sm:$0xff] }
 0x183   : > { %v2312_v47 = vmul.f32 1.442695, %v2260_v15  ;;  %v10706_v38 = vrot.slane %v10634_v39, %v6179_v2  ;;  %v2166_v29 = vadd.f32 %v2134_v36, %v2130_v40  ;;  %v2167_v56 = vadd.f32 %v2135_v44, %v2131_v12  ;;  %v10709_v28 = vld [vmem:[#allocation42_spill] sm:$0xff]  ;;  %v10712_v12 = vld [vmem:[#allocation65_spill] sm:$0xff] }
 0x184   : > { %3558 = vbcast.lane.b32.xlu1 %v10704_v43, 256  ;;  %v2132_v60 = vadd.f32 %v2059_v63, %v10707_v11  ;;  %v2133_v43 = vadd.f32 %v2063_v21, %v10708_v18  ;;  %5663 = vpow2.f32 %v2304_v57  ;;  %v2306_v5 = vmul.f32 1.442695, %v2257_v54  ;;  %v10713_v54 = vld [vmem:[#allocation61_spill] sm:$0xff]  ;;  %v10715_v57 = vld [vmem:[#allocation43_spill] sm:$0xff] }
 0x185   : > { %3551 = vbcast.lane.b32.xlu0 %v10706_v38, 256  ;;  %v2314_v48 = vmul.f32 1.442695, %v2261_v59  ;;  %v2242_v20 = vsub.f32 %v10709_v28, %v7661_v33  ;;  %5665 = vpow2.f32 %v2312_v47  ;;  %v2163_v15 = vadd.f32 %v2127_v10, %v7809_v6  ;;  %v10710_v38 = vld [vmem:[#allocation58_spill] sm:$0xff]  ;;  %v7898_v6 = vpop.permute.xlu1 %2362  ;;  %v2356_v28 = vpop.permute.xlu0 %2355 }
 0x186   : > { %v7883_v39 = vadd.f32 %v2166_v29, %v2160_v26  ;;  %v10711_v40 = vrot.slane %v10710_v38, %v6179_v2  ;;  %v7890_v44 = vadd.f32 %v2167_v56, %v2161_v52  ;;  %v7893_v63 = vadd.f32 %v2166_v29, %v7830_v62 }
 0x187   : > { %v2164_v21 = vadd.f32 %v2132_v60, %v2128_v55  ;;  %v2165_v18 = vadd.f32 %v2133_v43, %v2129_v49  ;;  %v10714_v59 = vrot.slane %v10713_v54, %v6179_v2  ;;  %5667 = vpow2.f32 %v2306_v5  ;;  %v10716_v5 = vld [vmem:[#allocation64_spill] sm:$0xff] }
 0x188   : > { %3572 = vbcast.lane.b32.xlu1 %v10711_v40, 256  ;;  %v7900_v10 = vadd.f32 %v2167_v56, %v2163_v15  ;;  %v2243_v47 = vsub.f32 %v10715_v57, %v7664_v0  ;;  %v2276_v11 = vmul.f32 1.442695, %v2242_v20  ;;  %5669 = vpow2.f32 %v2314_v48 }
 0x189   : > { %3565 = vbcast.lane.b32.xlu0 %v10714_v59, 256  ;;  %v2192_v40 = vadd.f32 %v2164_v21, %v2160_v26  ;;  %v2193_v29 = vadd.f32 %v2165_v18, %v2161_v52  ;;  %v2196_v55 = vadd.f32 %v2164_v21, %v7830_v62  ;;  %v2451_v43 = vrot.slane %v2342_v46, %v6179_v2  ;;  %v7918_v62 = vpop.permute.xlu1 %2376 }
 0x18a   : > { %5671 = vpow2.f32 %v2276_v11  ;;  %v2278_v49 = vmul.f32 1.442695, %v2243_v47  ;;  %v10717_v56 = vrot.slane %v10716_v5, %v6179_v2  ;;  %v2197_v59 = vadd.f32 %v2165_v18, %v2163_v15  ;;  %v7925_v18 = vpop.permute.xlu0 %2369 }
 0x18b   : > { %v2234_v20 = vmax.f32 %v2192_v40, %v7883_v39  ;;  %v2237_v48 = vmax.f32 %v2193_v29, %v7890_v44  ;;  %v2246_v26 = vsub.f32 %v7631_v23, %v7661_v33  ;;  %v10718_v52 = vrot.slane %v10712_v12, %v6179_v2 }
 0x18c   : > { %3586 = vbcast.lane.b32.xlu1 %v10717_v56, 256  ;;  %5673 = vpow2.f32 %v2278_v49  ;;  %v2455_v57 = vrot.slane %v2342_v46, %v6182_v3  ;;  %v2247_v15 = vsub.f32 %v7633_v58, %v7664_v0  ;;  %v7928_v23 = vmul.f32 %v7758_v22, %v2451_v43  ;;  %v10719_v46 = vld [vmem:[#allocation66_spill] sm:$0xff]  ;;  %v10726_v0 = vld [vmem:[#allocation71_spill] sm:$0xff] }
 0x18d   : > { %3579 = vbcast.lane.b32.xlu0 %v10718_v52, 256  ;;  %v2235_v47 = vmax.f32 %v2234_v20, %v2196_v55  ;;  %v2238_v11 = vmax.f32 %v2237_v48, %v2197_v59  ;;  %v2284_v56 = vmul.f32 1.442695, %v2246_v26  ;;  %v2467_v36 = vrot.slane %v2356_v28, %v6179_v2  ;;  %v10723_v48 = vld [vmem:[#allocation68_spill] sm:$0xff] }
 0x18e   : > { %v2286_v52 = vmul.f32 1.442695, %v2247_v15  ;;  %v2471_v21 = vrot.slane %v2356_v28, %v6182_v3  ;;  %v10720_v60 = vrot.slane %v10719_v46, %v6179_v2  ;;  %v2250_v43 = vsub.f32 %v7700_v42, %v7737_v7  ;;  %v7948_v15 = vpop.permute.xlu1 %2390 }
 0x18f   : > { %v7938_v58 = vmax.f32 %v2235_v47, %v7893_v63  ;;  %v7941_v20 = vmax.f32 %v2238_v11, %v7900_v10  ;;  %5675 = vpow2.f32 %v2284_v56  ;;  %v10724_v26 = vrot.slane %v10723_v48, %v6179_v2  ;;  %v2384_v11 = vpop.permute.xlu0 %2383 }
 0x190   : > { %3600 = vbcast.lane.b32.xlu1 %v10720_v60, 256  ;;  %v7951_v28 = vmul.f32 %v7763_v24, %v2455_v57  ;;  %5677 = vpow2.f32 %v2286_v52  ;;  %v2251_v47 = vsub.f32 %v7710_v37, %v7750_v45  ;;  %v2580_v57 = vmul.f32 %v7767_v14, %v2467_v36 }
 0x191   : > { %10721 = vst [vmem:[#allocation18_spill] sm:$0xff] %v7938_v58  ;;  %10722 = vst [vmem:[#allocation19_spill] sm:$0xff] %v7941_v20  ;;  %3593 = vbcast.lane.b32.xlu0 %v10724_v26, 256  ;;  %v2264_v56 = vsub.f32 %v2192_v40, %v7938_v58  ;;  %v2265_v42 = vsub.f32 %v2193_v29, %v7941_v20  ;;  %v2268_v46 = vsub.f32 %v2196_v55, %v7938_v58  ;;  %v7961_v26 = vpop.eup %5663 }
 0x192   : > { %v2269_v48 = vsub.f32 %v2197_v59, %v7941_v20  ;;  %10725 = vst [vmem:[#allocation20_spill] sm:$0xff] %v7961_v26  ;;  %v7965_v52 = vmul.f32 %v7776_v41, %v2471_v21  ;;  %v2292_v60 = vmul.f32 1.442695, %v2250_v43  ;;  %v2294_v49 = vmul.f32 1.442695, %v2251_v47  ;;  %v7970_v40 = vpop.eup %5665  ;;  %v7974_v12 = vpop.permute.xlu1 %2404 }
 0x193   : > { %v10727_v37 = vrot.slane %v10726_v0, %v6179_v2  ;;  %10728 = vst [vmem:[#allocation21_spill] sm:$0xff] %v7970_v40  ;;  %v2320_v29 = vmul.f32 1.442695, %v2264_v56  ;;  %v2322_v33 = vmul.f32 1.442695, %v2265_v42  ;;  %v2483_v59 = vrot.slane %v7925_v18, %v6179_v2  ;;  %v10729_v0 = vld [vmem:[#allocation72_spill] sm:$0xff]  ;;  %v2398_v56 = vpop.permute.xlu0 %2397 }
 0x194   : > { %v2328_v55 = vmul.f32 1.442695, %v2268_v46  ;;  %v2330_v36 = vmul.f32 1.442695, %v2269_v48  ;;  %5679 = vpow2.f32 %v2292_v60  ;;  %v2254_v43 = vsub.f32 %v7702_v13, %v7737_v7  ;;  %v7983_v42 = vpop.eup %5667 }
 0x195   : > { %3614 = vbcast.lane.b32.xlu1 %v10727_v37, 256  ;;  %v10730_v47 = vrot.slane %v10729_v0, %v6179_v2  ;;  %10731 = vst [vmem:[#allocation22_spill] sm:$0xff] %v7983_v42  ;;  %5681 = vpow2.f32 %v2320_v29  ;;  %v2487_v60 = vrot.slane %v7925_v18, %v6182_v3  ;;  %v2255_v48 = vsub.f32 %v7713_v61, %v7750_v45  ;;  %v7991_v37 = vpop.eup %5669 }
 0x196   : > { %10732 = vst [vmem:[#allocation10_spill] sm:$0xff] %v7991_v37  ;;  %5683 = vpow2.f32 %v2322_v33  ;;  %v7994_v13 = vmul.f32 %v7847_v16, %v2483_v59  ;;  %v2300_v0 = vmul.f32 1.442695, %v2254_v43  ;;  %v10733_v29 = vrot.slane %v10615_v17, %v6182_v3  ;;  %v8005_v33 = vpop.permute.xlu1 %2418 }
 0x197   : > { %3607 = vbcast.lane.b32.xlu0 %v10730_v47, 256  ;;  %v8001_v46 = vpop.eup %5671  ;;  %5685 = vpow2.f32 %v2328_v55  ;;  %v2302_v18 = vmul.f32 1.442695, %v2255_v48  ;;  %v2499_v61 = vrot.slane %v2384_v11, %v6179_v2  ;;  %v2503_v21 = vrot.slane %v2384_v11, %v6182_v3  ;;  %v8018_v48 = vpop.permute.xlu0 %2411 }
 0x198   : > { %5687 = vpow2.f32 %v2330_v36  ;;  %v10734_v59 = vrot.slane %v7876_v30, %v6179_v2  ;;  %v2258_v17 = vsub.f32 %v7787_v27, %v7840_v32  ;;  %v10735_v55 = vrot.slane %v10616_v1, %v6182_v3 }
 0x199   : > { %3840 = vbcast.lane.b32.xlu1 %v10733_v29, 256  ;;  %v2259_v29 = vsub.f32 %v7789_v25, %v7855_v8  ;;  %v8020_v11 = vpop.eup %5673  ;;  %5689 = vpow2.f32 %v2294_v49  ;;  %v8023_v36 = vmul.f32 %v7860_v31, %v2487_v60  ;;  %v8028_v27 = vmul.f32 %v7852_v19, %v2499_v61 }
 0x19a   : > { %v2578_v43 = vmul.f32 %v8001_v46, %v10734_v59  ;;  %v10736_v25 = vrot.slane %v7876_v30, %v6182_v3  ;;  %5691 = vpow2.f32 %v2300_v0  ;;  %v2308_v47 = vmul.f32 1.442695, %v2258_v17  ;;  %v8042_v45 = vpop.permute.xlu1 %2432 }
 0x19b   : > { %3833 = vbcast.lane.b32.xlu0 %v10735_v55, 256  ;;  %v10737_v49 = vrot.slane %v10619_v50, %v6182_v3  ;;  %5693 = vpow2.f32 %v2302_v18  ;;  %v8039_v60 = vmul.f32 %v7869_v34, %v2503_v21  ;;  %v2310_v59 = vmul.f32 1.442695, %v2259_v29  ;;  %v8051_v18 = vpop.permute.xlu0 %2425 }
 0x19c   : > { %v2579_v1 = vmul.f32 %v8020_v11, %v10736_v25  ;;  %v2608_v55 = vadd.f32 %v2578_v43, %v7928_v23  ;;  %v2515_v61 = vrot.slane %v2398_v56, %v6179_v2  ;;  %v8044_v30 = vpop.eup %5675  ;;  %5695 = vpow2.f32 %v2308_v47 }
 0x19d   : > { %3854 = vbcast.lane.b32.xlu1 %v10737_v49, 256  ;;  %v2519_v0 = vrot.slane %v2398_v56, %v6182_v3  ;;  %v10738_v50 = vrot.slane %v10620_v9, %v6182_v3  ;;  %v8053_v21 = vpop.eup %5677  ;;  %v10740_v43 = vrot.slane %v7898_v6, %v6179_v2  ;;  %5697 = vpow2.f32 %v2310_v59 }
 0x19e   : > { %v2611_v25 = vadd.f32 %v2579_v1, %v7951_v28  ;;  %v2609_v23 = vadd.f32 %v2608_v55, %v2580_v57  ;;  %10739 = vst [vmem:[#allocation23_spill] sm:$0xff] %v8053_v21  ;;  %v2262_v57 = vsub.f32 %v7795_v53, %v7840_v32  ;;  %v10741_v9 = vrot.slane %v7898_v6, %v6182_v3 }
 0x19f   : > { %3847 = vbcast.lane.b32.xlu0 %v10738_v50, 256  ;;  %v2582_v17 = vmul.f32 %v8044_v30, %v10740_v43  ;;  %v2263_v1 = vsub.f32 %v7798_v4, %v7855_v8  ;;  %v10742_v59 = vrot.slane %v10624_v51, %v6182_v3  ;;  %v8076_v53 = vmul.f32 %v7961_v26, %v2515_v61  ;;  %v8081_v50 = vpop.permute.xlu1 %2446  ;;  %v8090_v61 = vpop.permute.xlu0 %2439 }
 0x1a0   : > { %v2583_v56 = vmul.f32 %v8053_v21, %v10741_v9  ;;  %v2612_v47 = vadd.f32 %v2611_v25, %v7965_v52  ;;  %v8079_v6 = vmul.f32 %v7983_v42, %v2519_v0  ;;  %v2316_v49 = vmul.f32 1.442695, %v2262_v57 }
 0x1a1   : > { %3868 = vbcast.lane.b32.xlu1 %v10742_v59, 256  ;;  %v2610_v55 = vadd.f32 %v2609_v23, %v2582_v17  ;;  %v2318_v25 = vmul.f32 1.442695, %v2263_v1  ;;  %v2531_v4 = vrot.slane %v8018_v48, %v6179_v2  ;;  %v10743_v51 = vrot.slane %v10625_v35, %v6182_v3  ;;  %v8092_v23 = vpop.eup %5679  ;;  %v10746_v1 = vld [vmem:[#allocation56_spill] sm:$0xff] }
 0x1a2   : > { %v2613_v52 = vadd.f32 %v2612_v47, %v2583_v56  ;;  %v2535_v0 = vrot.slane %v8018_v48, %v6182_v3  ;;  %v2266_v17 = vsub.f32 %v7883_v39, %v7938_v58  ;;  %v2267_v57 = vsub.f32 %v7890_v44, %v7941_v20  ;;  %v8100_v9 = vpop.eup %5681 }
 0x1a3   : > { %3861 = vbcast.lane.b32.xlu0 %v10743_v51, 256  ;;  %5699 = vlog2.f32 %v2610_v55  ;;  %10744 = vst [vmem:[#allocation25_spill] sm:$0xff] %v8100_v9  ;;  %v10745_v35 = vrot.slane %v7918_v62, %v6179_v2  ;;  %v10747_v39 = vrot.slane %v10746_v1, %v6182_v3  ;;  %v8113_v59 = vpop.eup %5683  ;;  %v8116_v44 = vmul.f32 %v7970_v40, %v2531_v4  ;;  %v2645_v51 = vpop.permute.xlu1 %2644 }
 0x1a4   : > { %5701 = vlog2.f32 %v2613_v52  ;;  %10748 = vst [vmem:[#allocation26_spill] sm:$0xff] %v8113_v59  ;;  %v2324_v55 = vmul.f32 1.442695, %v2266_v17  ;;  %v2326_v52 = vmul.f32 1.442695, %v2267_v57  ;;  %v2547_v48 = vrot.slane %v8051_v18, %v6179_v2  ;;  %v2638_v4 = vpop.permute.xlu0 %2637 }
 0x1a5   : > { %v2586_v56 = vmul.f32 %v8092_v23, %v10745_v35  ;;  %3882 = vbcast.lane.b32.xlu1 %v10747_v39, 256  ;;  %5703 = vpow2.f32 %v2316_v49  ;;  %v8118_v35 = vpop.eup %5685  ;;  %v2551_v1 = vrot.slane %v8051_v18, %v6182_v3  ;;  %v10749_v39 = vld [vmem:[#allocation57_spill] sm:$0xff]  ;;  %v8131_v17 = vmul.f32 %v7991_v37, %v2535_v0  ;;  %v10751_v0 = vld [vmem:[#allocation59_spill] sm:$0xff] }
 0x1a6   : > { %5705 = vpow2.f32 %v2318_v25  ;;  %v10750_v49 = vrot.slane %v10749_v39, %v6182_v3  ;;  %v8128_v43 = vpop.eup %5687  ;;  %v2271_v25 = vsub.f32 %v7900_v10, %v7941_v20  ;;  %v10755_v39 = vrot.slane %v7948_v15, %v6179_v2 }
 0x1a7   : > { %v2614_v47 = vadd.f32 %v2586_v56, %v7994_v13  ;;  %5707 = vpow2.f32 %v2324_v55  ;;  %v2270_v13 = vsub.f32 %v7893_v63, %v7938_v58  ;;  %v8137_v57 = vpop.eup %5689  ;;  %v10752_v55 = vrot.slane %v10751_v0, %v6182_v3  ;;  %v2659_v56 = vpop.permute.xlu1 %2658 }
 0x1a8   : > { %3875 = vbcast.lane.b32.xlu0 %v10750_v49, 256  ;;  %5709 = vpow2.f32 %v2326_v52  ;;  %v8147_v49 = vpop.eup %5691  ;;  %v10753_v63 = vrot.slane %v7918_v62, %v6182_v3  ;;  %v2334_v52 = vmul.f32 1.442695, %v2271_v25  ;;  %v2563_v62 = vrot.slane %v8090_v61, %v6179_v2  ;;  %v2652_v25 = vpop.permute.xlu0 %2651 }
 0x1a9   : > { %v2615_v18 = vadd.f32 %v2614_v47, %v8028_v27  ;;  %3896 = vbcast.lane.b32.xlu1 %v10752_v55, 256  ;;  %v8154_v27 = vmul.f32 %v8100_v9, %v2547_v48  ;;  %v2332_v47 = vmul.f32 1.442695, %v2270_v13  ;;  %v8156_v29 = vpop.eup %5693  ;;  %v2590_v0 = vmul.f32 %v8147_v49, %v10755_v39  ;;  %v10756_v48 = vld [vmem:[#allocation60_spill] sm:$0xff] }
 0x1aa   : > { %v2587_v10 = vmul.f32 %v8137_v57, %v10753_v63  ;;  %10754 = vst [vmem:[#allocation24_spill] sm:$0xff] %v8156_v29  ;;  %v8163_v55 = vmul.f32 %v8113_v59, %v2551_v1  ;;  %v2755_v63 = vrot.slane %v2645_v51, %v6179_v2  ;;  %v10757_v13 = vrot.slane %v10756_v48, %v6182_v3  ;;  %v8171_v28 = vpop.eup %5695 }
 0x1ab   : > { %10758 = vst [vmem:[#allocation27_spill] sm:$0xff] %v8171_v28  ;;  %5711 = vpow2.f32 %v2332_v47  ;;  %v2759_v1 = vrot.slane %v2645_v51, %v6182_v3  ;;  %v8177_v59 = vpop.eup %5697  ;;  %v2616_v58 = vadd.f32 %v2615_v18, %v2590_v0  ;;  %v10760_v9 = vrot.slane %v7974_v12, %v6179_v2 }
 0x1ac   : > { %3889 = vbcast.lane.b32.xlu0 %v10757_v13, 256  ;;  %v2617_v20 = vadd.f32 %v2587_v10, %v8023_v36  ;;  %10759 = vst [vmem:[#allocation67_spill] sm:$0xff] %v8177_v59  ;;  %5713 = vpow2.f32 %v2334_v52  ;;  %v2567_v13 = vrot.slane %v8090_v61, %v6182_v3  ;;  %v10761_v36 = vrot.slane %v10710_v38, %v6182_v3  ;;  %v2673_v61 = vpop.permute.xlu1 %2672 }
 0x1ad   : > { %v2594_v48 = vmul.f32 %v8171_v28, %v10760_v9  ;;  %v10762_v10 = vrot.slane %v7948_v15, %v6182_v3  ;;  %v10763_v47 = vrot.slane %v7974_v12, %v6182_v3  ;;  %v8198_v52 = vmul.f32 %v8118_v35, %v2563_v62 }
 0x1ae   : > { %3910 = vbcast.lane.b32.xlu1 %v10761_v36, 256  ;;  %v2618_v18 = vadd.f32 %v2617_v20, %v8039_v60  ;;  %5715 = vlog2.f32 %v2616_v58  ;;  %v2874_v0 = vmul.f32 %v8001_v46, %v2755_v63  ;;  %v2747_v15 = vrot.slane %v2638_v4, %v6179_v2  ;;  %v8206_v20 = vpop.permute.xlu0 %2665 }
 0x1af   : > { %v2591_v51 = vmul.f32 %v8156_v29, %v10762_v10  ;;  %v2595_v9 = vmul.f32 %v8177_v59, %v10763_v47  ;;  %v2620_v38 = vadd.f32 %v2594_v48, %v8076_v53  ;;  %v10764_v36 = vrot.slane %v10713_v54, %v6182_v3 }
 0x1b0   : > { %v2875_v60 = vmul.f32 %v8020_v11, %v2759_v1  ;;  %v2751_v62 = vrot.slane %v2638_v4, %v6182_v3  ;;  %v2771_v10 = vrot.slane %v2659_v56, %v6179_v2  ;;  %v5700_v58 = vpop.eup %5699  ;;  %v2872_v63 = vmul.f32 %v7758_v22, %v2747_v15  ;;  %v10767_v22 = vld [vmem:[#allocation65_spill] sm:$0xff] }
 0x1b1   : > { %3903 = vbcast.lane.b32.xlu0 %v10764_v36, 256  ;;  %v2619_v12 = vadd.f32 %v2618_v18, %v2591_v51  ;;  %v2623_v53 = vadd.f32 %v2595_v9, %v8079_v6  ;;  %v2775_v48 = vrot.slane %v2659_v56, %v6182_v3  ;;  %v2763_v47 = vrot.slane %v2652_v25, %v6179_v2  ;;  %v5702_v51 = vpop.eup %5701  ;;  %v8221_v36 = vpop.permute.xlu1 %2686 }
 0x1b2   : > { %v10765_v54 = vrot.slane %v10716_v5, %v6182_v3  ;;  %v2621_v1 = vadd.f32 %v2620_v38, %v8116_v44  ;;  %v2605_v4 = vmul.f32 %v8128_v43, %v2567_v13  ;;  %v2873_v18 = vmul.f32 %v7763_v24, %v2751_v62  ;;  %v8223_v6 = vpop.eup %5703 }
 0x1b3   : > { %5717 = vlog2.f32 %v2619_v12  ;;  %10766 = vst [vmem:[#allocation28_spill] sm:$0xff] %v8223_v6  ;;  %v3225_v9 = vmul.f32 0.6931472, %v5700_v58  ;;  %v3227_v56 = vmul.f32 0.6931472, %v5702_v51  ;;  %v2624_v15 = vadd.f32 %v2623_v53, %v8131_v17  ;;  %v8229_v12 = vpop.permute.xlu0 %2679  ;;  %v8231_v44 = vpop.eup %5705 }
 0x1b4   : > { %3924 = vbcast.lane.b32.xlu1 %v10765_v54, 256  ;;  %v2904_v39 = vadd.f32 %v2874_v0, %v2872_v63  ;;  %v10768_v5 = vrot.slane %v10767_v22, %v6182_v3  ;;  %v10769_v13 = vrot.slane %v8005_v33, %v6179_v2  ;;  %v2878_v62 = vmul.f32 %v8044_v30, %v2771_v10  ;;  %v8240_v0 = vpop.eup %5707 }
 0x1b5   : > { %v2879_v58 = vmul.f32 %v8053_v21, %v2775_v48  ;;  %v2767_v17 = vrot.slane %v2652_v25, %v6182_v3  ;;  %v10770_v22 = vrot.slane %v8005_v33, %v6182_v3  ;;  %v2907_v63 = vadd.f32 %v2875_v60, %v2873_v18  ;;  %v8256_v33 = vpop.permute.xlu1 %2700 }
 0x1b6   : > { %3917 = vbcast.lane.b32.xlu0 %v10768_v5, 256  ;;  %v2598_v38 = vmul.f32 %v8223_v6, %v10769_v13  ;;  %v2876_v54 = vmul.f32 %v7767_v14, %v2763_v47  ;;  %v2787_v51 = vrot.slane %v2673_v61, %v6179_v2  ;;  %v8248_v5 = vpop.eup %5709  ;;  %v10771_v10 = vrot.slane %v8042_v45, %v6179_v2 }
 0x1b7   : > { %v2599_v53 = vmul.f32 %v8231_v44, %v10770_v22  ;;  %v2877_v48 = vmul.f32 %v7776_v41, %v2767_v17  ;;  %v2791_v21 = vrot.slane %v2673_v61, %v6182_v3  ;;  %v10772_v60 = vrot.slane %v8042_v45, %v6182_v3 }
 0x1b8   : > { %v2622_v13 = vadd.f32 %v2621_v1, %v2598_v38  ;;  %v2602_v25 = vmul.f32 %v8240_v0, %v10771_v10  ;;  %v2905_v18 = vadd.f32 %v2904_v39, %v2876_v54  ;;  %v2882_v1 = vmul.f32 %v8092_v23, %v2787_v51  ;;  %v8263_v38 = vpop.permute.xlu0 %2693  ;;  %v8267_v61 = vpop.eup %5711 }
 0x1b9   : > { %v2625_v22 = vadd.f32 %v2624_v15, %v2599_v53  ;;  %v2603_v47 = vmul.f32 %v8248_v5, %v10772_v60  ;;  %v2908_v14 = vadd.f32 %v2907_v63, %v2877_v48  ;;  %v2883_v17 = vmul.f32 %v8137_v57, %v2791_v21  ;;  %10773 = vst [vmem:[#allocation29_spill] sm:$0xff] %v8267_v61  ;;  %v8272_v39 = vpop.eup %5713 }
 0x1ba   : > { %5719 = vlog2.f32 %v2622_v13  ;;  %v2626_v10 = vadd.f32 %v2602_v25, %v8154_v27  ;;  %v2906_v53 = vadd.f32 %v2905_v18, %v2878_v62  ;;  %v2779_v45 = vrot.slane %v8206_v20, %v6179_v2  ;;  %10774 = vst [vmem:[#allocation30_spill] sm:$0xff] %v8272_v39  ;;  %v8281_v13 = vpop.permute.xlu1 %2714 }
 0x1bb   : > { %5721 = vlog2.f32 %v2625_v22  ;;  %v2629_v15 = vadd.f32 %v2603_v47, %v8163_v55  ;;  %v10775_v54 = vrot.slane %v8081_v50, %v6179_v2  ;;  %v2909_v63 = vadd.f32 %v2908_v14, %v2879_v58  ;;  %v5716_v60 = vpop.eup %5715 }
 0x1bc   : > { %v2627_v27 = vadd.f32 %v2626_v10, %v8198_v52  ;;  %v2783_v21 = vrot.slane %v8206_v20, %v6182_v3  ;;  %v10776_v55 = vrot.slane %v8081_v50, %v6182_v3  ;;  %5723 = vlog2.f32 %v2906_v53  ;;  %v8288_v22 = vpop.permute.xlu0 %2707  ;;  %v10777_v20 = vld [vmem:[#allocation15_spill] sm:$0xff]  ;;  %v10779_v50 = vld [vmem:[#allocation13_spill] sm:$0xff] }
 0x1bd   : > { %v2606_v51 = vmul.f32 %v8267_v61, %v10775_v54  ;;  %v2630_v25 = vadd.f32 %v2629_v15, %v2605_v4  ;;  %v2880_v48 = vmul.f32 %v7847_v16, %v2779_v45  ;;  %5725 = vlog2.f32 %v2909_v63 }
 0x1be   : > { %v2607_v62 = vmul.f32 %v8272_v39, %v10776_v55  ;;  %v2881_v14 = vmul.f32 %v7860_v31, %v2783_v21  ;;  %v2803_v52 = vrot.slane %v8221_v36, %v6179_v2  ;;  %v8294_v58 = vadd.f32 %v3225_v9, %v10777_v20  ;;  %v8303_v54 = vpop.permute.xlu1 %2728 }
 0x1bf   : > { %v2628_v47 = vadd.f32 %v2627_v27, %v2606_v51  ;;  %v8297_v18 = vadd.f32 %v3227_v56, %v10779_v50  ;;  %v3237_v4 = vmul.f32 0.6931472, %v5716_v60  ;;  %v2910_v15 = vadd.f32 %v2882_v1, %v2880_v48 }
 0x1c0   : > { %10778 = vst [vmem:[#allocation31_spill] sm:$0xff] %v8294_v58  ;;  %v2631_v10 = vadd.f32 %v2630_v25, %v2607_v62  ;;  %v2807_v53 = vrot.slane %v8221_v36, %v6182_v3  ;;  %v2795_v45 = vrot.slane %v8229_v12, %v6179_v2  ;;  %v5718_v51 = vpop.eup %5717  ;;  %v2913_v27 = vadd.f32 %v2883_v17, %v2881_v14  ;;  %v8308_v63 = vpop.permute.xlu0 %2721  ;;  %v8314_v36 = vld [vmem:[%s10184_s5 + $0x3c] sm:$0x7]  ;;  %v8321_v17 = vld [vmem:[%s10184_s5 + $0x38] sm:$0x7] }
 0x1c1   : > { %10780 = vst [vmem:[#allocation11_spill] sm:$0xff] %v8297_v18  ;;  %5727 = vlog2.f32 %v2628_v47  ;;  %v2886_v9 = vmul.f32 %v8147_v49, %v2803_v52  ;;  %v2799_v56 = vrot.slane %v8229_v12, %v6182_v3  ;;  %v3239_v21 = vmul.f32 0.6931472, %v5718_v51  ;;  %10781 = vst [vmem:[#allocation33_spill] sm:$0xff] %v8314_v36  ;;  %v10783_v47 = vld [vmem:[#allocation46_spill] sm:$0xff] }
 0x1c2   : > { %5729 = vlog2.f32 %v2631_v10  ;;  %v2884_v1 = vmul.f32 %v7852_v19, %v2795_v45  ;;  %v3936_v55 = vrot.slane %v8314_v36, %v6182_v3  ;;  %10782 = vst [vmem:[#allocation32_spill] sm:$0xff] %v8321_v17  ;;  %v3929_v12 = vrot.slane %v8321_v17, %v6182_v3  ;;  %v8338_v45 = vpop.permute.xlu1 %2742 }
 0x1c3   : > { %v8326_v62 = vadd.f32 %v3237_v4, %v7737_v7  ;;  %v2885_v25 = vmul.f32 %v7869_v34, %v2799_v56  ;;  %v2819_v48 = vrot.slane %v8256_v33, %v6179_v2  ;;  %v2823_v60 = vrot.slane %v8256_v33, %v6182_v3 }
 0x1c4   : > { %v8334_v14 = vadd.f32 %v3239_v21, %v10783_v47  ;;  %v2911_v52 = vadd.f32 %v2910_v15, %v2884_v1  ;;  %3938 = vbcast.lane.b32.xlu1 %v3936_v55, 256  ;;  %3931 = vbcast.lane.b32.xlu0 %v3929_v12, 256  ;;  %v2811_v10 = vrot.slane %v8263_v38, %v6179_v2  ;;  %v8344_v33 = vpop.permute.xlu0 %2735  ;;  %v6017_v21 = vmov 0   ;;  %v8351_v12 = vld [vmem:[%s10184_s5 + $0x44] sm:$0x7] }
 0x1c5   : > { %v2887_v4 = vmul.f32 %v8156_v29, %v2807_v53  ;;  %v2914_v51 = vadd.f32 %v2913_v27, %v2885_v25  ;;  %v2890_v56 = vmul.f32 %v8171_v28, %v2819_v48  ;;  %v2815_v17 = vrot.slane %v8263_v38, %v6182_v3  ;;  %5637 = vset.pattern.permute.xlu1 %v6017_v21 }
 0x1c6   : > { %v2912_v15 = vadd.f32 %v2911_v52, %v2886_v9  ;;  %v2891_v1 = vmul.f32 %v8177_v59, %v2823_v60  ;;  %v2888_v55 = vmul.f32 %v7961_v26, %v2811_v10  ;;  %10784 = vst [vmem:[#allocation34_spill] sm:$0xff] %v8351_v12  ;;  %v3950_v53 = vrot.slane %v8351_v12, %v6182_v3  ;;  %v8359_v9 = vld [vmem:[%s10184_s5 + $0x40] sm:$0x7] }
 0x1c7   : > { %5636 = vset.pattern.permute.xlu0 %v6017_v21  ;;  %v5720_v27 = vpop.eup %5719  ;;  %v2915_v38 = vadd.f32 %v2914_v51, %v2887_v4  ;;  %v2889_v25 = vmul.f32 %v7983_v42, %v2815_v17  ;;  %10785 = vst [vmem:[#allocation35_spill] sm:$0xff] %v8359_v9  ;;  %v3943_v48 = vrot.slane %v8359_v9, %v6182_v3  ;;  %v8373_v17 = vpop.permute.xlu1 %2940 }
 0x1c8   : > { %v2835_v60 = vrot.slane %v8281_v13, %v6179_v2  ;;  %v5722_v52 = vpop.eup %5721  ;;  %v8367_v10 = vadd.f32 %v8326_v62, %v8294_v58  ;;  %v8371_v4 = vadd.f32 %v8334_v14, %v8297_v18  ;;  %5731 = vlog2.f32 %v2912_v15  ;;  %3952 = vbcast.lane.b32.xlu1 %v3950_v53, 256  ;;  %v8377_v12 = vpop.permute.xlu0 %2933 }
 0x1c9   : > { %v3249_v51 = vmul.f32 0.6931472, %v5720_v27  ;;  %5733 = vlog2.f32 %v2915_v38  ;;  %v2916_v21 = vadd.f32 %v2890_v56, %v2888_v55  ;;  %3945 = vbcast.lane.b32.xlu0 %v3943_v48, 256  ;;  %v2839_v9 = vrot.slane %v8281_v13, %v6182_v3  ;;  %v5724_v42 = vpop.eup %5723  ;;  %v5905_v56 = vld [vmem:[%s10184_s5 + $0x4] sm:$0x7]  ;;  %v10788_v13 = vld [vmem:[#allocation17_spill] sm:$0xff] }
 0x1ca   : > { %10786 = vst [vmem:[#allocation36_spill] sm:$0xff] %v8367_v10  ;;  %10787 = vst [vmem:[#allocation38_spill] sm:$0xff] %v8371_v4  ;;  %v3251_v26 = vmul.f32 0.6931472, %v5722_v52  ;;  %v2919_v10 = vadd.f32 %v2891_v1, %v2889_v25  ;;  %v2827_v59 = vrot.slane %v8288_v22, %v6179_v2  ;;  %v2831_v15 = vrot.slane %v8288_v22, %v6182_v3  ;;  %v5726_v53 = vpop.eup %5725  ;;  %v5906_v1 = vld [vmem:[%s10184_s5] sm:$0x7] }
 0x1cb   : > { %v3229_v4 = vmul.f32 0.6931472, %v5724_v42  ;;  %v2894_v27 = vmul.f32 %v8223_v6, %v2835_v60  ;;  %v4176_v55 = vrot.slane %v5905_v56, %v10788_v13  ;;  %v4169_v38 = vrot.slane %v5906_v1, %v10788_v13  ;;  %v8396_v60 = vpop.permute.xlu1 %2954 }
 0x1cc   : > { %v3231_v25 = vmul.f32 0.6931472, %v5726_v53  ;;  %v2892_v48 = vmul.f32 %v7970_v40, %v2827_v59  ;;  %v2893_v22 = vmul.f32 %v7991_v37, %v2831_v15  ;;  %v2851_v42 = vrot.slane %v8303_v54, %v6179_v2  ;;  %v8405_v59 = vpop.permute.xlu0 %2947 }
 0x1cd   : > { %v8399_v6 = vadd.f32 %v3249_v51, %v7840_v32  ;;  %4178 = vbcast.lane.b32.xlu1 %v4176_v55, 256  ;;  %4171 = vbcast.lane.b32.xlu0 %v4169_v38, 256  ;;  %v2855_v56 = vrot.slane %v8303_v54, %v6182_v3  ;;  %v2843_v53 = vrot.slane %v8308_v63, %v6179_v2 }
 0x1ce   : > { %v5728_v52 = vpop.eup %5727  ;;  %v2895_v37 = vmul.f32 %v8231_v44, %v2839_v9  ;;  %v2917_v40 = vadd.f32 %v2916_v21, %v2892_v48  ;;  %v2920_v28 = vadd.f32 %v2919_v10, %v2893_v22  ;;  %v8409_v36 = vadd.f32 %v3251_v26, %v7855_v8  ;;  %v10793_v26 = vld [vmem:[#allocation25_spill] sm:$0xff] }
 0x1cf   : > { %10789 = vst [vmem:[#allocation39_spill] sm:$0xff] %v8399_v6  ;;  %v5730_v15 = vpop.eup %5729  ;;  %v3261_v1 = vmul.f32 0.6931472, %v5728_v52  ;;  %v8412_v55 = vadd.f32 %v3229_v4, %v10777_v20  ;;  %v2898_v54 = vmul.f32 %v8240_v0, %v2851_v42  ;;  %v8416_v38 = vadd.f32 %v3231_v25, %v10779_v50  ;;  %v8418_v29 = vpop.permute.xlu1 %2968  ;;  %v5907_v4 = vld [vmem:[%s10184_s5 + $0xc] sm:$0x7]  ;;  %v10794_v25 = vld [vmem:[#allocation18_spill] sm:$0xff] }
 0x1d0   : > { %10790 = vst [vmem:[#allocation37_spill] sm:$0xff] %v8409_v36  ;;  %v3263_v51 = vmul.f32 0.6931472, %v5730_v15  ;;  %v2918_v34 = vadd.f32 %v2917_v40, %v2894_v27  ;;  %v2921_v19 = vadd.f32 %v2920_v28, %v2895_v37  ;;  %v2899_v9 = vmul.f32 %v8248_v5, %v2855_v56  ;;  %v8428_v22 = vpop.permute.xlu0 %2961  ;;  %v5908_v37 = vld [vmem:[%s10184_s5 + $0x8] sm:$0x7]  ;;  %v10796_v52 = vld [vmem:[#allocation26_spill] sm:$0xff] }
 0x1d1   : > { %10791 = vst [vmem:[#allocation12_spill] sm:$0xff] %v8412_v55  ;;  %10792 = vst [vmem:[#allocation40_spill] sm:$0xff] %v8416_v38  ;;  %v2847_v10 = vrot.slane %v8308_v63, %v6182_v3  ;;  %v2896_v21 = vmul.f32 %v10793_v26, %v2843_v53  ;;  %v4190_v48 = vrot.slane %v5907_v4, %v10788_v13  ;;  %v10795_v27 = vld [vmem:[#allocation19_spill] sm:$0xff] }
 0x1d2   : > { %v8431_v40 = vadd.f32 %v3261_v1, %v10794_v25  ;;  %5735 = vlog2.f32 %v2918_v34  ;;  %v4183_v28 = vrot.slane %v5908_v37, %v10788_v13  ;;  %v2867_v63 = vrot.slane %v8338_v45, %v6179_v2 }
 0x1d3   : > { %v8440_v42 = vadd.f32 %v3263_v51, %v10795_v27  ;;  %5737 = vlog2.f32 %v2921_v19  ;;  %v2897_v56 = vmul.f32 %v10796_v52, %v2847_v10  ;;  %v2922_v53 = vadd.f32 %v2898_v54, %v2896_v21  ;;  %4192 = vbcast.lane.b32.xlu1 %v4190_v48, 256  ;;  %v8450_v37 = vpop.permute.xlu1 %2982  ;;  %v5909_v54 = vld [vmem:[%s10184_s5 + $0x14] sm:$0x7] }
 0x1d4   : > { %4185 = vbcast.lane.b32.xlu0 %v4183_v28, 256  ;;  %v2871_v34 = vrot.slane %v8338_v45, %v6182_v3  ;;  %v2902_v15 = vmul.f32 %v8267_v61, %v2867_v63  ;;  %v2859_v1 = vrot.slane %v8344_v33, %v6179_v2  ;;  %v2863_v4 = vrot.slane %v8344_v33, %v6182_v3  ;;  %v5910_v45 = vld [vmem:[%s10184_s5 + $0x10] sm:$0x7]  ;;  %v8462_v33 = vpop.permute.xlu0 %2975 }
 0x1d5   : > { %v5732_v51 = vpop.eup %5731  ;;  %v2925_v19 = vadd.f32 %v2899_v9, %v2897_v56  ;;  %v4204_v10 = vrot.slane %v5909_v54, %v10788_v13  ;;  %v4197_v21 = vrot.slane %v5910_v45, %v10788_v13  ;;  %v3051_v48 = vrot.slane %v8373_v17, %v6179_v2 }
 0x1d6   : > { %v5734_v28 = vpop.eup %5733  ;;  %v3241_v63 = vmul.f32 0.6931472, %v5732_v51  ;;  %v2903_v9 = vmul.f32 %v8272_v39, %v2871_v34  ;;  %v2900_v56 = vmul.f32 %v8118_v35, %v2859_v1  ;;  %v2901_v61 = vmul.f32 %v8128_v43, %v2863_v4 }
 0x1d7   : > { %v3243_v54 = vmul.f32 0.6931472, %v5734_v28  ;;  %4206 = vbcast.lane.b32.xlu1 %v4204_v10, 256  ;;  %v3055_v50 = vrot.slane %v8373_v17, %v6182_v3  ;;  %v3170_v45 = vmul.f32 %v8001_v46, %v3051_v48  ;;  %v3043_v20 = vrot.slane %v8377_v12, %v6179_v2  ;;  %v10797_v17 = vld [vmem:[#allocation47_spill] sm:$0xff]  ;;  %v5911_v46 = vld [vmem:[%s10184_s5 + $0x1c] sm:$0x7]  ;;  %v8486_v28 = vpop.permute.xlu1 %2996 }
 0x1d8   : > { %v8473_v52 = vadd.f32 %v3241_v63, %v7737_v7  ;;  %v2923_v51 = vadd.f32 %v2922_v53, %v2900_v56  ;;  %v2926_v26 = vadd.f32 %v2925_v19, %v2901_v61  ;;  %4199 = vbcast.lane.b32.xlu0 %v4197_v21, 256  ;;  %v3047_v34 = vrot.slane %v8377_v12, %v6182_v3  ;;  %v8488_v61 = vpop.permute.xlu0 %2989 }
 0x1d9   : > { %v8478_v1 = vadd.f32 %v3243_v54, %v10783_v47  ;;  %v3171_v4 = vmul.f32 %v8020_v11, %v3055_v50  ;;  %v3168_v10 = vmul.f32 %v10797_v17, %v3043_v20  ;;  %v4218_v48 = vrot.slane %v5911_v46, %v10788_v13 }
 0x1da   : > { %v8492_v12 = vadd.f32 %v8326_v62, %v8412_v55  ;;  %v8496_v53 = vadd.f32 %v8334_v14, %v8416_v38  ;;  %v2924_v11 = vadd.f32 %v2923_v51, %v2902_v15  ;;  %v2927_v20 = vadd.f32 %v2926_v26, %v2903_v9  ;;  %v5912_v26 = vld [vmem:[%s10184_s5 + $0x18] sm:$0x7] }
 0x1db   : > { %v8500_v50 = vadd.f32 %v8431_v40, %v8399_v6  ;;  %v8504_v19 = vadd.f32 %v8440_v42, %v8409_v36  ;;  %v8508_v21 = vadd.f32 %v8473_v52, %v8294_v58  ;;  %v3169_v63 = vmul.f32 %v7763_v24, %v3047_v34  ;;  %4220 = vbcast.lane.b32.xlu1 %v4218_v48, 256  ;;  %v8525_v34 = vpop.permute.xlu1 %3010 }
 0x1dc   : > { %10798 = vst [vmem:[#allocation41_spill] sm:$0xff] %v8492_v12  ;;  %10799 = vst [vmem:[#allocation44_spill] sm:$0xff] %v8496_v53  ;;  %v8513_v56 = vadd.f32 %v8473_v52, %v8412_v55  ;;  %5739 = vlog2.f32 %v2924_v11  ;;  %v4211_v15 = vrot.slane %v5912_v26, %v10788_v13  ;;  %v3067_v9 = vrot.slane %v8396_v60, %v6179_v2  ;;  %v8527_v17 = vpop.permute.xlu0 %3003  ;;  %v10801_v53 = vld [vmem:[#allocation14_spill] sm:$0xff] }
 0x1dd   : > { %v8523_v54 = vadd.f32 %v8478_v1, %v8297_v18  ;;  %5741 = vlog2.f32 %v2927_v20  ;;  %v3200_v24 = vadd.f32 %v3170_v45, %v3168_v10  ;;  %v3203_v51 = vadd.f32 %v3171_v4, %v3169_v63  ;;  %v5913_v20 = vld [vmem:[%s10184_s5 + $0x24] sm:$0x7]  ;;  %v5914_v63 = vld [vmem:[%s10184_s5 + $0x20] sm:$0x7] }
 0x1de   : > { %10800 = vst [vmem:[#allocation45_spill] sm:$0xff] %v8513_v56  ;;  %4213 = vbcast.lane.b32.xlu0 %v4211_v15, 256  ;;  %v3071_v46 = vrot.slane %v8396_v60, %v6182_v3  ;;  %v3059_v48 = vrot.slane %v8405_v59, %v6179_v2  ;;  %v3063_v11 = vrot.slane %v8405_v59, %v6182_v3 }
 0x1df   : > { %v4232_v45 = vrot.slane %v5913_v20, %v10788_v13  ;;  %v5736_v4 = vpop.eup %5735  ;;  %v3174_v10 = vmul.f32 %v8044_v30, %v3067_v9  ;;  %v4225_v60 = vrot.slane %v5914_v63, %v10788_v13  ;;  %v3083_v26 = vrot.slane %v8418_v29, %v6179_v2  ;;  %v8556_v58 = vpop.permute.xlu1 %3024 }
 0x1e0   : > { %v3087_v59 = vrot.slane %v8418_v29, %v6182_v3  ;;  %v5738_v15 = vpop.eup %5737  ;;  %v3253_v56 = vmul.f32 0.6931472, %v5736_v4  ;;  %v3172_v12 = vmul.f32 %v10801_v53, %v3059_v48  ;;  %v3173_v20 = vmul.f32 %v7776_v41, %v3063_v11  ;;  %v10802_v29 = vld [vmem:[#allocation23_spill] sm:$0xff]  ;;  %v8560_v48 = vpop.permute.xlu0 %3017 }
 0x1e1   : > { %4234 = vbcast.lane.b32.xlu1 %v4232_v45, 256  ;;  %v3075_v30 = vrot.slane %v8428_v22, %v6179_v2  ;;  %v3255_v9 = vmul.f32 0.6931472, %v5738_v15  ;;  %v3178_v55 = vmul.f32 %v8092_v23, %v3083_v26  ;;  %v3079_v18 = vrot.slane %v8428_v22, %v6182_v3 }
 0x1e2   : > { %v3179_v63 = vmul.f32 %v8137_v57, %v3087_v59  ;;  %v3175_v4 = vmul.f32 %v10802_v29, %v3071_v46  ;;  %v3201_v39 = vadd.f32 %v3200_v24, %v3172_v12  ;;  %v3204_v53 = vadd.f32 %v3203_v51, %v3173_v20  ;;  %4227 = vbcast.lane.b32.xlu0 %v4225_v60, 256  ;;  %v5915_v57 = vld [vmem:[%s10184_s5 + $0x2c] sm:$0x7]  ;;  %v5916_v12 = vld [vmem:[%s10184_s5 + $0x28] sm:$0x7]  ;;  %v10805_v20 = vld [vmem:[#allocation24_spill] sm:$0xff] }
 0x1e3   : > { %v3176_v41 = vmul.f32 %v7847_v16, %v3075_v30  ;;  %v8564_v11 = vadd.f32 %v8478_v1, %v8416_v38  ;;  %v3177_v23 = vmul.f32 %v7860_v31, %v3079_v18  ;;  %v4246_v22 = vrot.slane %v5915_v57, %v10788_v13  ;;  %v8585_v59 = vpop.permute.xlu1 %3038 }
 0x1e4   : > { %v4239_v16 = vrot.slane %v5916_v12, %v10788_v13  ;;  %v8576_v24 = vadd.f32 %v3253_v56, %v7840_v32  ;;  %v8579_v51 = vadd.f32 %v3255_v9, %v7855_v8  ;;  %v3202_v46 = vadd.f32 %v3201_v39, %v3174_v10  ;;  %v8595_v15 = vpop.permute.xlu0 %3031  ;;  %v5918_v9 = vld [vmem:[%s10184_s5 + $0x30] sm:$0x7]  ;;  %v10808_v12 = vld [vmem:[#allocation33_spill] sm:$0xff] }
 0x1e5   : > { %10803 = vst [vmem:[#allocation48_spill] sm:$0xff] %v8564_v11  ;;  %v3205_v31 = vadd.f32 %v3204_v53, %v3175_v4  ;;  %v3206_v18 = vadd.f32 %v3178_v55, %v3176_v41  ;;  %v3209_v45 = vadd.f32 %v3179_v63, %v3177_v23  ;;  %4248 = vbcast.lane.b32.xlu1 %v4246_v22, 256  ;;  %v5917_v55 = vld [vmem:[%s10184_s5 + $0x34] sm:$0x7] }
 0x1e6   : > { %10804 = vst [vmem:[#allocation51_spill] sm:$0xff] %v8576_v24  ;;  %v3099_v60 = vrot.slane %v8450_v37, %v6179_v2  ;;  %v3103_v26 = vrot.slane %v8450_v37, %v6182_v3  ;;  %5743 = vlog2.f32 %v3202_v46  ;;  %4241 = vbcast.lane.b32.xlu0 %v4239_v16, 256  ;;  %v3091_v56 = vrot.slane %v8462_v33, %v6179_v2  ;;  %v10807_v4 = vld [vmem:[#allocation16_spill] sm:$0xff] }
 0x1e7   : > { %v3095_v39 = vrot.slane %v8462_v33, %v6182_v3  ;;  %v4260_v10 = vrot.slane %v5917_v55, %v10788_v13  ;;  %5745 = vlog2.f32 %v3205_v31  ;;  %v4253_v63 = vrot.slane %v5918_v9, %v10788_v13  ;;  %v10806_v33 = vld [vmem:[#allocation50_spill] sm:$0xff]  ;;  %v10809_v46 = vld [vmem:[#allocation32_spill] sm:$0xff]  ;;  %v10810_v55 = vld [vmem:[#allocation27_spill] sm:$0xff] }
 0x1e8   : > { %v3182_v37 = vmul.f32 %v8147_v49, %v3099_v60  ;;  %v3183_v30 = vmul.f32 %v10805_v20, %v3103_v26  ;;  %v3180_v29 = vmul.f32 %v10806_v33, %v3091_v56  ;;  %v3115_v41 = vrot.slane %v8486_v28, %v6179_v2  ;;  %v8617_v60 = vpop.permute.xlu1 %3502  ;;  %v8620_v20 = vpop.permute.xlu0 %3495  ;;  %v10811_v33 = vld [vmem:[#allocation67_spill] sm:$0xff] }
 0x1e9   : > { %v3181_v53 = vmul.f32 %v10807_v4, %v3095_v39  ;;  %v3119_v23 = vrot.slane %v8486_v28, %v6182_v3  ;;  %v5740_v57 = vpop.eup %5739  ;;  %4262 = vbcast.lane.b32.xlu1 %v4260_v10, 256  ;;  %v3107_v49 = vrot.slane %v8488_v61, %v6179_v2  ;;  %v3111_v22 = vrot.slane %v8488_v61, %v6182_v3  ;;  %v10812_v4 = vld [vmem:[#allocation20_spill] sm:$0xff] }
 0x1ea   : > { %v4274_v16 = vrot.slane %v10808_v12, %v10788_v13  ;;  %v4267_v31 = vrot.slane %v10809_v46, %v10788_v13  ;;  %v5742_v26 = vpop.eup %5741  ;;  %v3265_v56 = vmul.f32 0.6931472, %v5740_v57  ;;  %v3207_v39 = vadd.f32 %v3206_v18, %v3180_v29  ;;  %4255 = vbcast.lane.b32.xlu0 %v4253_v63, 256  ;;  %v10813_v12 = vld [vmem:[#allocation22_spill] sm:$0xff] }
 0x1eb   : > { %v3210_v28 = vadd.f32 %v3209_v45, %v3181_v53  ;;  %v3186_v10 = vmul.f32 %v10810_v55, %v3115_v41  ;;  %v3267_v9 = vmul.f32 0.6931472, %v5742_v26  ;;  %v3187_v61 = vmul.f32 %v10811_v33, %v3119_v23  ;;  %v10814_v45 = vld [vmem:[#allocation36_spill] sm:$0xff]  ;;  %v10815_v29 = vld [vmem:[#allocation38_spill] sm:$0xff] }
 0x1ec   : > { %v3184_v8 = vmul.f32 %v10812_v4, %v3107_v49  ;;  %v3185_v32 = vmul.f32 %v10813_v12, %v3111_v22  ;;  %v8626_v46 = vadd.f32 %v3265_v56, %v10794_v25  ;;  %v3208_v11 = vadd.f32 %v3207_v39, %v3182_v37  ;;  %v8641_v57 = vpop.permute.xlu1 %3516  ;;  %v8647_v22 = vpop.permute.xlu0 %3509  ;;  %v10820_v39 = vld [vmem:[#allocation28_spill] sm:$0xff]  ;;  %v10824_v4 = vld [vmem:[#allocation10_spill] sm:$0xff] }
 0x1ed   : > { %v3211_v38 = vadd.f32 %v3210_v28, %v3183_v30  ;;  %v3131_v18 = vrot.slane %v8525_v34, %v6179_v2  ;;  %v8636_v41 = vadd.f32 %v8431_v40, %v8576_v24  ;;  %v8639_v23 = vadd.f32 %v3267_v9, %v10795_v27  ;;  %4276 = vbcast.lane.b32.xlu1 %v4274_v16, 256 }
 0x1ee   : > { %10817 = vst [vmem:[#allocation53_spill] sm:$0xff] %v8641_v57  ;;  %v8645_v37 = vadd.f32 %v8440_v42, %v8579_v51  ;;  %5747 = vlog2.f32 %v3208_v11  ;;  %v3212_v30 = vadd.f32 %v3186_v10, %v3184_v8  ;;  %v3215_v49 = vadd.f32 %v3187_v61, %v3185_v32  ;;  %4269 = vbcast.lane.b32.xlu0 %v4267_v31, 256  ;;  %v10821_v11 = vld [vmem:[#allocation34_spill] sm:$0xff]  ;;  %v10823_v61 = vld [vmem:[#allocation21_spill] sm:$0xff] }
 0x1ef   : > { %10816 = vst [vmem:[#allocation52_spill] sm:$0xff] %v8636_v41  ;;  %v8651_v26 = vadd.f32 %v8626_v46, %v8399_v6  ;;  %v8655_v56 = vadd.f32 %v8626_v46, %v8576_v24  ;;  %5749 = vlog2.f32 %v3211_v38  ;;  %v3135_v16 = vrot.slane %v8525_v34, %v6182_v3  ;;  %v10822_v38 = vld [vmem:[#allocation35_spill] sm:$0xff]  ;;  %v10826_v24 = vld [vmem:[#allocation26_spill] sm:$0xff] }
 0x1f0   : > { %10818 = vst [vmem:[#allocation54_spill] sm:$0xff] %v8645_v37  ;;  %v3190_v28 = vmul.f32 %v10820_v39, %v3131_v18  ;;  %v3123_v32 = vrot.slane %v8527_v17, %v6179_v2  ;;  %v3127_v8 = vrot.slane %v8527_v17, %v6182_v3  ;;  %v4288_v31 = vrot.slane %v10821_v11, %v10788_v13  ;;  %v8676_v33 = vpop.permute.xlu1 %3530  ;;  %v8687_v11 = vpop.permute.xlu0 %3523 }
 0x1f1   : > { %10819 = vst [vmem:[#allocation55_spill] sm:$0xff] %v8655_v56  ;;  %v8668_v55 = vadd.f32 %v8639_v23, %v8409_v36  ;;  %v4281_v10 = vrot.slane %v10822_v38, %v10788_v13  ;;  %v3147_v34 = vrot.slane %v8556_v58, %v6179_v2  ;;  %v3151_v9 = vrot.slane %v8556_v58, %v6182_v3  ;;  %v5565_v13 = vld.sshfl [vmem:[%s10185_s6] sm:$0x11 pattern:$0x75316420]  ;;  %v10825_v56 = vld [vmem:[#allocation25_spill] sm:$0xff] }
 0x1f2   : > { %v3188_v17 = vmul.f32 %v10823_v61, %v3123_v32  ;;  %v3189_v12 = vmul.f32 %v10824_v4, %v3127_v8  ;;  %4290 = vbcast.lane.b32.xlu1 %v4288_v31, 256  ;;  %v3139_v18 = vrot.slane %v8560_v48, %v6179_v2  ;;  %v3143_v39 = vrot.slane %v8560_v48, %v6182_v3 }
 0x1f3   : > { %v5744_v58 = vpop.eup %5743  ;;  %v3191_v38 = vmul.f32 %v8231_v44, %v3135_v16  ;;  %4283 = vbcast.lane.b32.xlu0 %v4281_v10, 256  ;;  %v3194_v32 = vmul.f32 %v8240_v0, %v3147_v34  ;;  %v3195_v8 = vmul.f32 %v8248_v5, %v3151_v9  ;;  %v6018_v31 = vmov 1966171168   ;;  %v10827_v0 = vld [vmem:[#allocation15_spill] sm:$0xff] }
 0x1f4   : > { %v4656_v61 = vunpack.c.l.s4 %v6018_v31  ;;  %v5746_v4 = vpop.eup %5745  ;;  %v3233_v53 = vmul.f32 0.6931472, %v5744_v58  ;;  %v3213_v63 = vadd.f32 %v3212_v30, %v3188_v17  ;;  %v3216_v48 = vadd.f32 %v3215_v49, %v3189_v12  ;;  %v8694_v25 = vpop.permute.xlu1 %3544  ;;  %v10830_v17 = vld [vmem:[#allocation13_spill] sm:$0xff] }
 0x1f5   : > { %v3192_v37 = vmul.f32 %v10825_v56, %v3139_v18  ;;  %v3235_v41 = vmul.f32 0.6931472, %v5746_v4  ;;  %v3193_v36 = vmul.f32 %v10826_v24, %v3143_v39  ;;  %v4654_v6 = vcombine.high %v5565_v13, %v5565_v13  ;;  %v8703_v30 = vpop.permute.xlu0 %3537  ;;  %v10829_v56 = vld [vmem:[#allocation8_spill] sm:$0xff] }
 0x1f6   : > { %v4657_v27 = vunpack.c.0.s8 %v4656_v61  ;;  %v8698_v44 = vadd.f32 %v8639_v23, %v8579_v51  ;;  %v8701_v5 = vadd.f32 %v3233_v53, %v10827_v0  ;;  %v3214_v16 = vadd.f32 %v3213_v63, %v3190_v28  ;;  %10828 = vst [vmem:[#allocation62_spill] sm:$0xff] %v8703_v30  ;;  %v5566_v28 = vld.sshfl [vmem:[%s10185_s6 + $0x2] sm:$0x11 pattern:$0x75316420] }
 0x1f7   : > { %v3217_v10 = vadd.f32 %v3216_v48, %v3191_v38  ;;  %v3163_v9 = vrot.slane %v8585_v59, %v6179_v2  ;;  %v8715_v12 = vadd.f32 %v3235_v41, %v10830_v17  ;;  %v3218_v63 = vadd.f32 %v3194_v32, %v3192_v37 }
 0x1f8   : > { %v8710_v34 = vsub.s32 %v4657_v27, %v10829_v56  ;;  %5751 = vlog2.f32 %v3214_v16  ;;  %v3221_v53 = vadd.f32 %v3195_v8, %v3193_v36  ;;  %v8722_v18 = vadd.f32 %v8326_v62, %v8701_v5  ;;  %v8727_v58 = vpop.permute.xlu1 %3558 }
 0x1f9   : > { %5753 = vlog2.f32 %v3217_v10  ;;  %v3167_v39 = vrot.slane %v8585_v59, %v6182_v3  ;;  %10831 = vst [vmem:[#allocation63_spill] sm:$0xff] %v8727_v58  ;;  %v8731_v41 = vadd.f32 %v8473_v52, %v8701_v5  ;;  %v3155_v37 = vrot.slane %v8595_v15, %v6179_v2  ;;  %v8738_v38 = vpop.permute.xlu0 %3551  ;;  %v10833_v59 = vld [vmem:[#allocation29_spill] sm:$0xff] }
 0x1fa   : > { %v4668_v27 = vrot.slane %v4654_v6, %v8710_v34  ;;  %v4661_v36 = vrot.slane %v5565_v13, %v8710_v34  ;;  %v3159_v62 = vrot.slane %v8595_v15, %v6182_v3  ;;  %v3198_v8 = vmul.f32 %v10833_v59, %v3163_v9 }
 0x1fb   : > { %v5748_v6 = vpop.eup %5747  ;;  %v4683_v31 = vrot.slane %v5566_v28, %v8710_v34  ;;  %v4676_v52 = vcombine.high %v5566_v28, %v5566_v28  ;;  %v3196_v48 = vmul.f32 %v8118_v35, %v3155_v37  ;;  %v8752_v0 = vadd.f32 %v8334_v14, %v8715_v12  ;;  %v5567_v28 = vld.sshfl [vmem:[%s10185_s6 + $0x4] sm:$0x11 pattern:$0x75316420] }
 0x1fc   : > { %v8741_v32 = vrot.slane %v4668_v27, %v6179_v2  ;;  %v5750_v61 = vpop.eup %5749  ;;  %v3245_v4 = vmul.f32 0.6931472, %v5748_v6  ;;  %v8746_v13 = vrot.slane %v4661_v36, %v6179_v2  ;;  %v3197_v15 = vmul.f32 %v8128_v43, %v3159_v62  ;;  %v8759_v9 = vpop.permute.xlu1 %3572  ;;  %v10837_v37 = vld [vmem:[#allocation30_spill] sm:$0xff] }
 0x1fd   : > { %v3247_v16 = vmul.f32 0.6931472, %v5750_v61  ;;  %v8756_v10 = vrot.slane %v4683_v31, %v6179_v2  ;;  %v4690_v56 = vrot.slane %v4676_v52, %v8710_v34  ;;  %v8763_v17 = vadd.f32 %v8478_v1, %v8715_v12  ;;  %v8770_v27 = vpop.permute.xlu0 %3565  ;;  %v10840_v52 = vld [vmem:[#allocation11_spill] sm:$0xff] }
 0x1fe   : > { %10832 = vst [vmem:[#allocation69_spill] sm:$0xff] %v8741_v32  ;;  %10834 = vst [vmem:[#allocation70_spill] sm:$0xff] %v8746_v13  ;;  %4922 = vperm.xlu1 %5637, %v8741_v32   ;;  %v3282_v43 = vadd.f32 %v3245_v4, %v7737_v7  ;;  %4918 = vperm.xlu0 %5636, %v8746_v13   ;;  %v3219_v35 = vadd.f32 %v3218_v63, %v3196_v48  ;;  %v10839_v7 = vld [vmem:[#allocation31_spill] sm:$0xff] }
 0x1ff   : > { %10835 = vst [vmem:[#allocation42_spill] sm:$0xff] %v8756_v10  ;;  %v3222_v14 = vadd.f32 %v3221_v53, %v3197_v15  ;;  %10836 = vst [vmem:[#allocation58_spill] sm:$0xff] %v8770_v27  ;;  %v3283_v36 = vadd.f32 %v3247_v16, %v10783_v47  ;;  %v3199_v62 = vmul.f32 %v10837_v37, %v3167_v39  ;;  %v5568_v37 = vld.sshfl [vmem:[%s10185_s6 + $0x6] sm:$0x11 pattern:$0x75316420] }
 0x200   : > { %v8775_v6 = vrot.slane %v4690_v56, %v6179_v2  ;;  %v4705_v1 = vrot.slane %v5567_v28, %v8710_v34  ;;  %v8779_v59 = vadd.f32 %v3282_v43, %v10839_v7  ;;  %v3220_v63 = vadd.f32 %v3219_v35, %v3198_v8  ;;  %v8793_v48 = vpop.permute.xlu1 %3586  ;;  %v10842_v8 = vld [vmem:[#allocation12_spill] sm:$0xff] }
 0x201   : > { %v8786_v61 = vadd.f32 %v3283_v36, %v10840_v52  ;;  %v3223_v47 = vadd.f32 %v3222_v14, %v3199_v62  ;;  %10841 = vst [vmem:[#allocation43_spill] sm:$0xff] %v8793_v48  ;;  %v8796_v15 = vadd.f32 %v3282_v43, %v10842_v8  ;;  %v10843_v16 = vmax.f32 %v10814_v45, %v8508_v21  ;;  %v8809_v62 = vpop.permute.xlu0 %3579  ;;  %v10846_v7 = vld [vmem:[#allocation40_spill] sm:$0xff] }
 0x202   : > { %10838 = vst [vmem:[#allocation61_spill] sm:$0xff] %v8775_v6  ;;  %4926 = vperm.xlu1 %5637, %v8756_v10   ;;  %4930 = vperm.xlu0 %5636, %v8775_v6   ;;  %v8804_v35 = vrot.slane %v4705_v1, %v6179_v2  ;;  %v4698_v14 = vcombine.high %v5567_v28, %v5567_v28  ;;  %10845 = vst [vmem:[#allocation66_spill] sm:$0xff] %v8809_v62  ;;  %5755 = vlog2.f32 %v3220_v63  ;;  %v10848_v1 = vld [vmem:[#allocation41_spill] sm:$0xff]  ;;  %v10853_v6 = vld [vmem:[#allocation48_spill] sm:$0xff] }
 0x203   : > { %v3351_v56 = vmax.f32 %v10843_v16, %v8779_v59  ;;  %v8812_v52 = vadd.f32 %v3283_v36, %v10846_v7  ;;  %v8815_v8 = vadd.f32 %v3282_v43, %v8701_v5  ;;  %v10847_v16 = vmax.f32 %v10815_v29, %v8523_v54  ;;  %v10849_v7 = vld [vmem:[#allocation44_spill] sm:$0xff] }
 0x204   : > { %10844 = vst [vmem:[#allocation64_spill] sm:$0xff] %v8804_v35  ;;  %v8822_v28 = vadd.f32 %v3283_v36, %v8715_v12  ;;  %5757 = vlog2.f32 %v3223_v47  ;;  %v4712_v53 = vrot.slane %v4698_v14, %v8710_v34  ;;  %v4727_v43 = vrot.slane %v5568_v37, %v8710_v34  ;;  %v8831_v63 = vpop.permute.xlu1 %3600  ;;  %v10851_v36 = vld [vmem:[#allocation45_spill] sm:$0xff] }
 0x205   : > { %v3359_v4 = vmax.f32 %v10847_v16, %v8786_v61  ;;  %v3352_v31 = vmax.f32 %v3351_v56, %v10848_v1  ;;  %v5752_v39 = vpop.eup %5751  ;;  %v4720_v16 = vcombine.high %v5568_v37, %v5568_v37  ;;  %10850 = vst [vmem:[#allocation68_spill] sm:$0xff] %v8831_v63  ;;  %v8839_v14 = vpop.permute.xlu0 %3593 }
 0x206   : > { %4934 = vperm.xlu1 %5637, %v8804_v35   ;;  %v5754_v12 = vpop.eup %5753  ;;  %v3257_v56 = vmul.f32 0.6931472, %v5752_v39  ;;  %v8835_v47 = vrot.slane %v4712_v53, %v6179_v2  ;;  %v8843_v10 = vrot.slane %v4727_v43, %v6179_v2  ;;  %v10855_v39 = vld [vmem:[#allocation49_spill] sm:$0xff] }
 0x207   : > { %v3360_v24 = vmax.f32 %v3359_v4, %v10849_v7  ;;  %v3353_v49 = vmax.f32 %v3352_v31, %v10851_v36  ;;  %v3259_v5 = vmul.f32 0.6931472, %v5754_v12  ;;  %v4734_v37 = vrot.slane %v4720_v16, %v8710_v34  ;;  %v5569_v31 = vld.sshfl [vmem:[%s10185_s6 + $0x8] sm:$0x11 pattern:$0x75316420] }
 0x208   : > { %10852 = vst [vmem:[#allocation71_spill] sm:$0xff] %v8835_v47  ;;  %10854 = vst [vmem:[#allocation72_spill] sm:$0xff] %v8843_v10  ;;  %v8851_v32 = vadd.f32 %v3257_v56, %v10855_v39  ;;  %4938 = vperm.xlu0 %5636, %v8835_v47   ;;  %v10856_v16 = vld [vmem:[#allocation9_spill] sm:$0xff]  ;;  %v4749_v56 = vrot.slane %v5569_v31, %v8710_v34  ;;  %v8867_v39 = vpop.permute.xlu1 %3614  ;;  %v4742_v43 = vcombine.high %v5569_v31, %v5569_v31 }
 0x209   : > { %v3361_v35 = vmax.f32 %v3360_v24, %v10853_v6  ;;  %v3354_v53 = vmax.f32 %v3353_v49, %v8796_v15  ;;  %v8860_v4 = vadd.f32 %v3259_v5, %v10856_v16  ;;  %v8864_v49 = vrot.slane %v4734_v37, %v6179_v2  ;;  %v8882_v57 = vpop.permute.xlu0 %3607 }
 0x20a   : > { %4942 = vperm.xlu1 %5637, %v8843_v10   ;;  %v8880_v10 = vrot.slane %v4749_v56, %v6179_v2  ;;  %10859 = vst [vmem:[#allocation59_spill] sm:$0xff] %v8882_v57  ;;  %v8887_v24 = vadd.f32 %v8431_v40, %v8851_v32  ;;  %v8891_v31 = vadd.f32 %v8626_v46, %v8851_v32  ;;  %v5570_v56 = vld.sshfl [vmem:[%s10185_s6 + $0xa] sm:$0x11 pattern:$0x75316420] }
 0x20b   : > { %v3362_v12 = vmax.f32 %v3361_v35, %v8812_v52  ;;  %10857 = vst [vmem:[#allocation56_spill] sm:$0xff] %v8864_v49  ;;  %v3355_v47 = vmax.f32 %v3354_v53, %v8722_v18  ;;  %v8905_v40 = vadd.f32 %v8639_v23, %v8860_v4  ;;  %v4771_v46 = vrot.slane %v5570_v56, %v8710_v34 }
 0x20c   : > { %10858 = vst [vmem:[#allocation57_spill] sm:$0xff] %v8880_v10  ;;  %4946 = vperm.xlu0 %5636, %v8864_v49   ;;  %v8919_v35 = vpop.permute.xlu1 %3840 }
 0x20d   : > { %v3363_v5 = vmax.f32 %v3362_v12, %v8752_v0  ;;  %v3356_v53 = vmax.f32 %v3355_v47, %v8731_v41  ;;  %v4756_v12 = vrot.slane %v4742_v43, %v8710_v34  ;;  %v8901_v47 = vadd.f32 %v8440_v42, %v8860_v4  ;;  %10862 = vst [vmem:[#allocation46_spill] sm:$0xff] %v8919_v35  ;;  %v8938_v57 = vpop.permute.xlu0 %3833 }
 0x20e   : > { %4950 = vperm.xlu1 %5637, %v8880_v10   ;;  %v4764_v42 = vcombine.high %v5570_v56, %v5570_v56  ;;  %10865 = vst [vmem:[#allocation14_spill] sm:$0xff] %v8938_v57 }
 0x20f   : > { %v3364_v37 = vmax.f32 %v3363_v5, %v8763_v17  ;;  %v8910_v43 = vmax.f32 %v3356_v53, %v8815_v8  ;;  %v8913_v16 = vrot.slane %v4756_v12, %v6179_v2  ;;  %v8929_v12 = vrot.slane %v4771_v46, %v6179_v2  ;;  %v5756_v49 = vpop.eup %5755 }
 0x211   : > { %10860 = vst [vmem:[#allocation60_spill] sm:$0xff] %v8910_v43  ;;  %10861 = vst [vmem:[#allocation65_spill] sm:$0xff] %v8913_v16  ;;  %v8922_v23 = vmax.f32 %v3364_v37, %v8822_v28  ;;  %v3382_v5 = vsub.f32 %v10814_v45, %v8910_v43  ;;  %4954 = vperm.xlu0 %5636, %v8913_v16   ;;  %v5758_v35 = vpop.eup %5757  ;;  %v3384_v46 = vsub.f32 %v8508_v21, %v8910_v43 }
 0x212   : > { %10864 = vst [vmem:[#allocation47_spill] sm:$0xff] %v8929_v12  ;;  %v3386_v53 = vsub.f32 %v8779_v59, %v8910_v43  ;;  %v3388_v45 = vsub.f32 %v10848_v1, %v8910_v43  ;;  %4958 = vperm.xlu1 %5637, %v8929_v12   ;;  %v3390_v1 = vsub.f32 %v10851_v36, %v8910_v43  ;;  %v8971_v36 = vpop.permute.xlu1 %3854 }
 0x213   : > { %10863 = vst [vmem:[#allocation17_spill] sm:$0xff] %v8922_v23  ;;  %v3383_v10 = vsub.f32 %v10815_v29, %v8922_v23  ;;  %v3385_v37 = vsub.f32 %v8523_v54, %v8922_v23  ;;  %v3387_v21 = vsub.f32 %v8786_v61, %v8922_v23  ;;  %v3389_v59 = vsub.f32 %v10849_v7, %v8922_v23 }
 0x214   : > { %v3391_v58 = vsub.f32 %v10853_v6, %v8922_v23  ;;  %v3392_v56 = vsub.f32 %v8796_v15, %v8910_v43  ;;  %v3393_v29 = vsub.f32 %v8812_v52, %v8922_v23  ;;  %v3394_v54 = vsub.f32 %v8722_v18, %v8910_v43  ;;  %10866 = vst [vmem:[#allocation23_spill] sm:$0xff] %v8971_v36 }
 0x215   : > { %v3395_v61 = vsub.f32 %v8752_v0, %v8922_v23  ;;  %v3396_v7 = vsub.f32 %v8731_v41, %v8910_v43  ;;  %v3418_v16 = vmul.f32 1.442695, %v3382_v5  ;;  %v3397_v6 = vsub.f32 %v8763_v17, %v8922_v23  ;;  %v8979_v0 = vpop.permute.xlu0 %3847  ;;  %v5571_v17 = vld.sshfl [vmem:[%s10185_s6 + $0xc] sm:$0x11 pattern:$0x75316420] }
 0x216   : > { %v3398_v15 = vsub.f32 %v8815_v8, %v8910_v43  ;;  %v3399_v52 = vsub.f32 %v8822_v28, %v8922_v23  ;;  %v3426_v12 = vmul.f32 1.442695, %v3386_v53  ;;  %v3420_v18 = vmul.f32 1.442695, %v3383_v10 }
 0x217   : > { %v3422_v57 = vmul.f32 1.442695, %v3384_v46  ;;  %v3428_v30 = vmul.f32 1.442695, %v3387_v21  ;;  %5759 = vpow2.f32 %v3418_v16  ;;  %v3424_v41 = vmul.f32 1.442695, %v3385_v37 }
 0x218   : > { %5761 = vpow2.f32 %v3426_v12  ;;  %v3438_v5 = vmul.f32 1.442695, %v3392_v56  ;;  %v4778_v36 = vrot.slane %v4764_v42, %v8710_v34  ;;  %v3430_v8 = vmul.f32 1.442695, %v3388_v45  ;;  %v8987_v56 = vpop.permute.xlu1 %3868  ;;  %v10868_v45 = vld [vmem:[#allocation18_spill] sm:$0xff] }
 0x219   : > { %5763 = vpow2.f32 %v3428_v30  ;;  %v3432_v43 = vmul.f32 1.442695, %v3389_v59  ;;  %v3440_v28 = vmul.f32 1.442695, %v3393_v29  ;;  %v3434_v53 = vmul.f32 1.442695, %v3390_v1 }
 0x21a   : > { %v8985_v10 = vmul.f32 1.442695, %v3391_v58  ;;  %5765 = vpow2.f32 %v3438_v5  ;;  %v3450_v16 = vmul.f32 1.442695, %v3398_v15  ;;  %v3452_v46 = vmul.f32 1.442695, %v3399_v52  ;;  %v8997_v15 = vpop.permute.xlu0 %3861 }
 0x21b   : > { %5767 = vpow2.f32 %v3440_v28  ;;  %v3269_v37 = vmul.f32 0.6931472, %v5756_v49  ;;  %v3271_v12 = vmul.f32 0.6931472, %v5758_v35  ;;  %v8989_v42 = vmul.f32 1.442695, %v3394_v54 }
 0x21c   : > { %5769 = vpow2.f32 %v3450_v16  ;;  %v8992_v21 = vrot.slane %v4778_v36, %v6179_v2  ;;  %v4793_v30 = vrot.slane %v5571_v17, %v8710_v34  ;;  %v10869_v59 = vld [vmem:[#allocation19_spill] sm:$0xff]  ;;  %v4786_v29 = vcombine.high %v5571_v17, %v5571_v17  ;;  %v10872_v28 = vld [vmem:[#allocation37_spill] sm:$0xff] }
 0x21d   : > { %5771 = vpow2.f32 %v3452_v46  ;;  %v3294_v58 = vadd.f32 %v3269_v37, %v10868_v45  ;;  %v3295_v1 = vadd.f32 %v3271_v12, %v10869_v59  ;;  %v8999_v49 = vmul.f32 1.442695, %v3395_v61  ;;  %v10871_v52 = vld [vmem:[#allocation39_spill] sm:$0xff]  ;;  %v10879_v61 = vld [vmem:[#allocation54_spill] sm:$0xff] }
 0x21e   : > { %10867 = vst [vmem:[#allocation24_spill] sm:$0xff] %v8992_v21  ;;  %v3446_v35 = vmul.f32 1.442695, %v3396_v7  ;;  %5773 = vpow2.f32 %v3422_v57  ;;  %4962 = vperm.xlu0 %5636, %v8992_v21   ;;  %v9003_v54 = vrot.slane %v4793_v30, %v6179_v2  ;;  %v3448_v36 = vmul.f32 1.442695, %v3397_v6  ;;  %v10873_v46 = vld [vmem:[#allocation51_spill] sm:$0xff]  ;;  %v9047_v23 = vpop.permute.xlu0 %3875 }
 0x21f   : > { %v9006_v5 = vadd.f32 %v3294_v58, %v10871_v52  ;;  %v9009_v16 = vadd.f32 %v3295_v1, %v10872_v28  ;;  %5775 = vpow2.f32 %v3424_v41  ;;  %v4800_v57 = vrot.slane %v4786_v29, %v8710_v34  ;;  %v5572_v6 = vld.sshfl [vmem:[%s10185_s6 + $0xe] sm:$0x11 pattern:$0x75316420]  ;;  %v9036_v29 = vpop.permute.xlu1 %3882  ;;  %10880 = vst [vmem:[#allocation32_spill] sm:$0xff] %v9047_v23 }
 0x220   : > { %10870 = vst [vmem:[#allocation50_spill] sm:$0xff] %v9003_v54  ;;  %4966 = vperm.xlu1 %5637, %v9003_v54   ;;  %v9023_v37 = vadd.f32 %v3294_v58, %v10873_v46  ;;  %v9026_v12 = vadd.f32 %v3295_v1, %v8579_v51  ;;  %v10874_v41 = vmax.f32 %v8500_v50, %v8651_v26  ;;  %10876 = vst [vmem:[#allocation16_spill] sm:$0xff] %v9036_v29  ;;  %v10878_v46 = vld [vmem:[#allocation52_spill] sm:$0xff] }
 0x221   : > { %v10875_v45 = vmax.f32 %v8504_v19, %v8668_v55  ;;  %v9039_v52 = vadd.f32 %v3294_v58, %v8851_v32  ;;  %5777 = vpow2.f32 %v3420_v18  ;;  %v9042_v28 = vrot.slane %v4800_v57, %v6179_v2 }
 0x222   : > { %v3367_v30 = vmax.f32 %v10874_v41, %v9006_v5  ;;  %v4815_v51 = vrot.slane %v5572_v6, %v8710_v34  ;;  %5779 = vpow2.f32 %v3430_v8  ;;  %v4808_v17 = vcombine.high %v5572_v6, %v5572_v6  ;;  %v10883_v8 = vld [vmem:[#allocation55_spill] sm:$0xff] }
 0x223   : > { %v3375_v59 = vmax.f32 %v10875_v45, %v9009_v16  ;;  %10877 = vst [vmem:[#allocation33_spill] sm:$0xff] %v9042_v28  ;;  %v9052_v29 = vadd.f32 %v3295_v1, %v8860_v4  ;;  %5781 = vpow2.f32 %v3432_v43  ;;  %4970 = vperm.xlu0 %5636, %v9042_v28   ;;  %v10885_v43 = vrot.slane %v8620_v20, %v6179_v2 }
 0x224   : > { %v3368_v7 = vmax.f32 %v3367_v30, %v10878_v46  ;;  %v9049_v45 = vpop.eup %5759  ;;  %v9058_v18 = vrot.slane %v4815_v51, %v6179_v2  ;;  %5783 = vpow2.f32 %v3434_v53  ;;  %v10887_v32 = vrot.slane %v8647_v22, %v6179_v2 }
 0x225   : > { %v3376_v41 = vmax.f32 %v3375_v59, %v10879_v61  ;;  %v9060_v58 = vpop.eup %5761  ;;  %v3760_v30 = vmul.f32 %v9049_v45, %v10885_v43  ;;  %v4822_v59 = vrot.slane %v4808_v17, %v8710_v34  ;;  %5785 = vpow2.f32 %v8985_v10  ;;  %v5573_v17 = vld.sshfl [vmem:[%s10185_s6 + $0x10] sm:$0x11 pattern:$0x75316420] }
 0x226   : > { %10881 = vst [vmem:[#allocation27_spill] sm:$0xff] %v9058_v18  ;;  %10882 = vst [vmem:[#allocation67_spill] sm:$0xff] %v9060_v58  ;;  %v3369_v57 = vmax.f32 %v3368_v7, %v10883_v8  ;;  %v9066_v1 = vpop.eup %5763  ;;  %4974 = vperm.xlu1 %5637, %v9058_v18   ;;  %v9086_v43 = vmul.f32 %v9060_v58, %v10887_v32  ;;  %v9092_v7 = vpop.permute.xlu1 %3896  ;;  %5787 = vpow2.f32 %v3446_v35  ;;  %v10915_v18 = vld [vmem:[#allocation69_spill] sm:$0xff] }
 0x227   : > { %v3377_v6 = vmax.f32 %v3376_v41, %v8698_v44  ;;  %10884 = vst [vmem:[#allocation20_spill] sm:$0xff] %v9066_v1  ;;  %v9078_v51 = vpop.eup %5765  ;;  %10888 = vst [vmem:[#allocation36_spill] sm:$0xff] %v9092_v7  ;;  %v9103_v32 = vrot.slane %v4822_v59, %v6179_v2  ;;  %v10893_v28 = vrot.slane %v8676_v33, %v6179_v2  ;;  %5789 = vpow2.f32 %v3448_v36  ;;  %v9117_v35 = vpop.permute.xlu0 %3889 }
 0x228   : > { %10886 = vst [vmem:[#allocation22_spill] sm:$0xff] %v9078_v51  ;;  %v3370_v41 = vmax.f32 %v3369_v57, %v9023_v37  ;;  %v9094_v53 = vpop.eup %5767  ;;  %v10890_v57 = vrot.slane %v8647_v22, %v6182_v3  ;;  %10894 = vst [vmem:[#allocation35_spill] sm:$0xff] %v9117_v35  ;;  %5791 = vpow2.f32 %v8989_v42  ;;  %v10896_v35 = vrot.slane %v8676_v33, %v6182_v3 }
 0x229   : > { %v3378_v4 = vmax.f32 %v3377_v6, %v9026_v12  ;;  %10889 = vst [vmem:[#allocation38_spill] sm:$0xff] %v9094_v53  ;;  %10891 = vst [vmem:[#allocation28_spill] sm:$0xff] %v9103_v32  ;;  %v9107_v48 = vpop.eup %5769  ;;  %v9115_v22 = vmul.f32 %v9078_v51, %v10893_v28  ;;  %4978 = vperm.xlu0 %5636, %v9103_v32   ;;  %5793 = vpow2.f32 %v8999_v49 }
 0x22a   : > { %v9100_v6 = vmul.f32 %v9066_v1, %v10890_v57  ;;  %10892 = vst [vmem:[#allocation34_spill] sm:$0xff] %v9107_v48  ;;  %v3371_v23 = vmax.f32 %v3370_v41, %v8887_v24  ;;  %v9119_v59 = vpop.eup %5771  ;;  %v4830_v57 = vcombine.high %v5573_v17, %v5573_v17  ;;  %v9134_v51 = vmul.f32 %v9094_v53, %v10896_v35 }
 0x22b   : > { %v3379_v7 = vmax.f32 %v3378_v4, %v8901_v47  ;;  %10895 = vst [vmem:[#allocation21_spill] sm:$0xff] %v9119_v59  ;;  %v4837_v4 = vrot.slane %v5573_v17, %v8710_v34  ;;  %v9126_v10 = vpop.eup %5773  ;;  %v10897_v42 = vrot.slane %v8617_v60, %v6179_v2  ;;  %v10898_v17 = vrot.slane %v8738_v38, %v6179_v2 }
 0x22c   : > { %v3372_v28 = vmax.f32 %v3371_v23, %v8891_v31  ;;  %v4844_v33 = vrot.slane %v4830_v57, %v8710_v34  ;;  %v9151_v35 = vpop.eup %5775 }
 0x22d   : > { %v3380_v36 = vmax.f32 %v3379_v7, %v8905_v40  ;;  %v3762_v41 = vmul.f32 %v9126_v10, %v10897_v42  ;;  %v9145_v23 = vmul.f32 %v9107_v48, %v10898_v17  ;;  %v9148_v7 = vrot.slane %v4837_v4, %v6179_v2  ;;  %v9167_v17 = vpop.permute.xlu1 %3910 }
 0x22e   : > { %v9154_v49 = vmax.f32 %v3372_v28, %v9039_v52  ;;  %v10902_v42 = vrot.slane %v8738_v38, %v6182_v3  ;;  %10903 = vst [vmem:[#allocation15_spill] sm:$0xff] %v9167_v17  ;;  %v9171_v34 = vrot.slane %v4844_v33, %v6179_v2  ;;  %v6019_v48 = vmov 1  }
 0x22f   : > { %10899 = vst [vmem:[#allocation10_spill] sm:$0xff] %v9148_v7  ;;  %v9157_v32 = vmax.f32 %v3380_v36, %v9052_v29  ;;  %4982 = vperm.xlu1 %5637, %v9148_v7   ;;  %v9179_v36 = vpop.eup %5777  ;;  %v9185_v17 = vadd.f32 %v3762_v41, %v3760_v30 }
 0x230   : > { %10900 = vst [vmem:[#allocation25_spill] sm:$0xff] %v9154_v49  ;;  %v9163_v62 = vmul.f32 %v9119_v59, %v10902_v42  ;;  %10904 = vst [vmem:[#allocation8_spill] sm:$0xff] %v9171_v34  ;;  %v10906_v42 = vrot.slane %v8617_v60, %v6182_v3  ;;  %v9189_v59 = vpop.permute.xlu0 %3903  ;;  %v9191_v57 = vpop.eup %5779  ;;  %v3400_v28 = vsub.f32 %v8500_v50, %v9154_v49  ;;  %4986 = vperm.xlu0 %5636, %v9171_v34  }
 0x231   : > { %10901 = vst [vmem:[#allocation26_spill] sm:$0xff] %v9157_v32  ;;  %10905 = vst [vmem:[#allocation13_spill] sm:$0xff] %v9179_v36  ;;  %v3401_v38 = vsub.f32 %v8504_v19, %v9157_v32  ;;  %v3402_v60 = vsub.f32 %v8651_v26, %v9154_v49  ;;  %v3404_v30 = vsub.f32 %v9006_v5, %v9154_v49  ;;  %v9202_v41 = vpop.eup %5781 }
 0x232   : > { %v3763_v4 = vmul.f32 %v9151_v35, %v10906_v42  ;;  %10907 = vst [vmem:[#allocation29_spill] sm:$0xff] %v9189_v59  ;;  %10908 = vst [vmem:[#allocation30_spill] sm:$0xff] %v9191_v57  ;;  %v3403_v42 = vsub.f32 %v8668_v55, %v9157_v32  ;;  %v3405_v33 = vsub.f32 %v9009_v16, %v9157_v32  ;;  %v9212_v26 = vpop.eup %5783  ;;  %v3454_v63 = vmul.f32 1.442695, %v3400_v28 }
 0x233   : > { %10909 = vst [vmem:[#allocation31_spill] sm:$0xff] %v9202_v41  ;;  %v3406_v50 = vsub.f32 %v10878_v46, %v9154_v49  ;;  %v3407_v19 = vsub.f32 %v10879_v61, %v9157_v32  ;;  %10910 = vst [vmem:[#allocation11_spill] sm:$0xff] %v9212_v26  ;;  %v3408_v5 = vsub.f32 %v10883_v8, %v9154_v49  ;;  %5638 = vset.pattern.permute.xlu1 %v6019_v48  ;;  %v9233_v34 = vpop.eup %5785 }
 0x234   : > { %v3409_v59 = vsub.f32 %v8698_v44, %v9157_v32  ;;  %v3410_v55 = vsub.f32 %v9023_v37, %v9154_v49  ;;  %v3411_v16 = vsub.f32 %v9026_v12, %v9157_v32  ;;  %v3412_v46 = vsub.f32 %v8887_v24, %v9154_v49  ;;  %5028 = vperm.xlu1 %5638, %v8746_v13   ;;  %v9231_v37 = vpop.permute.xlu1 %3924  ;;  %v9239_v7 = vpop.eup %5787 }
 0x235   : > { %v3413_v61 = vsub.f32 %v8901_v47, %v9157_v32  ;;  %v3414_v8 = vsub.f32 %v8891_v31, %v9154_v49  ;;  %v3415_v44 = vsub.f32 %v8905_v40, %v9157_v32  ;;  %10911 = vst [vmem:[#allocation12_spill] sm:$0xff] %v9231_v37  ;;  %10912 = vst [vmem:[#allocation40_spill] sm:$0xff] %v9233_v34  ;;  %v3462_v47 = vmul.f32 1.442695, %v3404_v30  ;;  %v9246_v27 = vpop.permute.xlu0 %3917 }
 0x236   : > { %v3416_v12 = vsub.f32 %v9039_v52, %v9154_v49  ;;  %v3417_v24 = vsub.f32 %v9052_v29, %v9157_v32  ;;  %5639 = vset.pattern.permute.xlu0 %v6019_v48  ;;  %10913 = vst [vmem:[#allocation41_spill] sm:$0xff] %v9239_v7  ;;  %v3456_v31 = vmul.f32 1.442695, %v3401_v38  ;;  %v3458_v53 = vmul.f32 1.442695, %v3402_v60  ;;  %10916 = vst [vmem:[#allocation44_spill] sm:$0xff] %v9246_v27  ;;  %v9248_v52 = vpop.eup %5789 }
 0x237   : > { %v3464_v40 = vmul.f32 1.442695, %v3405_v33  ;;  %v10914_v13 = vrot.slane %v8620_v20, %v6182_v3  ;;  %5032 = vperm.xlu0 %5639, %v10915_v18   ;;  %10917 = vst [vmem:[#allocation45_spill] sm:$0xff] %v9248_v52  ;;  %v3460_v29 = vmul.f32 1.442695, %v3403_v42  ;;  %5795 = vpow2.f32 %v3462_v47  ;;  %v9250_v30 = vpop.eup %5791  ;;  %v10919_v60 = vld [vmem:[#allocation53_spill] sm:$0xff] }
 0x238   : > { %v3466_v28 = vmul.f32 1.442695, %v3406_v50  ;;  %v3474_v48 = vmul.f32 1.442695, %v3410_v55  ;;  %10918 = vst [vmem:[#allocation48_spill] sm:$0xff] %v9250_v30  ;;  %v10920_v20 = vrot.slane %v10919_v60, %v6179_v2  ;;  %v10921_v32 = vld [vmem:[#allocation42_spill] sm:$0xff]  ;;  %v9257_v49 = vpop.eup %5793 }
 0x239   : > { %v3761_v37 = vmul.f32 %v9179_v36, %v10914_v13  ;;  %5797 = vpow2.f32 %v3464_v40  ;;  %v3468_v38 = vmul.f32 1.442695, %v3407_v19  ;;  %v3476_v33 = vmul.f32 1.442695, %v3411_v16  ;;  %5036 = vperm.xlu1 %5638, %v10921_v32   ;;  %10922 = vst [vmem:[#allocation49_spill] sm:$0xff] %v9257_v49  ;;  %v10923_v40 = vld [vmem:[#allocation64_spill] sm:$0xff]  ;;  %v9260_v19 = vpop.permute.xlu1 %3938 }
 0x23a   : > { %v3766_v13 = vmul.f32 %v9191_v57, %v10920_v20  ;;  %v3470_v18 = vmul.f32 1.442695, %v3408_v5  ;;  %v3472_v27 = vmul.f32 1.442695, %v3409_v59  ;;  %5799 = vpow2.f32 %v3474_v48 }
 0x23b   : > { %v3486_v42 = vmul.f32 1.442695, %v3416_v12  ;;  %5801 = vpow2.f32 %v3476_v33  ;;  %v3478_v50 = vmul.f32 1.442695, %v3412_v46  ;;  %v3488_v55 = vmul.f32 1.442695, %v3417_v24  ;;  %5044 = vperm.xlu0 %5639, %v10923_v40  }
 0x23c   : > { %v3804_v47 = vadd.f32 %v3763_v4, %v3761_v37  ;;  %v3480_v16 = vmul.f32 1.442695, %v3413_v61  ;;  %v9262_v21 = vmul.f32 1.442695, %v3414_v8  ;;  %v3797_v20 = vadd.f32 %v9185_v17, %v9086_v43  ;;  %v10925_v46 = vld [vmem:[#allocation61_spill] sm:$0xff]  ;;  %v9274_v37 = vpop.permute.xlu0 %3931 }
 0x23d   : > { %5803 = vpow2.f32 %v3486_v42  ;;  %v9266_v32 = vmul.f32 1.442695, %v3415_v44  ;;  %v10924_v59 = vrot.slane %v10919_v60, %v6182_v3  ;;  %5040 = vperm.xlu1 %5638, %v10925_v46   ;;  %v10926_v61 = vrot.slane %v8687_v11, %v6179_v2  ;;  %v10930_v60 = vld [vmem:[#allocation72_spill] sm:$0xff] }
 0x23e   : > { %5805 = vpow2.f32 %v3488_v55  ;;  %v3805_v4 = vadd.f32 %v3804_v47, %v9100_v6  ;;  %v10927_v43 = vrot.slane %v8687_v11, %v6182_v3  ;;  %v3798_v44 = vadd.f32 %v3797_v20, %v3766_v13  ;;  %v10931_v11 = vld [vmem:[#allocation62_spill] sm:$0xff] }
 0x23f   : > { %v3767_v5 = vmul.f32 %v9202_v41, %v10924_v59  ;;  %v3768_v8 = vmul.f32 %v9212_v26, %v10926_v61  ;;  %5807 = vpow2.f32 %v3454_v63  ;;  %v10928_v6 = vrot.slane %v8694_v25, %v6179_v2  ;;  %5052 = vperm.xlu0 %5639, %v10930_v60   ;;  %v9306_v61 = vpop.permute.xlu1 %3952 }
 0x240   : > { %v3769_v17 = vmul.f32 %v9233_v34, %v10927_v43  ;;  %v10929_v48 = vrot.slane %v8694_v25, %v6182_v3  ;;  %5809 = vpow2.f32 %v3456_v31  ;;  %v10932_v55 = vrot.slane %v10931_v11, %v6179_v2  ;;  %v10934_v25 = vld [vmem:[#allocation46_spill] sm:$0xff] }
 0x241   : > { %v3806_v12 = vadd.f32 %v3805_v4, %v3767_v5  ;;  %v3774_v24 = vmul.f32 %v9239_v7, %v10928_v6  ;;  %v3799_v42 = vadd.f32 %v3798_v44, %v3768_v8  ;;  %v10933_v13 = vrot.slane %v10931_v11, %v6182_v3  ;;  %v10935_v31 = vld [vmem:[#allocation14_spill] sm:$0xff]  ;;  %v10936_v4 = vld [vmem:[#allocation71_spill] sm:$0xff]  ;;  %v9317_v6 = vpop.permute.xlu0 %3945 }
 0x242   : > { %v3775_v33 = vmul.f32 %v9248_v52, %v10929_v48  ;;  %v3772_v63 = vmul.f32 %v9250_v30, %v10932_v55  ;;  %5811 = vpow2.f32 %v3458_v53  ;;  %v3965_v59 = vrot.slane %v10934_v25, %v6179_v2  ;;  %5048 = vperm.xlu1 %5638, %v10936_v4  }
 0x243   : > { %v3773_v47 = vmul.f32 %v9257_v49, %v10933_v13  ;;  %v3807_v20 = vadd.f32 %v3806_v12, %v3769_v17  ;;  %5813 = vpow2.f32 %v3460_v29  ;;  %v3957_v5 = vrot.slane %v10935_v31, %v6179_v2  ;;  %v10937_v12 = vld [vmem:[#allocation57_spill] sm:$0xff]  ;;  %v10939_v13 = vld [vmem:[#allocation56_spill] sm:$0xff] }
 0x244   : > { %v3800_v8 = vadd.f32 %v3799_v42, %v9115_v22  ;;  %5815 = vpow2.f32 %v3470_v18  ;;  %v3969_v43 = vrot.slane %v10934_v25, %v6182_v3  ;;  %v3961_v53 = vrot.slane %v10935_v31, %v6182_v3  ;;  %5060 = vperm.xlu0 %5639, %v10937_v12   ;;  %v9321_v42 = vpop.eup %5795  ;;  %v10953_v12 = vld [vmem:[#allocation24_spill] sm:$0xff] }
 0x245   : > { %v3808_v29 = vadd.f32 %v3807_v20, %v9134_v51  ;;  %5817 = vpow2.f32 %v3472_v27  ;;  %v4100_v17 = vmul.f32 %v9126_v10, %v3965_v59  ;;  %v4098_v44 = vmul.f32 %v9049_v45, %v3957_v5  ;;  %v10938_v51 = vld [vmem:[#allocation23_spill] sm:$0xff] }
 0x246   : > { %v3801_v48 = vadd.f32 %v3800_v8, %v3772_v63  ;;  %5819 = vpow2.f32 %v3466_v28  ;;  %v4101_v18 = vmul.f32 %v9151_v35, %v3969_v43  ;;  %v4099_v22 = vmul.f32 %v9179_v36, %v3961_v53  ;;  %5056 = vperm.xlu1 %5638, %v10939_v13   ;;  %v9328_v20 = vpop.eup %5797  ;;  %v10940_v28 = vld [vmem:[#allocation59_spill] sm:$0xff]  ;;  %v9339_v43 = vpop.permute.xlu1 %4178 }
 0x247   : > { %v3809_v11 = vadd.f32 %v3808_v29, %v3773_v47  ;;  %5821 = vpow2.f32 %v3468_v38  ;;  %v3759_v27 = vrot.slane %v8867_v39, %v6182_v3  ;;  %v3981_v55 = vrot.slane %v10938_v51, %v6179_v2  ;;  %v9334_v47 = vpop.eup %5799  ;;  %v10941_v8 = vld [vmem:[#allocation47_spill] sm:$0xff] }
 0x248   : > { %v3802_v63 = vadd.f32 %v3801_v48, %v3774_v24  ;;  %5823 = vpow2.f32 %v3478_v50  ;;  %v3985_v59 = vrot.slane %v10938_v51, %v6182_v3  ;;  %v4134_v5 = vadd.f32 %v4100_v17, %v4098_v44  ;;  %5068 = vperm.xlu0 %5639, %v10941_v8   ;;  %v9341_v24 = vpop.eup %5801  ;;  %v9360_v51 = vpop.permute.xlu0 %4171 }
 0x249   : > { %v3810_v38 = vadd.f32 %v3809_v11, %v3775_v33  ;;  %5825 = vpow2.f32 %v3480_v16  ;;  %v10942_v53 = vrot.slane %v8759_v9, %v6179_v2  ;;  %v4142_v16 = vadd.f32 %v4101_v18, %v4099_v22  ;;  %v10945_v11 = vld [vmem:[#allocation65_spill] sm:$0xff] }
 0x24a   : > { %v3803_v50 = vadd.f32 %v3802_v63, %v9145_v23  ;;  %5827 = vpow2.f32 %v9262_v21  ;;  %v9349_v33 = vpop.eup %5803  ;;  %v10944_v17 = vrot.slane %v8759_v9, %v6182_v3  ;;  %v4104_v48 = vmul.f32 %v9191_v57, %v3981_v55  ;;  %5064 = vperm.xlu1 %5638, %v10945_v11   ;;  %v9412_v11 = vpop.permute.xlu1 %4192  ;;  %v10958_v57 = vld [vmem:[#allocation27_spill] sm:$0xff] }
 0x24b   : > { %v3782_v29 = vmul.f32 %v9321_v42, %v10942_v53  ;;  %10943 = vst [vmem:[#allocation9_spill] sm:$0xff] %v9349_v33  ;;  %5829 = vpow2.f32 %v9266_v32  ;;  %v3973_v23 = vrot.slane %v8979_v0, %v6179_v2  ;;  %v9362_v21 = vpop.eup %5805  ;;  %v3811_v18 = vadd.f32 %v3810_v38, %v9163_v62  ;;  %10954 = vst [vmem:[#allocation19_spill] sm:$0xff] %v9412_v11  ;;  %v10961_v11 = vld [vmem:[#allocation16_spill] sm:$0xff] }
 0x24c   : > { %v3783_v44 = vmul.f32 %v9328_v20, %v10944_v17  ;;  %10946 = vst [vmem:[#allocation18_spill] sm:$0xff] %v9362_v21  ;;  %v10947_v9 = vrot.slane %v8839_v14, %v6179_v2  ;;  %v4105_v32 = vmul.f32 %v9202_v41, %v3985_v59  ;;  %v3977_v55 = vrot.slane %v8979_v0, %v6182_v3  ;;  %v9374_v63 = vpop.eup %5807 }
 0x24d   : > { %5831 = vlog2.f32 %v3803_v50  ;;  %v10948_v53 = vrot.slane %v8839_v14, %v6182_v3  ;;  %v4102_v62 = vmul.f32 %v9060_v58, %v3973_v23  ;;  %v3997_v38 = vrot.slane %v8987_v56, %v6179_v2  ;;  %5076 = vperm.xlu0 %5639, %v9003_v54   ;;  %v9386_v59 = vpop.eup %5809  ;;  %v9432_v58 = vpop.permute.xlu0 %4185 }
 0x24e   : > { %v9369_v22 = vmul.f32 %v9334_v47, %v10947_v9  ;;  %v10949_v9 = vld [vmem:[#allocation63_spill] sm:$0xff]  ;;  %v4103_v31 = vmul.f32 %v9066_v1, %v3977_v55  ;;  %v4001_v14 = vrot.slane %v8987_v56, %v6182_v3  ;;  %v3989_v23 = vrot.slane %v8997_v15, %v6179_v2  ;;  %5072 = vperm.xlu1 %5638, %v10953_v12  }
 0x24f   : > { %v9380_v17 = vmul.f32 %v9341_v24, %v10948_v53  ;;  %v10950_v0 = vrot.slane %v10949_v9, %v6179_v2  ;;  %v9397_v53 = vpop.eup %5811  ;;  %v10951_v25 = vrot.slane %v10949_v9, %v6182_v3  ;;  %v10952_v8 = vrot.slane %v8867_v39, %v6179_v2  ;;  %v10955_v9 = vld [vmem:[#allocation58_spill] sm:$0xff] }
 0x250   : > { %v4135_v55 = vadd.f32 %v4134_v5, %v4102_v62  ;;  %v3993_v56 = vrot.slane %v8997_v15, %v6182_v3  ;;  %v9414_v60 = vpop.eup %5813  ;;  %5833 = vlog2.f32 %v3811_v18  ;;  %v4143_v39 = vadd.f32 %v4142_v16, %v4103_v31 }
 0x251   : > { %v3778_v50 = vmul.f32 %v9374_v63, %v10950_v0  ;;  %v3779_v54 = vmul.f32 %v9386_v59, %v10951_v25  ;;  %v9407_v0 = vmul.f32 %v9349_v33, %v10952_v8  ;;  %v10956_v25 = vrot.slane %v10955_v9, %v6179_v2  ;;  %v9421_v1 = vpop.eup %5815  ;;  %5084 = vperm.xlu0 %5639, %v10958_v57   ;;  %v9480_v36 = vpop.permute.xlu0 %4199 }
 0x252   : > { %v4106_v8 = vmul.f32 %v9212_v26, %v3989_v23  ;;  %v10957_v15 = vrot.slane %v10955_v9, %v6182_v3  ;;  %v9428_v62 = vmul.f32 %v9362_v21, %v3759_v27  ;;  %v4107_v18 = vmul.f32 %v9233_v34, %v3993_v56  ;;  %v9434_v31 = vpop.eup %5817  ;;  %v10959_v23 = vld [vmem:[#allocation22_spill] sm:$0xff]  ;;  %10973 = vst [vmem:[#allocation37_spill] sm:$0xff] %v9480_v36  ;;  %v10984_v36 = vld [vmem:[#allocation15_spill] sm:$0xff] }
 0x253   : > { %v3780_v41 = vmul.f32 %v9397_v53, %v10956_v25  ;;  %v4136_v12 = vadd.f32 %v4135_v55, %v4104_v48  ;;  %v4108_v25 = vmul.f32 %v10959_v23, %v3997_v38  ;;  %v10960_v26 = vld [vmem:[#allocation38_spill] sm:$0xff]  ;;  %v4144_v9 = vadd.f32 %v4143_v39, %v4105_v32  ;;  %v9438_v40 = vpop.eup %5819  ;;  %v10962_v55 = vld [vmem:[#allocation33_spill] sm:$0xff] }
 0x254   : > { %v3781_v5 = vmul.f32 %v9414_v60, %v10957_v15  ;;  %v4109_v13 = vmul.f32 %v10960_v26, %v4001_v14  ;;  %v4013_v56 = vrot.slane %v10961_v11, %v6179_v2  ;;  %v4017_v48 = vrot.slane %v10961_v11, %v6182_v3  ;;  %5080 = vperm.xlu1 %5638, %v10962_v55   ;;  %v9445_v57 = vpop.eup %5821  ;;  %v10967_v23 = vld [vmem:[#allocation10_spill] sm:$0xff] }
 0x255   : > { %v3812_v16 = vadd.f32 %v3780_v41, %v3778_v50  ;;  %v4137_v27 = vadd.f32 %v4136_v12, %v4106_v8  ;;  %v10963_v41 = vld [vmem:[#allocation66_spill] sm:$0xff]  ;;  %v4145_v14 = vadd.f32 %v4144_v9, %v4107_v18  ;;  %v9453_v39 = vpop.eup %5823  ;;  %5092 = vperm.xlu0 %5639, %v10967_v23   ;;  %v10969_v18 = vld [vmem:[#allocation43_spill] sm:$0xff] }
 0x256   : > { %v3820_v15 = vadd.f32 %v3781_v5, %v3779_v54  ;;  %v10964_v38 = vrot.slane %v10963_v41, %v6179_v2  ;;  %v10965_v54 = vld [vmem:[#allocation32_spill] sm:$0xff]  ;;  %v10966_v8 = vrot.slane %v10963_v41, %v6182_v3 }
 0x257   : > { %v3813_v32 = vadd.f32 %v3812_v16, %v3782_v29  ;;  %v4005_v12 = vrot.slane %v10965_v54, %v6179_v2  ;;  %v4009_v55 = vrot.slane %v10965_v54, %v6182_v3  ;;  %v4138_v26 = vadd.f32 %v4137_v27, %v4108_v25  ;;  %v9464_v29 = vpop.eup %5825 }
 0x258   : > { %v3784_v50 = vmul.f32 %v9438_v40, %v10964_v38  ;;  %v3785_v11 = vmul.f32 %v9445_v57, %v10966_v8  ;;  %v3821_v5 = vadd.f32 %v3820_v15, %v3783_v44  ;;  %v9462_v38 = vpop.permute.xlu1 %4206  ;;  %v10970_v16 = vrot.slane %v10969_v18, %v6179_v2  ;;  %v9471_v44 = vpop.eup %5827 }
 0x259   : > { %10968 = vst [vmem:[#allocation39_spill] sm:$0xff] %v9462_v38  ;;  %v4110_v41 = vmul.f32 %v9250_v30, %v4005_v12  ;;  %v4146_v8 = vadd.f32 %v4145_v14, %v4109_v13  ;;  %v10971_v25 = vrot.slane %v10969_v18, %v6182_v3  ;;  %v4112_v54 = vmul.f32 %v9239_v7, %v4013_v56  ;;  %v10972_v38 = vld [vmem:[#allocation28_spill] sm:$0xff]  ;;  %v10983_v30 = vld [vmem:[#allocation21_spill] sm:$0xff] }
 0x25a   : > { %v3786_v9 = vmul.f32 %v9421_v1, %v10970_v16  ;;  %v3814_v34 = vadd.f32 %v3813_v32, %v3784_v50  ;;  %v3822_v27 = vadd.f32 %v3821_v5, %v3785_v11  ;;  %v4111_v23 = vmul.f32 %v9257_v49, %v4009_v55  ;;  %5088 = vperm.xlu1 %5638, %v10972_v38   ;;  %v9482_v50 = vpop.eup %5829  ;;  %v10974_v32 = vld [vmem:[#allocation68_spill] sm:$0xff] }
 0x25b   : > { %v3787_v15 = vmul.f32 %v9434_v31, %v10971_v25  ;;  %v10975_v13 = vrot.slane %v10974_v32, %v6179_v2  ;;  %v4113_v18 = vmul.f32 %v9248_v52, %v4017_v48  ;;  %v4139_v16 = vadd.f32 %v4138_v26, %v4110_v41  ;;  %v10977_v25 = vld [vmem:[#allocation36_spill] sm:$0xff]  ;;  %v5832_v7 = vpop.eup %5831  ;;  %v10979_v48 = vld [vmem:[#allocation35_spill] sm:$0xff] }
 0x25c   : > { %v3815_v12 = vadd.f32 %v3814_v34, %v3786_v9  ;;  %v10976_v56 = vrot.slane %v10974_v32, %v6182_v3  ;;  %v4147_v5 = vadd.f32 %v4146_v8, %v4111_v23  ;;  %v4029_v38 = vrot.slane %v10977_v25, %v6179_v2  ;;  %v9512_v32 = vpop.permute.xlu1 %4220 }
 0x25d   : > { %v3790_v14 = vmul.f32 %v9453_v39, %v10975_v13  ;;  %v3823_v11 = vadd.f32 %v3822_v27, %v3787_v15  ;;  %v10978_v13 = vrot.slane %v10940_v28, %v6179_v2  ;;  %v4033_v26 = vrot.slane %v10977_v25, %v6182_v3  ;;  %v10981_v27 = vld [vmem:[#allocation8_spill] sm:$0xff]  ;;  %v10982_v25 = vld [vmem:[#allocation34_spill] sm:$0xff] }
 0x25e   : > { %v3791_v55 = vmul.f32 %v9464_v29, %v10976_v56  ;;  %v3816_v49 = vadd.f32 %v3815_v12, %v9369_v22  ;;  %v4021_v9 = vrot.slane %v10979_v48, %v6179_v2  ;;  %v10980_v23 = vrot.slane %v10940_v28, %v6182_v3  ;;  %5096 = vperm.xlu1 %5638, %v10981_v27  }
 0x25f   : > { %v3792_v34 = vmul.f32 %v9471_v44, %v10978_v13  ;;  %v3824_v41 = vadd.f32 %v3823_v11, %v9380_v17  ;;  %v4025_v22 = vrot.slane %v10979_v48, %v6182_v3  ;;  %v4140_v15 = vadd.f32 %v4139_v16, %v4112_v54  ;;  %v5834_v17 = vpop.eup %5833  ;;  %v9521_v54 = vpop.permute.xlu0 %4213 }
 0x260   : > { %v3793_v8 = vmul.f32 %v9482_v50, %v10980_v23  ;;  %v3817_v12 = vadd.f32 %v3816_v49, %v3790_v14  ;;  %v4116_v56 = vmul.f32 %v9374_v63, %v4029_v38  ;;  %v4114_v13 = vmul.f32 %v10982_v25, %v4021_v9  ;;  %v10985_v38 = vld [vmem:[#allocation29_spill] sm:$0xff] }
 0x261   : > { %v4148_v52 = vadd.f32 %v4147_v5, %v4113_v18  ;;  %v9516_v11 = vmul.f32 0.6931472, %v5832_v7  ;;  %v3825_v28 = vadd.f32 %v3824_v41, %v3791_v55  ;;  %v4115_v23 = vmul.f32 %v10983_v30, %v4025_v22 }
 0x262   : > { %v4045_v48 = vrot.slane %v10984_v36, %v6179_v2  ;;  %v3818_v16 = vadd.f32 %v3817_v12, %v3792_v34  ;;  %v4141_v27 = vadd.f32 %v4140_v15, %v4114_v13  ;;  %v4049_v49 = vrot.slane %v10984_v36, %v6182_v3  ;;  %v9536_v15 = vpop.permute.xlu1 %4234 }
 0x263   : > { %v4037_v14 = vrot.slane %v10985_v38, %v6179_v2  ;;  %v3826_v18 = vadd.f32 %v3825_v28, %v3793_v8  ;;  %v4117_v7 = vmul.f32 %v9386_v59, %v4033_v26  ;;  %v4149_v5 = vadd.f32 %v4148_v52, %v4115_v23  ;;  %v10986_v26 = vld [vmem:[#allocation12_spill] sm:$0xff]  ;;  %v9546_v23 = vpop.permute.xlu0 %4227 }
 0x264   : > { %v4041_v55 = vrot.slane %v10985_v38, %v6182_v3  ;;  %v3819_v9 = vadd.f32 %v3818_v16, %v9407_v0  ;;  %5835 = vlog2.f32 %v4141_v27  ;;  %v4120_v41 = vmul.f32 %v9321_v42, %v4045_v48  ;;  %v10987_v0 = vld [vmem:[#allocation44_spill] sm:$0xff] }
 0x265   : > { %v4118_v34 = vmul.f32 %v9397_v53, %v4037_v14  ;;  %v3827_v22 = vadd.f32 %v3826_v18, %v9428_v62  ;;  %5837 = vlog2.f32 %v4149_v5  ;;  %v4121_v36 = vmul.f32 %v9328_v20, %v4049_v49 }
 0x266   : > { %v4119_v8 = vmul.f32 %v9414_v60, %v4041_v55  ;;  %5839 = vlog2.f32 %v3819_v9  ;;  %v4061_v12 = vrot.slane %v10986_v26, %v6179_v2  ;;  %v4053_v27 = vrot.slane %v10987_v0, %v6179_v2  ;;  %v10988_v9 = vld [vmem:[#allocation70_spill] sm:$0xff] }
 0x267   : > { %v4150_v52 = vadd.f32 %v4118_v34, %v4116_v56  ;;  %5841 = vlog2.f32 %v3827_v22  ;;  %v4065_v62 = vrot.slane %v10986_v26, %v6182_v3  ;;  %v4057_v28 = vrot.slane %v10987_v0, %v6182_v3 }
 0x268   : > { %v4158_v13 = vadd.f32 %v4119_v8, %v4117_v7  ;;  %v4507_v48 = vmul.f32 0.6931472, %v5834_v17  ;;  %v4122_v16 = vmul.f32 %v9438_v40, %v4053_v27  ;;  %v6020_v14 = vmov 2   ;;  %v10989_v27 = vld [vmem:[#allocation69_spill] sm:$0xff] }
 0x269   : > { %v4151_v56 = vadd.f32 %v4150_v52, %v4120_v41  ;;  %v4123_v49 = vmul.f32 %v9445_v57, %v4057_v28  ;;  %5640 = vset.pattern.permute.xlu0 %v6020_v14  ;;  %v4077_v18 = vrot.slane %v9260_v19, %v6179_v2  ;;  %v4081_v7 = vrot.slane %v9260_v19, %v6182_v3  ;;  %v9564_v19 = vpop.permute.xlu1 %4248 }
 0x26a   : > { %v4159_v38 = vadd.f32 %v4158_v13, %v4121_v36  ;;  %v4124_v5 = vmul.f32 %v9421_v1, %v4061_v12  ;;  %5138 = vperm.xlu0 %5640, %v10988_v9   ;;  %v4069_v17 = vrot.slane %v9274_v37, %v6179_v2  ;;  %v4073_v41 = vrot.slane %v9274_v37, %v6182_v3  ;;  %v11016_v9 = vld [vmem:[#allocation49_spill] sm:$0xff] }
 0x26b   : > { %v4152_v55 = vadd.f32 %v4151_v56, %v4122_v16  ;;  %v4125_v34 = vmul.f32 %v9434_v31, %v4065_v62  ;;  %v4128_v36 = vmul.f32 %v9453_v39, %v4077_v18  ;;  %v4093_v8 = vrot.slane %v9306_v61, %v6179_v2  ;;  %5641 = vset.pattern.permute.xlu1 %v6020_v14  ;;  %v9576_v16 = vpop.permute.xlu0 %4241 }
 0x26c   : > { %v4160_v22 = vadd.f32 %v4159_v38, %v4123_v49  ;;  %v4129_v52 = vmul.f32 %v9464_v29, %v4081_v7  ;;  %v4126_v26 = vmul.f32 %v9334_v47, %v4069_v17  ;;  %v4127_v12 = vmul.f32 %v9341_v24, %v4073_v41  ;;  %5142 = vperm.xlu1 %5641, %v10989_v27   ;;  %v10991_v41 = vld [vmem:[#allocation42_spill] sm:$0xff] }
 0x26d   : > { %v4153_v0 = vadd.f32 %v4152_v55, %v4124_v5  ;;  %v4097_v13 = vrot.slane %v9306_v61, %v6182_v3  ;;  %v4085_v62 = vrot.slane %v9317_v6, %v6179_v2  ;;  %v4089_v28 = vrot.slane %v9317_v6, %v6182_v3  ;;  %v10990_v5 = vld [vmem:[#allocation60_spill] sm:$0xff] }
 0x26e   : > { %v4161_v37 = vadd.f32 %v4160_v22, %v4125_v34  ;;  %5150 = vperm.xlu0 %5640, %v10925_v46   ;;  %v4303_v49 = vrot.slane %v9339_v43, %v6179_v2  ;;  %v4307_v38 = vrot.slane %v9339_v43, %v6182_v3  ;;  %v4295_v61 = vrot.slane %v9360_v51, %v6179_v2  ;;  %v10992_v43 = vld [vmem:[#allocation17_spill] sm:$0xff] }
 0x26f   : > { %v4154_v56 = vadd.f32 %v4153_v0, %v4126_v26  ;;  %v4130_v18 = vmul.f32 %v9471_v44, %v4085_v62  ;;  %v4131_v7 = vmul.f32 %v9482_v50, %v4089_v28  ;;  %v4299_v6 = vrot.slane %v9360_v51, %v6182_v3 }
 0x270   : > { %v4162_v14 = vadd.f32 %v4161_v37, %v4127_v12  ;;  %v9591_v55 = vadd.f32 %v9516_v11, %v10990_v5  ;;  %5146 = vperm.xlu1 %5641, %v10991_v41   ;;  %v9595_v22 = vadd.f32 %v4507_v48, %v10992_v43  ;;  %v4438_v12 = vmul.f32 %v9126_v10, %v4303_v49  ;;  %v9599_v37 = vpop.permute.xlu1 %4262  ;;  %v10993_v10 = vld [vmem:[#allocation13_spill] sm:$0xff] }
 0x271   : > { %v4155_v17 = vadd.f32 %v4154_v56, %v4128_v36  ;;  %v5836_v34 = vpop.eup %5835  ;;  %v4436_v0 = vmul.f32 %v9049_v45, %v4295_v61  ;;  %v4132_v51 = vmul.f32 %v9349_v33, %v4093_v8  ;;  %v4133_v11 = vmul.f32 %v9362_v21, %v4097_v13  ;;  %v10994_v45 = vld [vmem:[#allocation19_spill] sm:$0xff]  ;;  %v10997_v21 = vld [vmem:[#allocation56_spill] sm:$0xff] }
 0x272   : > { %v4163_v26 = vadd.f32 %v4162_v14, %v4129_v52  ;;  %v5838_v62 = vpop.eup %5837  ;;  %5158 = vperm.xlu0 %5640, %v10936_v4   ;;  %v4311_v36 = vrot.slane %v9432_v58, %v6179_v2  ;;  %v4439_v52 = vmul.f32 %v9151_v35, %v4307_v38  ;;  %v4437_v49 = vmul.f32 %v10993_v10, %v4299_v6  ;;  %v9610_v14 = vpop.permute.xlu0 %4255  ;;  %v10995_v4 = vld [vmem:[#allocation64_spill] sm:$0xff]  ;;  %v10996_v38 = vld [vmem:[#allocation25_spill] sm:$0xff] }
 0x273   : > { %v4156_v28 = vadd.f32 %v4155_v17, %v4130_v18  ;;  %v5840_v48 = vpop.eup %5839  ;;  %v4319_v61 = vrot.slane %v10994_v45, %v6179_v2  ;;  %v4509_v13 = vmul.f32 0.6931472, %v5836_v34  ;;  %v4323_v17 = vrot.slane %v10994_v45, %v6182_v3  ;;  %v10998_v34 = vld [vmem:[#allocation67_spill] sm:$0xff]  ;;  %v11015_v33 = vld [vmem:[#allocation48_spill] sm:$0xff] }
 0x274   : > { %v4164_v56 = vadd.f32 %v4163_v26, %v4131_v7  ;;  %v5842_v8 = vpop.eup %5841  ;;  %v4517_v46 = vmul.f32 0.6931472, %v5840_v48  ;;  %5154 = vperm.xlu1 %5641, %v10995_v4   ;;  %v4472_v26 = vadd.f32 %v4438_v12, %v4436_v0  ;;  %v4315_v35 = vrot.slane %v9432_v58, %v6182_v3  ;;  %v11000_v4 = vld [vmem:[#allocation30_spill] sm:$0xff]  ;;  %v9627_v0 = vpop.permute.xlu1 %4276  ;;  %v11002_v58 = vld [vmem:[#allocation31_spill] sm:$0xff] }
 0x275   : > { %v4157_v18 = vadd.f32 %v4156_v28, %v4132_v51  ;;  %v4519_v41 = vmul.f32 0.6931472, %v5842_v8  ;;  %v4511_v10 = vmul.f32 0.6931472, %v5838_v62  ;;  %v4440_v51 = vmul.f32 %v10998_v34, %v4311_v36  ;;  %v10999_v28 = vld [vmem:[#allocation26_spill] sm:$0xff]  ;;  %v11003_v62 = vld [vmem:[#allocation39_spill] sm:$0xff] }
 0x276   : > { %v4165_v7 = vadd.f32 %v4164_v56, %v4133_v11  ;;  %v9618_v6 = vadd.f32 %v4517_v46, %v10996_v38  ;;  %5166 = vperm.xlu0 %5640, %v10997_v21   ;;  %v4480_v45 = vadd.f32 %v4439_v52, %v4437_v49  ;;  %v4442_v8 = vmul.f32 %v11000_v4, %v4319_v61  ;;  %v11001_v11 = vld [vmem:[#allocation20_spill] sm:$0xff]  ;;  %v9643_v49 = vpop.permute.xlu0 %4269  ;;  %v11007_v61 = vld [vmem:[#allocation65_spill] sm:$0xff] }
 0x277   : > { %5843 = vlog2.f32 %v4157_v18  ;;  %v9623_v48 = vadd.f32 %v4519_v41, %v10999_v28  ;;  %v4441_v12 = vmul.f32 %v11001_v11, %v4315_v35  ;;  %v4443_v46 = vmul.f32 %v11002_v58, %v4323_v17  ;;  %v11004_v21 = vld [vmem:[#allocation72_spill] sm:$0xff]  ;;  %v11008_v17 = vld [vmem:[#allocation37_spill] sm:$0xff] }
 0x278   : > { %5845 = vlog2.f32 %v4165_v7  ;;  %v4473_v56 = vadd.f32 %v4472_v26, %v4440_v51  ;;  %v4335_v18 = vrot.slane %v11003_v62, %v6179_v2  ;;  %5162 = vperm.xlu1 %5641, %v11004_v21   ;;  %v9635_v41 = vadd.f32 %v9618_v6, %v9591_v55 }
 0x279   : > { %v9639_v4 = vadd.f32 %v9623_v48, %v9595_v22  ;;  %v4481_v36 = vadd.f32 %v4480_v45, %v4441_v12  ;;  %v4339_v52 = vrot.slane %v11003_v62, %v6182_v3  ;;  %v4327_v7 = vrot.slane %v11008_v17, %v6179_v2  ;;  %v11009_v12 = vld [vmem:[#allocation11_spill] sm:$0xff]  ;;  %v11010_v62 = vld [vmem:[#allocation40_spill] sm:$0xff] }
 0x27a   : > { %11005 = vst [vmem:[#allocation51_spill] sm:$0xff] %v9635_v41  ;;  %5174 = vperm.xlu0 %5640, %v11007_v61   ;;  %v4331_v26 = vrot.slane %v11008_v17, %v6182_v3  ;;  %v4474_v35 = vadd.f32 %v4473_v56, %v4442_v8  ;;  %v9651_v34 = vadd.f32 %v4509_v13, %v10990_v5  ;;  %v11011_v56 = vld [vmem:[#allocation57_spill] sm:$0xff]  ;;  %v11013_v5 = vld [vmem:[#allocation38_spill] sm:$0xff] }
 0x27b   : > { %11006 = vst [vmem:[#allocation52_spill] sm:$0xff] %v9639_v4  ;;  %v4482_v51 = vadd.f32 %v4481_v36, %v4443_v46  ;;  %v4351_v45 = vrot.slane %v9512_v32, %v6179_v2  ;;  %v4343_v11 = vrot.slane %v9521_v54, %v6179_v2  ;;  %v4444_v58 = vmul.f32 %v11009_v12, %v4327_v7  ;;  %v11012_v36 = vld [vmem:[#allocation22_spill] sm:$0xff]  ;;  %v9671_v12 = vpop.permute.xlu1 %4290 }
 0x27c   : > { %v4445_v61 = vmul.f32 %v11010_v62, %v4331_v26  ;;  %v4355_v21 = vrot.slane %v9512_v32, %v6182_v3  ;;  %v4347_v8 = vrot.slane %v9521_v54, %v6182_v3  ;;  %5170 = vperm.xlu1 %5641, %v11011_v56   ;;  %v4569_v13 = vmax.f32 %v9639_v4, %v9635_v41  ;;  %v11014_v32 = vld [vmem:[#allocation24_spill] sm:$0xff] }
 0x27d   : > { %v9667_v46 = vadd.f32 %v4511_v10, %v10992_v43  ;;  %v4446_v17 = vmul.f32 %v11012_v36, %v4335_v18  ;;  %v4447_v7 = vmul.f32 %v11013_v5, %v4339_v52  ;;  %v4475_v26 = vadd.f32 %v4474_v35, %v4444_v58  ;;  %v9684_v52 = vpop.permute.xlu0 %4283  ;;  %v11019_v58 = vld [vmem:[#allocation47_spill] sm:$0xff] }
 0x27e   : > { %v4483_v62 = vadd.f32 %v4482_v51, %v4445_v61  ;;  %5182 = vperm.xlu0 %5640, %v11014_v32   ;;  %v4448_v54 = vmul.f32 %v11015_v33, %v4343_v11  ;;  %v4449_v56 = vmul.f32 %v11016_v9, %v4347_v8  ;;  %v4367_v41 = vrot.slane %v9536_v15, %v6179_v2  ;;  %v11017_v61 = vld [vmem:[#allocation41_spill] sm:$0xff] }
 0x27f   : > { %v4371_v10 = vrot.slane %v9536_v15, %v6182_v3  ;;  %v4359_v18 = vrot.slane %v9546_v23, %v6179_v2  ;;  %v4363_v5 = vrot.slane %v9546_v23, %v6182_v3  ;;  %v4450_v35 = vmul.f32 %v11017_v61, %v4351_v45  ;;  %v11018_v51 = vld [vmem:[#allocation45_spill] sm:$0xff]  ;;  %v9696_v4 = vpop.permute.xlu1 %4922 }
 0x280   : > { %v4451_v33 = vmul.f32 %v11018_v51, %v4355_v21  ;;  %v4476_v11 = vadd.f32 %v4475_v26, %v4446_v17  ;;  %v4484_v9 = vadd.f32 %v4483_v62, %v4447_v7  ;;  %5178 = vperm.xlu1 %5641, %v11019_v58   ;;  %v4383_v15 = vrot.slane %v9564_v19, %v6179_v2  ;;  %v11021_v21 = vld [vmem:[#allocation33_spill] sm:$0xff] }
 0x281   : > { %v4452_v8 = vmul.f32 %v10982_v25, %v4359_v18  ;;  %v4387_v36 = vrot.slane %v9564_v19, %v6182_v3  ;;  %v4375_v23 = vrot.slane %v9576_v16, %v6179_v2  ;;  %11020 = vst [vmem:[#allocation54_spill] sm:$0xff] %v9696_v4  ;;  %v4453_v17 = vmul.f32 %v10983_v30, %v4363_v5  ;;  %v11022_v5 = vld [vmem:[#allocation50_spill] sm:$0xff] }
 0x282   : > { %v4477_v45 = vadd.f32 %v4476_v11, %v4448_v54  ;;  %v4485_v61 = vadd.f32 %v4484_v9, %v4449_v56  ;;  %5190 = vperm.xlu0 %5640, %v11021_v21   ;;  %v4379_v25 = vrot.slane %v9576_v16, %v6182_v3  ;;  %v9704_v26 = vadd.f32 %v9618_v6, %v9651_v34  ;;  %v9709_v54 = vpop.permute.xlu0 %4918 }
 0x283   : > { %v4454_v19 = vmul.f32 %v9374_v63, %v4367_v41  ;;  %v4455_v62 = vmul.f32 %v9386_v59, %v4371_v10  ;;  %v4456_v18 = vmul.f32 %v9397_v53, %v4375_v23  ;;  %v4458_v4 = vmul.f32 %v9321_v42, %v4383_v15  ;;  %v11023_v53 = vld [vmem:[#allocation28_spill] sm:$0xff] }
 0x284   : > { %v5844_v7 = vpop.eup %5843  ;;  %v4478_v51 = vadd.f32 %v4477_v45, %v4450_v35  ;;  %v4486_v11 = vadd.f32 %v4485_v61, %v4451_v33  ;;  %v4457_v30 = vmul.f32 %v9414_v60, %v4379_v25  ;;  %5186 = vperm.xlu1 %5641, %v11022_v5   ;;  %v4570_v9 = vmax.f32 %v9704_v26, %v4569_v13  ;;  %v9727_v33 = vpop.permute.xlu1 %4926  ;;  %v11024_v45 = vld [vmem:[#allocation27_spill] sm:$0xff] }
 0x285   : > { %v4521_v56 = vmul.f32 0.6931472, %v5844_v7  ;;  %v5846_v16 = vpop.eup %5845  ;;  %v4459_v63 = vmul.f32 %v9328_v20, %v4387_v36  ;;  %v4488_v41 = vadd.f32 %v4456_v18, %v4454_v19  ;;  %v4399_v35 = vrot.slane %v9599_v37, %v6179_v2  ;;  %v11025_v7 = vld [vmem:[#allocation8_spill] sm:$0xff] }
 0x286   : > { %v4479_v59 = vadd.f32 %v4478_v51, %v4452_v8  ;;  %v4487_v10 = vadd.f32 %v4486_v11, %v4453_v17  ;;  %5198 = vperm.xlu0 %5640, %v11023_v53   ;;  %v4496_v23 = vadd.f32 %v4457_v30, %v4455_v62  ;;  %v9721_v60 = vadd.f32 %v9623_v48, %v9667_v46  ;;  %v9736_v25 = vpop.permute.xlu0 %4930  ;;  %v11026_v11 = vld [vmem:[#allocation10_spill] sm:$0xff] }
 0x287   : > { %v4391_v13 = vrot.slane %v9610_v14, %v6179_v2  ;;  %v4395_v42 = vrot.slane %v9610_v14, %v6182_v3  ;;  %v4489_v20 = vadd.f32 %v4488_v41, %v4458_v4  ;;  %v9730_v8 = vadd.f32 %v4521_v56, %v10996_v38 }
 0x288   : > { %5847 = vlog2.f32 %v4479_v59  ;;  %v4403_v15 = vrot.slane %v9599_v37, %v6182_v3  ;;  %v4497_v36 = vadd.f32 %v4496_v23, %v4459_v63  ;;  %5194 = vperm.xlu1 %5641, %v11024_v45   ;;  %v4523_v61 = vmul.f32 0.6931472, %v5846_v16  ;;  %v9761_v63 = vpop.permute.xlu1 %4934 }
 0x289   : > { %5849 = vlog2.f32 %v4487_v10  ;;  %v4460_v17 = vmul.f32 %v9438_v40, %v4391_v13  ;;  %v4567_v14 = vmax.f32 %v9721_v60, %v4570_v9  ;;  %v4462_v4 = vmul.f32 %v9421_v1, %v4399_v35 }
 0x28a   : > { %5206 = vperm.xlu0 %5640, %v11025_v7   ;;  %v4461_v19 = vmul.f32 %v9445_v57, %v4395_v42  ;;  %v4415_v37 = vrot.slane %v9627_v0, %v6179_v2  ;;  %v4407_v18 = vrot.slane %v9643_v49, %v6179_v2  ;;  %v4411_v40 = vrot.slane %v9643_v49, %v6182_v3  ;;  %v9773_v35 = vpop.permute.xlu0 %4938 }
 0x28b   : > { %v4490_v62 = vadd.f32 %v4489_v20, %v4460_v17  ;;  %v9750_v56 = vadd.f32 %v9730_v8, %v9591_v55  ;;  %v4463_v1 = vmul.f32 %v9434_v31, %v4403_v15  ;;  %v4419_v57 = vrot.slane %v9627_v0, %v6182_v3  ;;  %v11028_v17 = vld [vmem:[#allocation9_spill] sm:$0xff] }
 0x28c   : > { %v4498_v51 = vadd.f32 %v4497_v36, %v4461_v19  ;;  %5202 = vperm.xlu1 %5641, %v11026_v11   ;;  %v9757_v30 = vadd.f32 %v4523_v61, %v10999_v28  ;;  %v4464_v16 = vmul.f32 %v9334_v47, %v4407_v18  ;;  %v4465_v9 = vmul.f32 %v9341_v24, %v4411_v40  ;;  %v11031_v40 = vld [vmem:[#allocation42_spill] sm:$0xff] }
 0x28d   : > { %v4491_v49 = vadd.f32 %v4490_v62, %v4462_v4  ;;  %v4568_v41 = vmax.f32 %v9750_v56, %v4567_v14  ;;  %v6021_v59 = vmov 3   ;;  %v4423_v0 = vrot.slane %v9684_v52, %v6179_v2 }
 0x28e   : > { %5643 = vset.pattern.permute.xlu0 %v6021_v59  ;;  %v4499_v31 = vadd.f32 %v4498_v51, %v4463_v1  ;;  %v4466_v10 = vmul.f32 %v9453_v39, %v4415_v37  ;;  %v4431_v47 = vrot.slane %v9671_v12, %v6179_v2  ;;  %v4427_v24 = vrot.slane %v9684_v52, %v6182_v3  ;;  %v11027_v52 = vld [vmem:[#allocation70_spill] sm:$0xff]  ;;  %v9797_v1 = vpop.permute.xlu0 %4946 }
 0x28f   : > { %v4492_v23 = vadd.f32 %v4491_v49, %v4464_v16  ;;  %5252 = vperm.xlu0 %5643, %v10989_v27   ;;  %v4467_v13 = vmul.f32 %v9464_v29, %v4419_v57  ;;  %v4435_v20 = vrot.slane %v9671_v12, %v6182_v3  ;;  %v4468_v15 = vmul.f32 %v9471_v44, %v4423_v0  ;;  %v11029_v3 = vld [vmem:[#allocation64_spill] sm:$0xff]  ;;  %v9789_v44 = vpop.permute.xlu1 %4942  ;;  %v11030_v12 = vld [vmem:[#allocation18_spill] sm:$0xff] }
 0x290   : > { %v4500_v42 = vadd.f32 %v4499_v31, %v4465_v9  ;;  %5642 = vset.pattern.permute.xlu1 %v6021_v59  ;;  %v9782_v39 = vadd.f32 %v9757_v30, %v9595_v22  ;;  %v4469_v2 = vmul.f32 %v9482_v50, %v4427_v24  ;;  %v4470_v14 = vmul.f32 %v11028_v17, %v4431_v47  ;;  %v11033_v31 = vld [vmem:[#allocation60_spill] sm:$0xff] }
 0x291   : > { %v4493_v36 = vadd.f32 %v4492_v23, %v4466_v10  ;;  %5248 = vperm.xlu1 %5642, %v11027_v52   ;;  %v4471_v19 = vmul.f32 %v11030_v12, %v4435_v20  ;;  %v9794_v50 = vadd.f32 %v9730_v8, %v9651_v34  ;;  %v9804_v10 = vadd.f32 %v9757_v30, %v9667_v46  ;;  %v11034_v23 = vld [vmem:[#allocation61_spill] sm:$0xff] }
 0x292   : > { %v4501_v61 = vadd.f32 %v4500_v42, %v4467_v13  ;;  %v4571_v29 = vmax.f32 %v9782_v39, %v4568_v41  ;;  %v11032_v41 = vld [vmem:[#allocation72_spill] sm:$0xff]  ;;  %v6022_v20 = vmov 4  }
 0x293   : > { %v4494_v4 = vadd.f32 %v4493_v36, %v4468_v15  ;;  %5264 = vperm.xlu0 %5643, %v11029_v3   ;;  %v9807_v47 = vpop.permute.xlu1 %4950  ;;  %v9814_v15 = vpop.permute.xlu0 %4954  ;;  %v11035_v36 = vld [vmem:[#allocation71_spill] sm:$0xff] }
 0x294   : > { %v4502_v37 = vadd.f32 %v4501_v61, %v4469_v2  ;;  %v4572_v9 = vmax.f32 %v9794_v50, %v4571_v29 }
 0x295   : > { %v5848_v62 = vpop.eup %5847  ;;  %v4495_v18 = vadd.f32 %v4494_v4, %v4470_v14  ;;  %5256 = vperm.xlu1 %5642, %v11031_v40  }
 0x296   : > { %v5850_v51 = vpop.eup %5849  ;;  %v4513_v57 = vmul.f32 0.6931472, %v5848_v62  ;;  %v4503_v16 = vadd.f32 %v4502_v37, %v4471_v19  ;;  %v4573_v13 = vmax.f32 %v9804_v10, %v4572_v9  ;;  %v11036_v62 = vld [vmem:[#allocation56_spill] sm:$0xff] }
 0x297   : > { %v4515_v49 = vmul.f32 0.6931472, %v5850_v51  ;;  %5851 = vlog2.f32 %v4495_v18  ;;  %5272 = vperm.xlu0 %5643, %v11032_v41   ;;  %v9822_v29 = vpop.permute.xlu1 %4958 }
 0x298   : > { %v4532_v0 = vadd.f32 %v4513_v57, %v11033_v31  ;;  %5853 = vlog2.f32 %v4503_v16 }
 0x299   : > { %5260 = vperm.xlu1 %5642, %v11034_v23   ;;  %v4533_v42 = vadd.f32 %v4515_v49, %v10992_v43  ;;  %v9826_v43 = vpop.permute.xlu0 %4962 }
 0x29a   : > { %v9810_v24 = vadd.f32 %v9618_v6, %v4532_v0 }
 0x29b   : > { %5645 = vset.pattern.permute.xlu0 %v6022_v20  ;;  %v9820_v61 = vadd.f32 %v9623_v48, %v4533_v42  ;;  %v9834_v12 = vpop.permute.xlu1 %4966  ;;  %v9838_v19 = vadd.f32 %v9757_v30, %v4533_v42  ;;  %v11037_v30 = vld [vmem:[#allocation57_spill] sm:$0xff] }
 0x29c   : > { %5362 = vperm.xlu0 %5645, %v10989_v27   ;;  %v4574_v2 = vmax.f32 %v9810_v24, %v4573_v13  ;;  %v9830_v27 = vadd.f32 %v9730_v8, %v4532_v0 }
 0x29d   : > { %5268 = vperm.xlu1 %5642, %v11035_v36  }
 0x29e   : > { %v4575_v6 = vmax.f32 %v9820_v61, %v4574_v2  ;;  %v9841_v37 = vpop.permute.xlu0 %4970 }
 0x2a0   : > { %5374 = vperm.xlu0 %5645, %v11029_v3   ;;  %v4576_v48 = vmax.f32 %v9830_v27, %v4575_v6 }
 0x2a1   : > { %5644 = vset.pattern.permute.xlu1 %v6022_v20  ;;  %v9849_v16 = vpop.permute.xlu1 %4974 }
 0x2a2   : > { %5358 = vperm.xlu1 %5644, %v11027_v52   ;;  %v4577_v18 = vmax.f32 %v9838_v19, %v4576_v48 }
 0x2a4   : > { %v5852_v17 = vpop.eup %5851  ;;  %5382 = vperm.xlu0 %5645, %v11032_v41   ;;  %v11038_v41 = vld [vmem:[#allocation65_spill] sm:$0xff] }
 0x2a5   : > { %v5854_v14 = vpop.eup %5853  ;;  %v4525_v4 = vmul.f32 0.6931472, %v5852_v17 }
 0x2a6   : > { %v4527_v3 = vmul.f32 0.6931472, %v5854_v14  ;;  %5366 = vperm.xlu1 %5644, %v11031_v40  }
 0x2a7   : > { %v4538_v52 = vadd.f32 %v4525_v4, %v10996_v38 }
 0x2a8   : > { %v4539_v8 = vadd.f32 %v4527_v3, %v10999_v28  ;;  %5386 = vperm.xlu0 %5645, %v11036_v62   ;;  %v9855_v28 = vpop.permute.xlu0 %4978 }
 0x2a9   : > { %v4544_v51 = vadd.f32 %v4538_v52, %v9591_v55  ;;  %v9853_v9 = vadd.f32 %v4538_v52, %v9651_v34  ;;  %v9864_v31 = vadd.f32 %v4538_v52, %v4532_v0  ;;  %v11039_v0 = vld [vmem:[#allocation52_spill] sm:$0xff] }
 0x2aa   : > { %5370 = vperm.xlu1 %5644, %v11034_v23   ;;  %v4545_v40 = vadd.f32 %v4539_v8, %v9595_v22  ;;  %v9860_v55 = vadd.f32 %v4539_v8, %v9667_v46  ;;  %v9866_v23 = vpop.permute.xlu1 %4982  ;;  %v9870_v13 = vadd.f32 %v4539_v8, %v4533_v42 }
 0x2ab   : > { %v4578_v57 = vmax.f32 %v4544_v51, %v4577_v18 }
 0x2ac   : > { %5390 = vperm.xlu0 %5645, %v11037_v30   ;;  %v9873_v20 = vpop.permute.xlu0 %4986 }
 0x2ad   : > { %v4579_v38 = vmax.f32 %v4545_v40, %v4578_v57 }
 0x2ae   : > { %5378 = vperm.xlu1 %5644, %v11035_v36   ;;  %v11040_v36 = vld [vmem:[#allocation51_spill] sm:$0xff] }
 0x2af   : > { %v4580_v49 = vmax.f32 %v9853_v9, %v4579_v38  ;;  %v9879_v2 = vpop.permute.xlu1 %5028 }
 0x2b0   : > { %5394 = vperm.xlu0 %5645, %v11038_v41  }
 0x2b1   : > { %v4581_v22 = vmax.f32 %v9860_v55, %v4580_v49 }
 0x2b2   : > { %5646 = vset.pattern.permute.xlu1 %v6021_v59  ;;  %v5033_v59 = vpop.permute.xlu0 %5032 }
 0x2b3   : > { %v4582_v34 = vmax.f32 %v9864_v31, %v4581_v22  ;;  %5276 = vperm.xlu1 %5646, %v11036_v62  }
 0x2b4   : > { %5398 = vperm.xlu0 %5645, %v11019_v58   ;;  %v9887_v17 = vpop.permute.xlu1 %5036 }
 0x2b5   : > { %v9877_v46 = vmax.f32 %v9870_v13, %v4582_v34 }
 0x2b6   : > { %v9895_v4 = vpop.permute.xlu0 %5044 }
 0x2b7   : > { %5280 = vperm.xlu1 %5646, %v11037_v30   ;;  %v4585_v42 = vsub.f32 %v11039_v0, %v9877_v46  ;;  %v4584_v6 = vsub.f32 %v11040_v36, %v9877_v46  ;;  %v4586_v14 = vsub.f32 %v9750_v56, %v9877_v46  ;;  %v4587_v48 = vsub.f32 %v9782_v39, %v9877_v46 }
 0x2b8   : > { %5402 = vperm.xlu0 %5645, %v11014_v32   ;;  %v4588_v3 = vsub.f32 %v4544_v51, %v9877_v46  ;;  %v9898_v62 = vpop.permute.xlu1 %5040  ;;  %v4589_v56 = vsub.f32 %v4545_v40, %v9877_v46  ;;  %v4590_v51 = vsub.f32 %v9704_v26, %v9877_v46  ;;  %v4593_v34 = vsub.f32 %v9804_v10, %v9877_v46 }
 0x2b9   : > { %v4604_v52 = vmul.f32 1.442695, %v4585_v42  ;;  %v4602_v8 = vmul.f32 1.442695, %v4584_v6  ;;  %v4606_v18 = vmul.f32 1.442695, %v4586_v14  ;;  %v4596_v10 = vsub.f32 %v9810_v24, %v9877_v46 }
 0x2ba   : > { %v4608_v57 = vmul.f32 1.442695, %v4587_v48  ;;  %v4610_v30 = vmul.f32 1.442695, %v4588_v3  ;;  %v9903_v39 = vpop.permute.xlu0 %5052  ;;  %v4612_v49 = vmul.f32 1.442695, %v4589_v56 }
 0x2bb   : > { %5284 = vperm.xlu1 %5646, %v11038_v41   ;;  %5855 = vpow2.f32 %v4604_v52  ;;  %v4614_v40 = vmul.f32 1.442695, %v4590_v51  ;;  %v4592_v41 = vsub.f32 %v9794_v50, %v9877_v46  ;;  %v4595_v50 = vsub.f32 %v9860_v55, %v9877_v46  ;;  %v11041_v3 = vld [vmem:[#allocation54_spill] sm:$0xff] }
 0x2bc   : > { %5406 = vperm.xlu0 %5645, %v11022_v5   ;;  %5857 = vpow2.f32 %v4602_v8 }
 0x2bd   : > { %v9907_v38 = vpop.permute.xlu1 %5048  ;;  %5859 = vpow2.f32 %v4606_v18  ;;  %v4618_v0 = vmul.f32 1.442695, %v4592_v41  ;;  %v4624_v48 = vmul.f32 1.442695, %v4595_v50 }
 0x2be   : > { %5861 = vpow2.f32 %v4608_v57 }
 0x2bf   : > { %5288 = vperm.xlu1 %5646, %v11019_v58   ;;  %v4591_v58 = vsub.f32 %v9721_v60, %v9877_v46  ;;  %5863 = vpow2.f32 %v4610_v30  ;;  %v9918_v26 = vpop.permute.xlu0 %5060  ;;  %v4594_v60 = vsub.f32 %v9853_v9, %v9877_v46 }
 0x2c0   : > { %5410 = vperm.xlu0 %5645, %v11021_v21   ;;  %5865 = vpow2.f32 %v4612_v49 }
 0x2c1   : > { %v9915_v22 = vpop.permute.xlu1 %5056  ;;  %5867 = vpow2.f32 %v4614_v40  ;;  %v4622_v36 = vmul.f32 1.442695, %v4594_v60 }
 0x2c3   : > { %5292 = vperm.xlu1 %5646, %v11014_v32   ;;  %v4616_v32 = vmul.f32 1.442695, %v4591_v58  ;;  %v9933_v6 = vpop.permute.xlu0 %5068  ;;  %v4599_v58 = vsub.f32 %v9838_v19, %v9877_v46 }
 0x2c4   : > { %5414 = vperm.xlu0 %5645, %v11024_v45  }
 0x2c5   : > { %v9925_v42 = vpop.permute.xlu1 %5064  ;;  %5869 = vpow2.f32 %v4616_v32 }
 0x2c6   : > { %5871 = vpow2.f32 %v4618_v0 }
 0x2c7   : > { %5296 = vperm.xlu1 %5646, %v11022_v5   ;;  %v4620_v5 = vmul.f32 1.442695, %v4593_v34 }
 0x2c8   : > { %5418 = vperm.xlu0 %5645, %v11023_v53   ;;  %v9935_v9 = vpop.eup %5855  ;;  %v9966_v40 = vpop.permute.xlu0 %5076 }
 0x2c9   : > { %v9937_v14 = vpop.eup %5857  ;;  %v4990_v55 = vmul.f32 %v9935_v9, %v11041_v3  ;;  %v5100_v52 = vmul.f32 %v9935_v9, %v5033_v59  ;;  %v9945_v8 = vpop.permute.xlu1 %5072  ;;  %5873 = vpow2.f32 %v4620_v5 }
 0x2ca   : > { %v9947_v24 = vpop.eup %5859  ;;  %v4989_v18 = vmul.f32 %v9937_v14, %v9709_v54  ;;  %v5099_v56 = vmul.f32 %v9937_v14, %v9879_v2  ;;  %5875 = vpow2.f32 %v4622_v36  ;;  %v4632_v36 = vmul.f32 1.442695, %v4599_v58 }
 0x2cb   : > { %5300 = vperm.xlu1 %5646, %v11021_v21   ;;  %v4597_v21 = vsub.f32 %v9820_v61, %v9877_v46  ;;  %v9954_v57 = vpop.eup %5861  ;;  %v4626_v61 = vmul.f32 1.442695, %v4596_v10  ;;  %v4991_v51 = vmul.f32 %v9947_v24, %v9727_v33  ;;  %v5101_v49 = vmul.f32 %v9947_v24, %v9887_v17 }
 0x2cc   : > { %5422 = vperm.xlu0 %5645, %v11026_v11   ;;  %v9958_v59 = vpop.eup %5863  ;;  %v5007_v30 = vadd.f32 %v4990_v55, %v4989_v18  ;;  %v5117_v54 = vadd.f32 %v5100_v52, %v5099_v56  ;;  %5877 = vpow2.f32 %v4624_v48  ;;  %v4992_v41 = vmul.f32 %v9954_v57, %v9736_v25  ;;  %v5085_v55 = vpop.permute.xlu0 %5084 }
 0x2cd   : > { %v4628_v2 = vmul.f32 1.442695, %v4597_v21  ;;  %v5102_v33 = vmul.f32 %v9954_v57, %v9898_v62  ;;  %v9973_v34 = vpop.eup %5865  ;;  %v4600_v17 = vsub.f32 %v9864_v31, %v9877_v46  ;;  %v4993_v19 = vmul.f32 %v9958_v59, %v9761_v63 }
 0x2ce   : > { %v5118_v32 = vadd.f32 %v5117_v54, %v5101_v49  ;;  %5879 = vpow2.f32 %v4626_v61  ;;  %v5103_v25 = vmul.f32 %v9958_v59, %v9895_v4  ;;  %v9983_v5 = vpop.eup %5867  ;;  %v4601_v62 = vsub.f32 %v9870_v13, %v9877_v46 }
 0x2cf   : > { %5304 = vperm.xlu1 %5646, %v11024_v45   ;;  %v4598_v45 = vsub.f32 %v9830_v27, %v9877_v46  ;;  %v5008_v27 = vadd.f32 %v5007_v30, %v4991_v51  ;;  %v9979_v0 = vpop.permute.xlu1 %5080  ;;  %5881 = vpow2.f32 %v4628_v2  ;;  %v4994_v63 = vmul.f32 %v9973_v34, %v9773_v35 }
 0x2d0   : > { %5426 = vperm.xlu0 %5645, %v11025_v7   ;;  %v5119_v50 = vadd.f32 %v5118_v32, %v5102_v33  ;;  %v5104_v10 = vmul.f32 %v9973_v34, %v9907_v38  ;;  %v4634_v4 = vmul.f32 1.442695, %v4600_v17  ;;  %v4995_v13 = vmul.f32 %v9983_v5, %v9789_v44  ;;  %v5093_v2 = vpop.permute.xlu0 %5092 }
 0x2d1   : > { %v4630_v60 = vmul.f32 1.442695, %v4598_v45  ;;  %v4636_v35 = vmul.f32 1.442695, %v4601_v62 }
 0x2d2   : > { %v5120_v48 = vadd.f32 %v5119_v50, %v5103_v25  ;;  %v9992_v3 = vpop.eup %5869 }
 0x2d3   : > { %5308 = vperm.xlu1 %5646, %v11023_v53   ;;  %v5009_v53 = vadd.f32 %v5008_v27, %v4992_v41  ;;  %5883 = vpow2.f32 %v4630_v60  ;;  %v9998_v18 = vpop.eup %5871  ;;  %v4996_v61 = vmul.f32 %v9992_v3, %v9797_v1  ;;  %v5106_v45 = vmul.f32 %v9992_v3, %v9915_v22 }
 0x2d4   : > { %v5121_v52 = vadd.f32 %v5120_v48, %v5104_v10  ;;  %5885 = vpow2.f32 %v4632_v36  ;;  %v4997_v54 = vmul.f32 %v9998_v18, %v9807_v47 }
 0x2d5   : > { %v5010_v31 = vadd.f32 %v5009_v53, %v4993_v19  ;;  %v5089_v38 = vpop.permute.xlu1 %5088  ;;  %5887 = vpow2.f32 %v4634_v4 }
 0x2d6   : > { %v10005_v44 = vpop.eup %5873  ;;  %5889 = vpow2.f32 %v4636_v35 }
 0x2d7   : > { %5312 = vperm.xlu1 %5646, %v11026_v11   ;;  %v5011_v21 = vadd.f32 %v5010_v31, %v4994_v63  ;;  %v5105_v11 = vmul.f32 %v9983_v5, %v9903_v39  ;;  %v10007_v39 = vpop.eup %5875  ;;  %v4998_v22 = vmul.f32 %v10005_v44, %v9814_v15  ;;  %v5108_v27 = vmul.f32 %v10005_v44, %v9925_v42 }
 0x2d8   : > { %v4999_v47 = vmul.f32 %v10007_v39, %v9822_v29 }
 0x2d9   : > { %v5012_v56 = vadd.f32 %v5011_v21, %v4995_v13  ;;  %v5122_v30 = vadd.f32 %v5121_v52, %v5105_v11  ;;  %v10013_v1 = vpop.eup %5877  ;;  %v5097_v32 = vpop.permute.xlu1 %5096 }
 0x2da   : > { %v5000_v15 = vmul.f32 %v10013_v1, %v9826_v43  ;;  %v5110_v42 = vmul.f32 %v10013_v1, %v9945_v8 }
 0x2db   : > { %5316 = vperm.xlu1 %5646, %v11025_v7   ;;  %v5013_v51 = vadd.f32 %v5012_v56, %v4996_v61  ;;  %v5107_v7 = vmul.f32 %v9998_v18, %v9918_v26  ;;  %v5123_v49 = vadd.f32 %v5122_v30, %v5106_v45  ;;  %v5109_v26 = vmul.f32 %v10007_v39, %v9933_v6  ;;  %v10023_v19 = vpop.eup %5879 }
 0x2dc   : > { %v10025_v60 = vpop.eup %5881  ;;  %v5001_v6 = vmul.f32 %v10023_v19, %v9834_v12  ;;  %v5111_v36 = vmul.f32 %v10023_v19, %v9966_v40 }
 0x2dd   : > { %v5014_v58 = vadd.f32 %v5013_v51, %v4997_v54  ;;  %v5124_v41 = vadd.f32 %v5123_v49, %v5107_v7  ;;  %v5002_v63 = vmul.f32 %v10025_v60, %v9841_v37  ;;  %v5112_v8 = vmul.f32 %v10025_v60, %v9979_v0 }
 0x2df   : > { %v5015_v33 = vadd.f32 %v5014_v58, %v4998_v22  ;;  %v5125_v17 = vadd.f32 %v5124_v41, %v5108_v27 }
 0x2e0   : > { %v10031_v62 = vpop.eup %5883 }
 0x2e1   : > { %v5016_v53 = vadd.f32 %v5015_v33, %v4999_v47  ;;  %v5126_v25 = vadd.f32 %v5125_v17, %v5109_v26  ;;  %v10039_v43 = vpop.eup %5885  ;;  %v5003_v12 = vmul.f32 %v10031_v62, %v9849_v16  ;;  %v5113_v52 = vmul.f32 %v10031_v62, %v5085_v55 }
 0x2e2   : > { %v10046_v11 = vpop.eup %5887  ;;  %v5004_v56 = vmul.f32 %v10039_v43, %v9855_v28  ;;  %v5114_v0 = vmul.f32 %v10039_v43, %v5089_v38 }
 0x2e3   : > { %v5017_v29 = vadd.f32 %v5016_v53, %v5000_v15  ;;  %v5127_v31 = vadd.f32 %v5126_v25, %v5110_v42  ;;  %v10053_v45 = vpop.eup %5889  ;;  %v5005_v7 = vmul.f32 %v10046_v11, %v9866_v23  ;;  %v5115_v55 = vmul.f32 %v10046_v11, %v5093_v2 }
 0x2e4   : > { %v5006_v38 = vmul.f32 %v10053_v45, %v9873_v20  ;;  %v5116_v41 = vmul.f32 %v10053_v45, %v5097_v32 }
 0x2e5   : > { %v5139_v50 = vpop.permute.xlu0 %5138  ;;  %v5018_v48 = vadd.f32 %v5017_v29, %v5001_v6  ;;  %v5128_v4 = vadd.f32 %v5127_v31, %v5111_v36 }
 0x2e6   : > { %v5209_v35 = vmul.f32 %v9937_v14, %v5139_v50 }
 0x2e7   : > { %v5143_v10 = vpop.permute.xlu1 %5142  ;;  %v5019_v40 = vadd.f32 %v5018_v48, %v5002_v63  ;;  %v5129_v37 = vadd.f32 %v5128_v4, %v5112_v8 }
 0x2e8   : > { %v5210_v21 = vmul.f32 %v9935_v9, %v5143_v10 }
 0x2e9   : > { %v5151_v13 = vpop.permute.xlu0 %5150  ;;  %v5020_v30 = vadd.f32 %v5019_v40, %v5003_v12  ;;  %v5130_v51 = vadd.f32 %v5129_v37, %v5113_v52 }
 0x2ea   : > { %v5227_v16 = vadd.f32 %v5210_v21, %v5209_v35  ;;  %v5212_v28 = vmul.f32 %v9954_v57, %v5151_v13 }
 0x2eb   : > { %v5147_v61 = vpop.permute.xlu1 %5146  ;;  %v5021_v58 = vadd.f32 %v5020_v30, %v5004_v56  ;;  %v5131_v22 = vadd.f32 %v5130_v51, %v5114_v0 }
 0x2ec   : > { %v5211_v54 = vmul.f32 %v9947_v24, %v5147_v61 }
 0x2ed   : > { %v5159_v49 = vpop.permute.xlu0 %5158  ;;  %v5022_v47 = vadd.f32 %v5021_v58, %v5005_v7  ;;  %v5132_v26 = vadd.f32 %v5131_v22, %v5115_v55 }
 0x2ee   : > { %v5228_v27 = vadd.f32 %v5227_v16, %v5211_v54  ;;  %v5214_v42 = vmul.f32 %v9973_v34, %v5159_v49 }
 0x2ef   : > { %v5155_v33 = vpop.permute.xlu1 %5154  ;;  %v5023_v15 = vadd.f32 %v5022_v47, %v5006_v38  ;;  %v5133_v2 = vadd.f32 %v5132_v26, %v5116_v41 }
 0x2f0   : > { %v5213_v17 = vmul.f32 %v9958_v59, %v5155_v33  ;;  %v5229_v53 = vadd.f32 %v5228_v27, %v5212_v28 }
 0x2f1   : > { %v5167_v23 = vpop.permute.xlu0 %5166  ;;  %5891 = vlog2.f32 %v5023_v15 }
 0x2f2   : > { %v5230_v25 = vadd.f32 %v5229_v53, %v5213_v17  ;;  %5893 = vlog2.f32 %v5133_v2  ;;  %v5216_v32 = vmul.f32 %v9992_v3, %v5167_v23 }
 0x2f3   : > { %v5163_v50 = vpop.permute.xlu1 %5162 }
 0x2f4   : > { %v5215_v29 = vmul.f32 %v9983_v5, %v5163_v50  ;;  %v5231_v6 = vadd.f32 %v5230_v25, %v5214_v42 }
 0x2f5   : > { %v5175_v20 = vpop.permute.xlu0 %5174 }
 0x2f6   : > { %v5232_v36 = vadd.f32 %v5231_v6, %v5215_v29  ;;  %v5218_v8 = vmul.f32 %v10005_v44, %v5175_v20 }
 0x2f7   : > { %v5171_v31 = vpop.permute.xlu1 %5170 }
 0x2f8   : > { %v5217_v63 = vmul.f32 %v9998_v18, %v5171_v31  ;;  %v5233_v10 = vadd.f32 %v5232_v36, %v5216_v32 }
 0x2f9   : > { %v5183_v48 = vpop.permute.xlu0 %5182 }
 0x2fa   : > { %v5234_v4 = vadd.f32 %v5233_v10, %v5217_v63  ;;  %v5220_v52 = vmul.f32 %v10013_v1, %v5183_v48 }
 0x2fb   : > { %v5179_v21 = vpop.permute.xlu1 %5178 }
 0x2fc   : > { %v5219_v12 = vmul.f32 %v10007_v39, %v5179_v21  ;;  %v5235_v13 = vadd.f32 %v5234_v4, %v5218_v8 }
 0x2fd   : > { %v5191_v40 = vpop.permute.xlu0 %5190 }
 0x2fe   : > { %v5236_v37 = vadd.f32 %v5235_v13, %v5219_v12  ;;  %v5892_v61 = vpop.eup %5891  ;;  %v5222_v54 = vmul.f32 %v10025_v60, %v5191_v40 }
 0x2ff   : > { %v5187_v35 = vpop.permute.xlu1 %5186  ;;  %v5894_v51 = vpop.eup %5893  ;;  %v5025_v16 = vmul.f32 0.6931472, %v5892_v61 }
 0x300   : > { %v5221_v56 = vmul.f32 %v10023_v19, %v5187_v35  ;;  %v5237_v0 = vadd.f32 %v5236_v37, %v5220_v52  ;;  %v5135_v55 = vmul.f32 0.6931472, %v5894_v51 }
 0x301   : > { %v5199_v30 = vpop.permute.xlu0 %5198  ;;  %v5026_v58 = vadd.f32 %v5025_v16, %v9877_v46 }
 0x302   : > { %v5238_v7 = vadd.f32 %v5237_v0, %v5221_v56  ;;  %v5136_v27 = vadd.f32 %v5135_v55, %v9877_v46  ;;  %v5224_v41 = vmul.f32 %v10039_v43, %v5199_v30 }
 0x303   : > { %v5195_v49 = vpop.permute.xlu1 %5194  ;;  %5467 = vst [vmem:[%s10077_s11] sm:$0xff] %v5026_v58 }
 0x304   : > { %v5223_v22 = vmul.f32 %v10031_v62, %v5195_v49  ;;  %v5239_v28 = vadd.f32 %v5238_v7, %v5222_v54  ;;  %5468 = vst [vmem:[%s10077_s11 + $0x8] sm:$0xff] %v5136_v27 }
 0x305   : > { %v5207_v38 = vpop.permute.xlu0 %5206 }
 0x306   : > { %v5240_v33 = vadd.f32 %v5239_v28, %v5223_v22  ;;  %v5226_v53 = vmul.f32 %v10053_v45, %v5207_v38 }
 0x307   : > { %v5203_v47 = vpop.permute.xlu1 %5202 }
 0x308   : > { %v5225_v26 = vmul.f32 %v10046_v11, %v5203_v47  ;;  %v5241_v17 = vadd.f32 %v5240_v33, %v5224_v41 }
 0x30a   : > { %v5253_v23 = vpop.permute.xlu0 %5252  ;;  %v5242_v15 = vadd.f32 %v5241_v17, %v5225_v26 }
 0x30b   : > { %v5320_v47 = vmul.f32 %v9935_v9, %v5253_v23 }
 0x30c   : > { %v5243_v2 = vadd.f32 %v5242_v15, %v5226_v53  ;;  %v5249_v42 = vpop.permute.xlu1 %5248 }
 0x30d   : > { %v5319_v27 = vmul.f32 %v9937_v14, %v5249_v42 }
 0x30e   : > { %5895 = vlog2.f32 %v5243_v2  ;;  %v5265_v25 = vpop.permute.xlu0 %5264 }
 0x30f   : > { %v5337_v2 = vadd.f32 %v5320_v47, %v5319_v27 }
 0x310   : > { %v5257_v50 = vpop.permute.xlu1 %5256 }
 0x311   : > { %v5321_v26 = vmul.f32 %v9947_v24, %v5257_v50 }
 0x312   : > { %v10084_v29 = vpop.permute.xlu0 %5272 }
 0x314   : > { %v5261_v6 = vpop.permute.xlu1 %5260 }
 0x317   : > { %v5363_v20 = vpop.permute.xlu0 %5362 }
 0x318   : > { %v5269_v32 = vpop.permute.xlu1 %5268  ;;  %v5430_v12 = vmul.f32 %v9935_v9, %v5363_v20  ;;  %v5322_v20 = vmul.f32 %v9954_v57, %v5261_v6 }
 0x31b   : > { %v5896_v36 = vpop.eup %5895  ;;  %v5375_v31 = vpop.permute.xlu0 %5374 }
 0x31c   : > { %v5245_v63 = vmul.f32 0.6931472, %v5896_v36  ;;  %v5433_v61 = vmul.f32 %v9958_v59, %v5375_v31 }
 0x31d   : > { %v5359_v10 = vpop.permute.xlu1 %5358 }
 0x31e   : > { %v5246_v48 = vadd.f32 %v5245_v63, %v9877_v46  ;;  %v5429_v4 = vmul.f32 %v9937_v14, %v5359_v10  ;;  %v5338_v14 = vadd.f32 %v5337_v2, %v5321_v26 }
 0x31f   : > { %v5383_v8 = vpop.permute.xlu0 %5382 }
 0x320   : > { %5469 = vst [vmem:[%s10077_s11 + $0x10] sm:$0xff] %v5246_v48  ;;  %v5447_v52 = vadd.f32 %v5430_v12, %v5429_v4  ;;  %v5435_v55 = vmul.f32 %v9983_v5, %v5383_v8  ;;  %v5339_v48 = vadd.f32 %v5338_v14, %v5322_v20  ;;  %v5324_v4 = vmul.f32 %v9973_v34, %v5269_v32 }
 0x321   : > { %v5367_v21 = vpop.permute.xlu1 %5366 }
 0x322   : > { %v5431_v13 = vmul.f32 %v9947_v24, %v5367_v21  ;;  %v5323_v24 = vmul.f32 %v9958_v59, %v5265_v25 }
 0x323   : > { %v5387_v40 = vpop.permute.xlu0 %5386 }
 0x324   : > { %v5448_v35 = vadd.f32 %v5447_v52, %v5431_v13  ;;  %v5436_v58 = vmul.f32 %v9992_v3, %v5387_v40  ;;  %v5340_v21 = vadd.f32 %v5339_v48, %v5323_v24 }
 0x325   : > { %v5371_v37 = vpop.permute.xlu1 %5370 }
 0x326   : > { %v5432_v56 = vmul.f32 %v9954_v57, %v5371_v37  ;;  %v5341_v40 = vadd.f32 %v5340_v21, %v5324_v4 }
 0x327   : > { %v5391_v0 = vpop.permute.xlu0 %5390 }
 0x328   : > { %v5449_v30 = vadd.f32 %v5448_v35, %v5432_v56  ;;  %v5437_v41 = vmul.f32 %v9998_v18, %v5391_v0  ;;  %v5325_v35 = vmul.f32 %v9983_v5, %v10084_v29 }
 0x329   : > { %v5379_v51 = vpop.permute.xlu1 %5378 }
 0x32a   : > { %v5434_v16 = vmul.f32 %v9973_v34, %v5379_v51  ;;  %v5450_v54 = vadd.f32 %v5449_v30, %v5433_v61  ;;  %v5342_v0 = vadd.f32 %v5341_v40, %v5325_v35 }
 0x32b   : > { %v5395_v7 = vpop.permute.xlu0 %5394 }
 0x32c   : > { %v5451_v49 = vadd.f32 %v5450_v54, %v5434_v16  ;;  %v5438_v17 = vmul.f32 %v10005_v44, %v5395_v7 }
 0x32e   : > { %v5452_v22 = vadd.f32 %v5451_v49, %v5435_v55  ;;  %v5277_v28 = vpop.permute.xlu1 %5276 }
 0x32f   : > { %v5399_v38 = vpop.permute.xlu0 %5398  ;;  %v5326_v56 = vmul.f32 %v9992_v3, %v5277_v28 }
 0x330   : > { %v5453_v33 = vadd.f32 %v5452_v22, %v5436_v58  ;;  %v5439_v31 = vmul.f32 %v10007_v39, %v5399_v38 }
 0x331   : > { %v5343_v30 = vadd.f32 %v5342_v0, %v5326_v56 }
 0x332   : > { %v5454_v53 = vadd.f32 %v5453_v33, %v5437_v41  ;;  %v5281_v15 = vpop.permute.xlu1 %5280 }
 0x333   : > { %v5403_v36 = vpop.permute.xlu0 %5402  ;;  %v5327_v34 = vmul.f32 %v9998_v18, %v5281_v15 }
 0x334   : > { %v5455_v63 = vadd.f32 %v5454_v53, %v5438_v17  ;;  %v5440_v9 = vmul.f32 %v10013_v1, %v5403_v36 }
 0x335   : > { %v5344_v55 = vadd.f32 %v5343_v30, %v5327_v34 }
 0x336   : > { %v5456_v42 = vadd.f32 %v5455_v63, %v5439_v31  ;;  %v5285_v10 = vpop.permute.xlu1 %5284 }
 0x337   : > { %v5407_v8 = vpop.permute.xlu0 %5406  ;;  %v5328_v51 = vmul.f32 %v10005_v44, %v5285_v10 }
 0x338   : > { %v5457_v23 = vadd.f32 %v5456_v42, %v5440_v9  ;;  %v5441_v57 = vmul.f32 %v10023_v19, %v5407_v8 }
 0x339   : > { %v5345_v49 = vadd.f32 %v5344_v55, %v5328_v51 }
 0x33a   : > { %v5289_v50 = vpop.permute.xlu1 %5288  ;;  %v5458_v6 = vadd.f32 %v5457_v23, %v5441_v57 }
 0x33b   : > { %v5411_v12 = vpop.permute.xlu0 %5410  ;;  %v5329_v5 = vmul.f32 %v10007_v39, %v5289_v50 }
 0x33c   : > { %v5442_v37 = vmul.f32 %v10025_v60, %v5411_v12 }
 0x33d   : > { %v5346_v28 = vadd.f32 %v5345_v49, %v5329_v5 }
 0x33e   : > { %v5293_v13 = vpop.permute.xlu1 %5292  ;;  %v5459_v59 = vadd.f32 %v5458_v6, %v5442_v37 }
 0x33f   : > { %v5415_v52 = vpop.permute.xlu0 %5414  ;;  %v5330_v58 = vmul.f32 %v10013_v1, %v5293_v13 }
 0x340   : > { %v5443_v61 = vmul.f32 %v10031_v62, %v5415_v52 }
 0x341   : > { %v5347_v33 = vadd.f32 %v5346_v28, %v5330_v58 }
 0x342   : > { %v5297_v25 = vpop.permute.xlu1 %5296  ;;  %v5460_v16 = vadd.f32 %v5459_v59, %v5443_v61 }
 0x343   : > { %v5419_v32 = vpop.permute.xlu0 %5418  ;;  %v5331_v27 = vmul.f32 %v10023_v19, %v5297_v25 }
 0x344   : > { %v5444_v54 = vmul.f32 %v10039_v43, %v5419_v32 }
 0x345   : > { %v5348_v17 = vadd.f32 %v5347_v33, %v5331_v27 }
 0x346   : > { %v5301_v7 = vpop.permute.xlu1 %5300  ;;  %v5461_v18 = vadd.f32 %v5460_v16, %v5444_v54 }
 0x347   : > { %v5423_v29 = vpop.permute.xlu0 %5422  ;;  %v5332_v47 = vmul.f32 %v10025_v60, %v5301_v7 }
 0x348   : > { %v5445_v3 = vmul.f32 %v10046_v11, %v5423_v29 }
 0x349   : > { %v5349_v1 = vadd.f32 %v5348_v17, %v5332_v47 }
 0x34a   : > { %v5305_v22 = vpop.permute.xlu1 %5304  ;;  %v5462_v44 = vadd.f32 %v5461_v18, %v5445_v3 }
 0x34b   : > { %v5427_v38 = vpop.permute.xlu0 %5426  ;;  %v5333_v53 = vmul.f32 %v10031_v62, %v5305_v22 }
 0x34c   : > { %v5446_v41 = vmul.f32 %v10053_v45, %v5427_v38 }
 0x34d   : > { %v5350_v2 = vadd.f32 %v5349_v1, %v5333_v53 }
 0x34e   : > { %v5463_v26 = vadd.f32 %v5462_v44, %v5446_v41  ;;  %v5309_v39 = vpop.permute.xlu1 %5308 }
 0x34f   : > { %v5334_v15 = vmul.f32 %v10039_v43, %v5309_v39 }
 0x350   : > { %5897 = vlog2.f32 %v5463_v26 }
 0x351   : > { %v5351_v36 = vadd.f32 %v5350_v2, %v5334_v15 }
 0x352   : > { %v5313_v19 = vpop.permute.xlu1 %5312 }
 0x353   : > { %v5335_v20 = vmul.f32 %v10046_v11, %v5313_v19 }
 0x355   : > { %v5352_v60 = vadd.f32 %v5351_v36, %v5335_v20 }
 0x356   : > { %v5317_v31 = vpop.permute.xlu1 %5316 }
 0x357   : > { %v5336_v63 = vmul.f32 %v10053_v45, %v5317_v31 }
 0x359   : > { %v5353_v14 = vadd.f32 %v5352_v60, %v5336_v63 }
 0x35b   : > { %5899 = vlog2.f32 %v5353_v14 }
 0x35d   : > { %v5898_v62 = vpop.eup %5897 }
 0x35e   : > { %v5465_v42 = vmul.f32 0.6931472, %v5898_v62 }
 0x360   : > { %v5466_v10 = vadd.f32 %v5465_v42, %v9877_v46 }
 0x362   : > { %5471 = vst [vmem:[%s10077_s11 + $0x20] sm:$0xff] %v5466_v10 }
 0x368   : > { %v5900_v43 = vpop.eup %5899 }
 0x369   : > { %v5355_v11 = vmul.f32 0.6931472, %v5900_v43 }
 0x36b   : > { %v5356_v45 = vadd.f32 %v5355_v11, %v9877_v46 }
 0x36d   : > { %5470 = vst [vmem:[%s10077_s11 + $0x18] sm:$0xff] %v5356_v45 }
 0x36e   : > { %5960 = shalt.err (!%p5957_p10)
}
 0x36f   : > { %s5961_s9 = scalar_lea.hbm %s10134_s22, 640  ;;  %s5965_s11 = scalar_lea.hbm %s10186_s7, 1280 }
 0x370   : > { %p5962_p1 = scmp.ne.s32.totalorder %s10134_s22, %s5961_s9  ;;  %p5966_p0 = scmp.lt.s32.totalorder %s10134_s22, %s10186_s7 }
 0x371   : > { %p5967_p2 = scmp.lt.s32.totalorder %s5965_s11, %s5961_s9 }
 0x372   : > { %p5963_p3 = pnand %p5962_p1, %p11042_p12 }
 0x373   : > { %p5968_p6 = por %p5967_p2, %p5966_p0 }
 0x374   : > { %p5964_p9 = pneg %p5963_p3 }
 0x376   : > { %p5969_p11 = pnand %p5968_p6, %p5964_p9 }
 0x378   : > { %5972 = shalt.err (!%p5969_p11)
}
 0x379   : > { %s6024_s20 = smov 128   ;;  %s6025_s29 = smov 256  }
 0x37a   : > { %s6026_s28 = smov 8  }
 0x37b   : > { %5580 = dma.vmem_to_hbm [thread:$0]  (%p11042_p12), %s10129_s18, 640, %s10134_s22, %s5473_s23, %s6024_s20, %s6025_s29, %s6026_s28  }
 0x37c PF: > { %s5500_s12 = sand.u32 1, %s5999_s24   ;;  %p11043_p13 = scmp.ne.s32.totalorder %s10396_s14, 0 }
 0x37d   : > { %p11044_p4 = scmp.ge.s32.totalorder %s6011_s27, 2  ;;  %s5501_s21 = scalar_lea.sflag [#allocation4], %s5500_s12 }
 0x37f   : > { %p5587_p5 = pnand %p11044_p4, %p11043_p13 }
 0x381   : > { %p5588_p7 = pneg %p5587_p5 }
 0x383   : > { %5994 = dma.done.wait (%p5588_p7), %s5501_s21, 640  }
 0x384   : > { %5996 = vsyncadd (%p5588_p7), %s5501_s21, 4294966656  ;;  %p20_p8 = scmp.ge.s32.totalorder %s6092_s30, 4   ;;  %s11045_s24 = smov %s6003_s25 }
 0x385   : > { %s11046_s25 = smov %s6007_s26  ;;  %s11047_s26 = smov %s6104_s10 }
 0x386   : > { %s11048_s27 = smov %s6092_s30  ;;  %22 = sbr.rel (!%p20_p8) target bundleno = 5 (0x5), region = 93 }
 0x38b   :  { %5506 = vsyncpa [#allocation3], 1 }
 0x38c   :  { %5508 = vsyncpa [#allocation3 + $0x1], 1 }
 0x38d   :  { %5509 = vsyncpa [#allocation4], 1 }
 0x38e   :  { %5511 = vsyncpa [#allocation4 + $0x1], 1 }

</bundles_post_ra>
